<compile_context>
chip_gen: v5e
topology: v5e:2x2
jax: 0.10.0
libtpu: 0.0.40
codegen_flags: <defaults>
</compile_context>

<pallas_src>
import functools

import jax
import jax.numpy as jnp
from jax.experimental import pallas as pl
from jax.experimental.pallas import tpu as pltpu


def _attention_kernel(x_ref, mask_ref, w1_ref, b1_ref, w2_ref, b2_ref,
                      o_ref, o_acc_ref, *, heads, dim, tw, n):
    """One grid step: full window attention for TW (batch*window) slices."""
    dh = dim // heads
    rows = tw * n

    # ---- linear1 for all TW windows at once: (TW*N, D) @ (D, 3D) on the MXU ----
    x2d = x_ref[...].reshape(rows, dim).astype(jnp.bfloat16)
    qkv = jnp.dot(x2d, w1_ref[...], preferred_element_type=jnp.float32)
    qkv = qkv + b1_ref[...]                 # f32; scale already folded into Q cols

    q = qkv[:, :dim]                        # column layout matches torch reshape:
    k = qkv[:, dim:2 * dim]                 # index = qkv_idx*H*Dh + h*Dh + d
    v = qkv[:, 2 * dim:3 * dim]

    mask = mask_ref[...]                    # (TW, N, N) f32, mask[w] for window w

    # ---- per-head attention, batched over the TW windows of this block ----
    for h in range(heads):
        cols = slice(h * dh, (h + 1) * dh)
        qh = q[:, cols].reshape(tw, n, dh).astype(jnp.bfloat16)
        kh = k[:, cols].reshape(tw, n, dh).astype(jnp.bfloat16)
        vh = v[:, cols].reshape(tw, n, dh).astype(jnp.bfloat16)

        s = jnp.einsum("wqc,wkc->wqk", qh, kh,
                       preferred_element_type=jnp.float32)        # (TW, N, N)
        s = s + mask
        s = s - jnp.max(s, axis=-1, keepdims=True)
        p = jnp.exp(s)
        p = p * pl.reciprocal(jnp.sum(p, axis=-1, keepdims=True), approx=True)

        oh = jnp.einsum("wqk,wkc->wqc", p.astype(jnp.bfloat16), vh,
                        preferred_element_type=jnp.float32)       # (TW, N, Dh)
        # torch transpose(1,2)+reshape == heads concatenated along features:
        # write this head's output directly into the accumulator columns.
        o_acc_ref[:, cols] = oh.reshape(rows, dh)

    # ---- linear2 on the whole (TW*N, D) slab; one lane-dense block store ----
    o = o_acc_ref[...].astype(jnp.bfloat16)
    out = jnp.dot(o, w2_ref[...], preferred_element_type=jnp.float32) + b2_ref[...]
    o_ref[...] = out.reshape(tw, n, dim).astype(o_ref.dtype)


def _pick_tw(bw, nw, n, d):
    """Choose how many windows TW to process per grid step.

    Constraints: TW | BW and (TW % nw == 0 or nw % TW == 0) so each step's masks
    are one contiguous block.  Aim for TW*N >= 128-256 matmul rows while keeping
    some grid depth for pipelining / megacore, and stay well inside the 32 MiB
    default scoped-VMEM limit (safe on v7x's 64 MiB physical VMEM too).
    """
    cands = [t for t in range(1, bw + 1)
             if bw % t == 0 and (t % nw == 0 or nw % t == 0)]

    def vmem_bytes(t):
        rows = t * n
        x_out = 2 * 2 * rows * d * 4            # double-buffered x + out blocks
        qkv = rows * 3 * d * 4
        scores = 2 * t * n * n * 4              # scores + probs
        m = max(t, nw) * n * n * 4
        acc = rows * d * 4
        return x_out + qkv + scores + m + acc

    cands = [t for t in cands if vmem_bytes(t) <= 24 * 1024 * 1024]
    if not cands:
        return 1
    for rows_min, grid_min in ((256, 4), (128, 2), (0, 1)):
        ok = [t for t in cands if t * n >= rows_min and bw // t >= grid_min]
        if ok:
            return min(ok)
    return cands[-1]


def earth_attention_no_bias(x, mask, w1, b1, w2, b2, *, heads):
    """x: (BW, N, D), mask: (NW, N, N), w1: (D, 3D), b1: (3D,), w2: (D, D), b2: (D,)."""
    bw, n, d = x.shape
    nw = mask.shape[0]
    assert bw % nw == 0
    assert d % heads == 0
    dh = d // heads
    scale = dh ** (-0.5)

    tw = _pick_tw(bw, nw, n, d)

    # Fold the attention scale into the Q third of linear1 (parameter transform),
    # then cast MXU weight operands to bf16 (biases stay f32, added post-matmul).
    col_scale = jnp.concatenate(
        [jnp.full((d,), scale, dtype=jnp.float32),
         jnp.ones((2 * d,), dtype=jnp.float32)])
    w1_bf = (w1.astype(jnp.float32) * col_scale[None, :]).astype(jnp.bfloat16)
    w2_bf = w2.astype(jnp.bfloat16)
    b1_2d = (b1.astype(jnp.float32) * col_scale).reshape(1, 3 * d)
    b2_2d = b2.astype(jnp.float32).reshape(1, d)

    # Mask for global window g is mask[g % nw].  With the divisibility constraint
    # on TW, each grid step needs a contiguous block of TW masks.
    if tw >= nw:
        mask_arr = mask if tw == nw else jnp.tile(mask, (tw // nw, 1, 1))
        mask_spec = pl.BlockSpec((tw, n, n), lambda i: (0, 0, 0))       # resident
    else:
        nblk = nw // tw
        mask_arr = mask
        mask_spec = pl.BlockSpec((tw, n, n), lambda i: (i % nblk, 0, 0))
    mask_arr = mask_arr.astype(jnp.float32)

    kernel = functools.partial(_attention_kernel, heads=heads, dim=d, tw=tw, n=n)

    grid_spec = pltpu.PrefetchScalarGridSpec(
        num_scalar_prefetch=0,
        grid=(bw // tw,),
        in_specs=[
            pl.BlockSpec((tw, n, d), lambda i: (i, 0, 0)),     # x block (TW windows)
            mask_spec,                                         # (TW, N, N) masks
            pl.BlockSpec((d, 3 * d), lambda i: (0, 0)),        # w1 (bf16, resident)
            pl.BlockSpec((1, 3 * d), lambda i: (0, 0)),        # b1 (f32)
            pl.BlockSpec((d, d), lambda i: (0, 0)),            # w2 (bf16, resident)
            pl.BlockSpec((1, d), lambda i: (0, 0)),            # b2 (f32)
        ],
        out_specs=pl.BlockSpec((tw, n, d), lambda i: (i, 0, 0)),
        scratch_shapes=[pltpu.VMEM((tw * n, d), jnp.float32)],
    )

    return pl.pallas_call(
        kernel,
        out_shape=jax.ShapeDtypeStruct((bw, n, d), x.dtype),
        grid_spec=grid_spec,
        compiler_params=pltpu.CompilerParams(dimension_semantics=("parallel",)),
    )(x, mask_arr, w1_bf, b1_2d, w2_bf, b2_2d)


def earth_attention_reference(x, mask, w1, b1, w2, b2, *, heads):
    """Pure-JAX f32 reference mirroring the PyTorch forward (dropout = identity)."""
    bw, n, d = x.shape
    nw = mask.shape[0]
    dh = d // heads
    scale = dh ** (-0.5)

    qkv = x @ w1 + b1                                               # (BW, N, 3D)
    qkv = qkv.reshape(bw, n, 3, heads, dh)
    qkv = jnp.transpose(qkv, (2, 0, 3, 1, 4))                       # (3, BW, H, N, Dh)
    q, k, v = qkv[0], qkv[1], qkv[2]
    q = q * scale
    attn = jnp.einsum("bhnd,bhmd->bhnm", q, k)                      # (BW, H, N, N)
    attn = attn.reshape(bw // nw, nw, heads, n, n) + mask[None, :, None, :, :]
    attn = attn.reshape(bw, heads, n, n)
    attn = jax.nn.softmax(attn, axis=-1)
    out = jnp.einsum("bhnm,bhmd->bhnd", attn, v)                    # (BW, H, N, Dh)
    out = jnp.transpose(out, (0, 2, 1, 3)).reshape(bw, n, d)
    out = out @ w2 + b2
    return out


if __name__ == "__main__":
    # Module config: dim=32, heads=4, window_size=(2,4,4) -> N = 32 patches per window.
    dim = 32
    heads = 4
    n_patch = 2 * 4 * 4          # total_window_size
    n_windows = 4
    n_batch = 2
    bw = n_batch * n_windows

    key = jax.random.PRNGKey(0)
    kx, km, kw1, kb1, kw2, kb2 = jax.random.split(key, 6)

    x = jax.random.normal(kx, (bw, n_patch, dim), dtype=jnp.float32)
    # Synthetic mask: some entries 0, some -100 (mimics shifted-window masking).
    mask = jnp.where(
        jax.random.uniform(km, (n_windows, n_patch, n_patch)) > 0.8, -100.0, 0.0
    ).astype(jnp.float32)

    # Parameters stored already transposed vs. torch weights:
    # w1 = linear1.weight.T, w2 = linear2.weight.T.
    w1 = 0.05 * jax.random.normal(kw1, (dim, 3 * dim), dtype=jnp.float32)
    b1 = 0.05 * jax.random.normal(kb1, (3 * dim,), dtype=jnp.float32)
    w2 = 0.05 * jax.random.normal(kw2, (dim, dim), dtype=jnp.float32)
    b2 = 0.05 * jax.random.normal(kb2, (dim,), dtype=jnp.float32)

    out = earth_attention_no_bias(x, mask, w1, b1, w2, b2, heads=heads)
    out = jax.block_until_ready(out)

    ref = earth_attention_reference(x, mask, w1, b1, w2, b2, heads=heads)
    ref = jax.block_until_ready(ref)

    assert out.shape == (bw, n_patch, dim)
    # bf16 MXU operands + approx reciprocal -> looser tolerance than pure-f32.
    assert jnp.allclose(out, ref, atol=3e-2, rtol=3e-2), (
        "Pallas output mismatch vs reference; max abs diff = "
        f"{float(jnp.max(jnp.abs(out - ref)))}"
    )
    print("KERNEL_OK")
</pallas_src>

<mosaic_0001>
module attributes {stable_mosaic.version = 11 : i64} {
  func.func @_attention_kernel(%arg0: i32, %arg1: memref<4x32x32xf32, #tpu.memory_space<vmem>>, %arg2: memref<4x32x32xf32, #tpu.memory_space<vmem>>, %arg3: memref<32x96xbf16, #tpu.memory_space<vmem>>, %arg4: memref<1x96xf32, #tpu.memory_space<vmem>>, %arg5: memref<32x32xbf16, #tpu.memory_space<vmem>>, %arg6: memref<1x32xf32, #tpu.memory_space<vmem>>, %arg7: memref<4x32x32xf32, #tpu.memory_space<vmem>>, %arg8: memref<128x32xf32, #tpu.memory_space<vmem>>) attributes {dimension_semantics = [#tpu.dimension_semantics<parallel>], iteration_bounds = array<i64: 2>, scalar_prefetch = 0 : i64, scratch_operands = 1 : i64, tpu.core_type = #tpu.core_type<tc>, window_params = [{transform_indices = @transform_0, window_bounds = array<i64: 4, 32, 32>}, {pipeline_mode = #tpu.pipeline_mode<synchronous>, transform_indices = @transform_1, window_bounds = array<i64: 4, 32, 32>}, {pipeline_mode = #tpu.pipeline_mode<synchronous>, transform_indices = @transform_2, window_bounds = array<i64: 32, 96>}, {pipeline_mode = #tpu.pipeline_mode<synchronous>, transform_indices = @transform_3, window_bounds = array<i64: 1, 96>}, {pipeline_mode = #tpu.pipeline_mode<synchronous>, transform_indices = @transform_4, window_bounds = array<i64: 32, 32>}, {pipeline_mode = #tpu.pipeline_mode<synchronous>, transform_indices = @transform_5, window_bounds = array<i64: 1, 32>}, {transform_indices = @transform_6, window_bounds = array<i64: 4, 32, 32>}]} {
    %c0 = arith.constant 0 : index
    %c0_0 = arith.constant 0 : index
    %c0_1 = arith.constant 0 : index
    %0 = vector.load %arg1[%c0, %c0_0, %c0_1] : memref<4x32x32xf32, #tpu.memory_space<vmem>>, vector<4x32x32xf32>
    %1 = vector.shape_cast %0 : vector<4x32x32xf32> to vector<128x32xf32>
    %2 = arith.truncf %1 : vector<128x32xf32> to vector<128x32xbf16>
    %c0_2 = arith.constant 0 : index
    %c0_3 = arith.constant 0 : index
    %3 = vector.load %arg3[%c0_2, %c0_3] : memref<32x96xbf16, #tpu.memory_space<vmem>>, vector<32x96xbf16>
    %cst = arith.constant dense<0.000000e+00> : vector<128x96xf32>
    %4 = tpu.matmul %2, %3, %cst {dimension_numbers = #tpu.dot_dimension_numbers<[1], [0], [0], [1], [0, 0, 1, 1], [], []>} : vector<128x32xbf16>, vector<32x96xbf16>, vector<128x96xf32> -> vector<128x96xf32>
    %c0_4 = arith.constant 0 : index
    %c0_5 = arith.constant 0 : index
    %5 = vector.load %arg4[%c0_4, %c0_5] : memref<1x96xf32, #tpu.memory_space<vmem>>, vector<1x96xf32>
    %6 = vector.broadcast %5 : vector<1x96xf32> to vector<128x96xf32>
    %7 = arith.addf %4, %6 : vector<128x96xf32>
    %8 = vector.extract_strided_slice %7 {offsets = [0, 0], sizes = [128, 32], strides = [1, 1]} : vector<128x96xf32> to vector<128x32xf32>
    %9 = vector.extract_strided_slice %7 {offsets = [0, 32], sizes = [128, 32], strides = [1, 1]} : vector<128x96xf32> to vector<128x32xf32>
    %10 = vector.extract_strided_slice %7 {offsets = [0, 64], sizes = [128, 32], strides = [1, 1]} : vector<128x96xf32> to vector<128x32xf32>
    %c0_6 = arith.constant 0 : index
    %c0_7 = arith.constant 0 : index
    %c0_8 = arith.constant 0 : index
    %11 = vector.load %arg2[%c0_6, %c0_7, %c0_8] : memref<4x32x32xf32, #tpu.memory_space<vmem>>, vector<4x32x32xf32>
    %12 = vector.extract_strided_slice %8 {offsets = [0, 0], sizes = [128, 8], strides = [1, 1]} : vector<128x32xf32> to vector<128x8xf32>
    %13 = vector.shape_cast %12 : vector<128x8xf32> to vector<4x32x8xf32>
    %14 = arith.truncf %13 : vector<4x32x8xf32> to vector<4x32x8xbf16>
    %15 = vector.extract_strided_slice %9 {offsets = [0, 0], sizes = [128, 8], strides = [1, 1]} : vector<128x32xf32> to vector<128x8xf32>
    %16 = vector.shape_cast %15 : vector<128x8xf32> to vector<4x32x8xf32>
    %17 = arith.truncf %16 : vector<4x32x8xf32> to vector<4x32x8xbf16>
    %18 = vector.extract_strided_slice %10 {offsets = [0, 0], sizes = [128, 8], strides = [1, 1]} : vector<128x32xf32> to vector<128x8xf32>
    %19 = vector.shape_cast %18 : vector<128x8xf32> to vector<4x32x8xf32>
    %20 = arith.truncf %19 : vector<4x32x8xf32> to vector<4x32x8xbf16>
    "tpu.trace_start"() <{level = 10 : i32, message = "wqc,wkc->wqk"}> : () -> ()
    %cst_9 = arith.constant dense<0.000000e+00> : vector<4x32x32xf32>
    %21 = tpu.matmul %14, %17, %cst_9 {dimension_numbers = #tpu.dot_dimension_numbers<[2], [2], [1], [1], [0, 0, 0, 1, 1, 1], [0], [0]>} : vector<4x32x8xbf16>, vector<4x32x8xbf16>, vector<4x32x32xf32> -> vector<4x32x32xf32>
    "tpu.trace_stop"() : () -> ()
    %22 = arith.addf %21, %11 : vector<4x32x32xf32>
    %cst_10 = arith.constant dense<0xFF800000> : vector<4x32xf32>
    %23 = vector.multi_reduction <maximumf>, %22, %cst_10 [2] : vector<4x32x32xf32> to vector<4x32xf32>
    %24 = vector.shape_cast %23 : vector<4x32xf32> to vector<4x32x1xf32>
    %25 = vector.broadcast %24 : vector<4x32x1xf32> to vector<4x32x32xf32>
    %26 = arith.subf %22, %25 : vector<4x32x32xf32>
    %27 = math.exp %26 : vector<4x32x32xf32>
    %cst_11 = arith.constant dense<0.000000e+00> : vector<4x32xf32>
    %28 = vector.multi_reduction <add>, %27, %cst_11 [2] : vector<4x32x32xf32> to vector<4x32xf32>
    %29 = vector.shape_cast %28 : vector<4x32xf32> to vector<4x32x1xf32>
    %30 = tpu.reciprocal %29 {approx = true} : vector<4x32x1xf32> -> vector<4x32x1xf32>
    %31 = vector.broadcast %30 : vector<4x32x1xf32> to vector<4x32x32xf32>
    %32 = arith.mulf %27, %31 : vector<4x32x32xf32>
    %33 = arith.truncf %32 : vector<4x32x32xf32> to vector<4x32x32xbf16>
    "tpu.trace_start"() <{level = 10 : i32, message = "wqk,wkc->wqc"}> : () -> ()
    %cst_12 = arith.constant dense<0.000000e+00> : vector<4x32x8xf32>
    %34 = tpu.matmul %33, %20, %cst_12 {dimension_numbers = #tpu.dot_dimension_numbers<[2], [1], [1], [2], [0, 0, 0, 1, 1, 2], [0], [0]>} : vector<4x32x32xbf16>, vector<4x32x8xbf16>, vector<4x32x8xf32> -> vector<4x32x8xf32>
    "tpu.trace_stop"() : () -> ()
    %35 = vector.shape_cast %34 : vector<4x32x8xf32> to vector<128x8xf32>
    %c0_13 = arith.constant 0 : index
    %c0_14 = arith.constant 0 : index
    %36 = vector.load %arg8[%c0_13, %c0_14] : memref<128x32xf32, #tpu.memory_space<vmem>>, vector<128x8xf32>
    tpu.vector_store %arg8[%c0_13, %c0_14], %35 {strides = array<i32>} : memref<128x32xf32, #tpu.memory_space<vmem>>, vector<128x8xf32>,
    %37 = vector.extract_strided_slice %8 {offsets = [0, 8], sizes = [128, 8], strides = [1, 1]} : vector<128x32xf32> to vector<128x8xf32>
    %38 = vector.shape_cast %37 : vector<128x8xf32> to vector<4x32x8xf32>
    %39 = arith.truncf %38 : vector<4x32x8xf32> to vector<4x32x8xbf16>
    %40 = vector.extract_strided_slice %9 {offsets = [0, 8], sizes = [128, 8], strides = [1, 1]} : vector<128x32xf32> to vector<128x8xf32>
    %41 = vector.shape_cast %40 : vector<128x8xf32> to vector<4x32x8xf32>
    %42 = arith.truncf %41 : vector<4x32x8xf32> to vector<4x32x8xbf16>
    %43 = vector.extract_strided_slice %10 {offsets = [0, 8], sizes = [128, 8], strides = [1, 1]} : vector<128x32xf32> to vector<128x8xf32>
    %44 = vector.shape_cast %43 : vector<128x8xf32> to vector<4x32x8xf32>
    %45 = arith.truncf %44 : vector<4x32x8xf32> to vector<4x32x8xbf16>
    "tpu.trace_start"() <{level = 10 : i32, message = "wqc,wkc->wqk"}> : () -> ()
    %cst_15 = arith.constant dense<0.000000e+00> : vector<4x32x32xf32>
    %46 = tpu.matmul %39, %42, %cst_15 {dimension_numbers = #tpu.dot_dimension_numbers<[2], [2], [1], [1], [0, 0, 0, 1, 1, 1], [0], [0]>} : vector<4x32x8xbf16>, vector<4x32x8xbf16>, vector<4x32x32xf32> -> vector<4x32x32xf32>
    "tpu.trace_stop"() : () -> ()
    %47 = arith.addf %46, %11 : vector<4x32x32xf32>
    %cst_16 = arith.constant dense<0xFF800000> : vector<4x32xf32>
    %48 = vector.multi_reduction <maximumf>, %47, %cst_16 [2] : vector<4x32x32xf32> to vector<4x32xf32>
    %49 = vector.shape_cast %48 : vector<4x32xf32> to vector<4x32x1xf32>
    %50 = vector.broadcast %49 : vector<4x32x1xf32> to vector<4x32x32xf32>
    %51 = arith.subf %47, %50 : vector<4x32x32xf32>
    %52 = math.exp %51 : vector<4x32x32xf32>
    %cst_17 = arith.constant dense<0.000000e+00> : vector<4x32xf32>
    %53 = vector.multi_reduction <add>, %52, %cst_17 [2] : vector<4x32x32xf32> to vector<4x32xf32>
    %54 = vector.shape_cast %53 : vector<4x32xf32> to vector<4x32x1xf32>
    %55 = tpu.reciprocal %54 {approx = true} : vector<4x32x1xf32> -> vector<4x32x1xf32>
    %56 = vector.broadcast %55 : vector<4x32x1xf32> to vector<4x32x32xf32>
    %57 = arith.mulf %52, %56 : vector<4x32x32xf32>
    %58 = arith.truncf %57 : vector<4x32x32xf32> to vector<4x32x32xbf16>
    "tpu.trace_start"() <{level = 10 : i32, message = "wqk,wkc->wqc"}> : () -> ()
    %cst_18 = arith.constant dense<0.000000e+00> : vector<4x32x8xf32>
    %59 = tpu.matmul %58, %45, %cst_18 {dimension_numbers = #tpu.dot_dimension_numbers<[2], [1], [1], [2], [0, 0, 0, 1, 1, 2], [0], [0]>} : vector<4x32x32xbf16>, vector<4x32x8xbf16>, vector<4x32x8xf32> -> vector<4x32x8xf32>
    "tpu.trace_stop"() : () -> ()
    %60 = vector.shape_cast %59 : vector<4x32x8xf32> to vector<128x8xf32>
    %c0_19 = arith.constant 0 : index
    %c8 = arith.constant 8 : index
    %61 = vector.load %arg8[%c0_19, %c8] : memref<128x32xf32, #tpu.memory_space<vmem>>, vector<128x8xf32>
    tpu.vector_store %arg8[%c0_19, %c8], %60 {strides = array<i32>} : memref<128x32xf32, #tpu.memory_space<vmem>>, vector<128x8xf32>,
    %62 = vector.extract_strided_slice %8 {offsets = [0, 16], sizes = [128, 8], strides = [1, 1]} : vector<128x32xf32> to vector<128x8xf32>
    %63 = vector.shape_cast %62 : vector<128x8xf32> to vector<4x32x8xf32>
    %64 = arith.truncf %63 : vector<4x32x8xf32> to vector<4x32x8xbf16>
    %65 = vector.extract_strided_slice %9 {offsets = [0, 16], sizes = [128, 8], strides = [1, 1]} : vector<128x32xf32> to vector<128x8xf32>
    %66 = vector.shape_cast %65 : vector<128x8xf32> to vector<4x32x8xf32>
    %67 = arith.truncf %66 : vector<4x32x8xf32> to vector<4x32x8xbf16>
    %68 = vector.extract_strided_slice %10 {offsets = [0, 16], sizes = [128, 8], strides = [1, 1]} : vector<128x32xf32> to vector<128x8xf32>
    %69 = vector.shape_cast %68 : vector<128x8xf32> to vector<4x32x8xf32>
    %70 = arith.truncf %69 : vector<4x32x8xf32> to vector<4x32x8xbf16>
    "tpu.trace_start"() <{level = 10 : i32, message = "wqc,wkc->wqk"}> : () -> ()
    %cst_20 = arith.constant dense<0.000000e+00> : vector<4x32x32xf32>
    %71 = tpu.matmul %64, %67, %cst_20 {dimension_numbers = #tpu.dot_dimension_numbers<[2], [2], [1], [1], [0, 0, 0, 1, 1, 1], [0], [0]>} : vector<4x32x8xbf16>, vector<4x32x8xbf16>, vector<4x32x32xf32> -> vector<4x32x32xf32>
    "tpu.trace_stop"() : () -> ()
    %72 = arith.addf %71, %11 : vector<4x32x32xf32>
    %cst_21 = arith.constant dense<0xFF800000> : vector<4x32xf32>
    %73 = vector.multi_reduction <maximumf>, %72, %cst_21 [2] : vector<4x32x32xf32> to vector<4x32xf32>
    %74 = vector.shape_cast %73 : vector<4x32xf32> to vector<4x32x1xf32>
    %75 = vector.broadcast %74 : vector<4x32x1xf32> to vector<4x32x32xf32>
    %76 = arith.subf %72, %75 : vector<4x32x32xf32>
    %77 = math.exp %76 : vector<4x32x32xf32>
    %cst_22 = arith.constant dense<0.000000e+00> : vector<4x32xf32>
    %78 = vector.multi_reduction <add>, %77, %cst_22 [2] : vector<4x32x32xf32> to vector<4x32xf32>
    %79 = vector.shape_cast %78 : vector<4x32xf32> to vector<4x32x1xf32>
    %80 = tpu.reciprocal %79 {approx = true} : vector<4x32x1xf32> -> vector<4x32x1xf32>
    %81 = vector.broadcast %80 : vector<4x32x1xf32> to vector<4x32x32xf32>
    %82 = arith.mulf %77, %81 : vector<4x32x32xf32>
    %83 = arith.truncf %82 : vector<4x32x32xf32> to vector<4x32x32xbf16>
    "tpu.trace_start"() <{level = 10 : i32, message = "wqk,wkc->wqc"}> : () -> ()
    %cst_23 = arith.constant dense<0.000000e+00> : vector<4x32x8xf32>
    %84 = tpu.matmul %83, %70, %cst_23 {dimension_numbers = #tpu.dot_dimension_numbers<[2], [1], [1], [2], [0, 0, 0, 1, 1, 2], [0], [0]>} : vector<4x32x32xbf16>, vector<4x32x8xbf16>, vector<4x32x8xf32> -> vector<4x32x8xf32>
    "tpu.trace_stop"() : () -> ()
    %85 = vector.shape_cast %84 : vector<4x32x8xf32> to vector<128x8xf32>
    %c0_24 = arith.constant 0 : index
    %c16 = arith.constant 16 : index
    %86 = vector.load %arg8[%c0_24, %c16] : memref<128x32xf32, #tpu.memory_space<vmem>>, vector<128x8xf32>
    tpu.vector_store %arg8[%c0_24, %c16], %85 {strides = array<i32>} : memref<128x32xf32, #tpu.memory_space<vmem>>, vector<128x8xf32>,
    %87 = vector.extract_strided_slice %8 {offsets = [0, 24], sizes = [128, 8], strides = [1, 1]} : vector<128x32xf32> to vector<128x8xf32>
    %88 = vector.shape_cast %87 : vector<128x8xf32> to vector<4x32x8xf32>
    %89 = arith.truncf %88 : vector<4x32x8xf32> to vector<4x32x8xbf16>
    %90 = vector.extract_strided_slice %9 {offsets = [0, 24], sizes = [128, 8], strides = [1, 1]} : vector<128x32xf32> to vector<128x8xf32>
    %91 = vector.shape_cast %90 : vector<128x8xf32> to vector<4x32x8xf32>
    %92 = arith.truncf %91 : vector<4x32x8xf32> to vector<4x32x8xbf16>
    %93 = vector.extract_strided_slice %10 {offsets = [0, 24], sizes = [128, 8], strides = [1, 1]} : vector<128x32xf32> to vector<128x8xf32>
    %94 = vector.shape_cast %93 : vector<128x8xf32> to vector<4x32x8xf32>
    %95 = arith.truncf %94 : vector<4x32x8xf32> to vector<4x32x8xbf16>
    "tpu.trace_start"() <{level = 10 : i32, message = "wqc,wkc->wqk"}> : () -> ()
    %cst_25 = arith.constant dense<0.000000e+00> : vector<4x32x32xf32>
    %96 = tpu.matmul %89, %92, %cst_25 {dimension_numbers = #tpu.dot_dimension_numbers<[2], [2], [1], [1], [0, 0, 0, 1, 1, 1], [0], [0]>} : vector<4x32x8xbf16>, vector<4x32x8xbf16>, vector<4x32x32xf32> -> vector<4x32x32xf32>
    "tpu.trace_stop"() : () -> ()
    %97 = arith.addf %96, %11 : vector<4x32x32xf32>
    %cst_26 = arith.constant dense<0xFF800000> : vector<4x32xf32>
    %98 = vector.multi_reduction <maximumf>, %97, %cst_26 [2] : vector<4x32x32xf32> to vector<4x32xf32>
    %99 = vector.shape_cast %98 : vector<4x32xf32> to vector<4x32x1xf32>
    %100 = vector.broadcast %99 : vector<4x32x1xf32> to vector<4x32x32xf32>
    %101 = arith.subf %97, %100 : vector<4x32x32xf32>
    %102 = math.exp %101 : vector<4x32x32xf32>
    %cst_27 = arith.constant dense<0.000000e+00> : vector<4x32xf32>
    %103 = vector.multi_reduction <add>, %102, %cst_27 [2] : vector<4x32x32xf32> to vector<4x32xf32>
    %104 = vector.shape_cast %103 : vector<4x32xf32> to vector<4x32x1xf32>
    %105 = tpu.reciprocal %104 {approx = true} : vector<4x32x1xf32> -> vector<4x32x1xf32>
    %106 = vector.broadcast %105 : vector<4x32x1xf32> to vector<4x32x32xf32>
    %107 = arith.mulf %102, %106 : vector<4x32x32xf32>
    %108 = arith.truncf %107 : vector<4x32x32xf32> to vector<4x32x32xbf16>
    "tpu.trace_start"() <{level = 10 : i32, message = "wqk,wkc->wqc"}> : () -> ()
    %cst_28 = arith.constant dense<0.000000e+00> : vector<4x32x8xf32>
    %109 = tpu.matmul %108, %95, %cst_28 {dimension_numbers = #tpu.dot_dimension_numbers<[2], [1], [1], [2], [0, 0, 0, 1, 1, 2], [0], [0]>} : vector<4x32x32xbf16>, vector<4x32x8xbf16>, vector<4x32x8xf32> -> vector<4x32x8xf32>
    "tpu.trace_stop"() : () -> ()
    %110 = vector.shape_cast %109 : vector<4x32x8xf32> to vector<128x8xf32>
    %c0_29 = arith.constant 0 : index
    %c24 = arith.constant 24 : index
    %111 = vector.load %arg8[%c0_29, %c24] : memref<128x32xf32, #tpu.memory_space<vmem>>, vector<128x8xf32>
    tpu.vector_store %arg8[%c0_29, %c24], %110 {strides = array<i32>} : memref<128x32xf32, #tpu.memory_space<vmem>>, vector<128x8xf32>,
    %c0_30 = arith.constant 0 : index
    %c0_31 = arith.constant 0 : index
    %112 = vector.load %arg8[%c0_30, %c0_31] : memref<128x32xf32, #tpu.memory_space<vmem>>, vector<128x32xf32>
    %113 = arith.truncf %112 : vector<128x32xf32> to vector<128x32xbf16>
    %c0_32 = arith.constant 0 : index
    %c0_33 = arith.constant 0 : index
    %114 = vector.load %arg5[%c0_32, %c0_33] : memref<32x32xbf16, #tpu.memory_space<vmem>>, vector<32x32xbf16>
    %cst_34 = arith.constant dense<0.000000e+00> : vector<128x32xf32>
    %115 = tpu.matmul %113, %114, %cst_34 {dimension_numbers = #tpu.dot_dimension_numbers<[1], [0], [0], [1], [0, 0, 1, 1], [], []>} : vector<128x32xbf16>, vector<32x32xbf16>, vector<128x32xf32> -> vector<128x32xf32>
    %c0_35 = arith.constant 0 : index
    %c0_36 = arith.constant 0 : index
    %116 = vector.load %arg6[%c0_35, %c0_36] : memref<1x32xf32, #tpu.memory_space<vmem>>, vector<1x32xf32>
    %117 = vector.broadcast %116 : vector<1x32xf32> to vector<128x32xf32>
    %118 = arith.addf %115, %117 : vector<128x32xf32>
    %119 = vector.shape_cast %118 : vector<128x32xf32> to vector<4x32x32xf32>
    %c0_37 = arith.constant 0 : index
    %c0_38 = arith.constant 0 : index
    %c0_39 = arith.constant 0 : index
    %120 = vector.load %arg7[%c0_37, %c0_38, %c0_39] : memref<4x32x32xf32, #tpu.memory_space<vmem>>, vector<4x32x32xf32>
    tpu.vector_store %arg7[%c0_37, %c0_38, %c0_39], %119 {strides = array<i32>} : memref<4x32x32xf32, #tpu.memory_space<vmem>>, vector<4x32x32xf32>,
    return
  }
  func.func @transform_0(%arg0: i32) -> (i32, i32, i32) {
    %c0_i32 = arith.constant 0 : i32
    %c0_i32_0 = arith.constant 0 : i32
    %c0_i32_1 = arith.constant 0 : i32
    return %arg0, %c0_i32, %c0_i32_0 : i32, i32, i32
  }
  func.func @transform_1(%arg0: i32) -> (i32, i32, i32) {
    %c0_i32 = arith.constant 0 : i32
    %c0_i32_0 = arith.constant 0 : i32
    %c0_i32_1 = arith.constant 0 : i32
    %c0_i32_2 = arith.constant 0 : i32
    return %c0_i32, %c0_i32_0, %c0_i32_1 : i32, i32, i32
  }
  func.func @transform_2(%arg0: i32) -> (i32, i32) {
    %c0_i32 = arith.constant 0 : i32
    %c0_i32_0 = arith.constant 0 : i32
    %c0_i32_1 = arith.constant 0 : i32
    return %c0_i32, %c0_i32_0 : i32, i32
  }
  func.func @transform_3(%arg0: i32) -> (i32, i32) {
    %c0_i32 = arith.constant 0 : i32
    %c0_i32_0 = arith.constant 0 : i32
    %c0_i32_1 = arith.constant 0 : i32
    return %c0_i32, %c0_i32_0 : i32, i32
  }
  func.func @transform_4(%arg0: i32) -> (i32, i32) {
    %c0_i32 = arith.constant 0 : i32
    %c0_i32_0 = arith.constant 0 : i32
    %c0_i32_1 = arith.constant 0 : i32
    return %c0_i32, %c0_i32_0 : i32, i32
  }
  func.func @transform_5(%arg0: i32) -> (i32, i32) {
    %c0_i32 = arith.constant 0 : i32
    %c0_i32_0 = arith.constant 0 : i32
    %c0_i32_1 = arith.constant 0 : i32
    return %c0_i32, %c0_i32_0 : i32, i32
  }
  func.func @transform_6(%arg0: i32) -> (i32, i32, i32) {
    %c0_i32 = arith.constant 0 : i32
    %c0_i32_0 = arith.constant 0 : i32
    %c0_i32_1 = arith.constant 0 : i32
    return %arg0, %c0_i32, %c0_i32_0 : i32, i32, i32
  }
}

</mosaic_0001>

<bundles_post_ra>
// kernel: tpu_custom_call.1
= control target key start
LH: loop header
LB: loop body
LE: loop exit
PB: predicated region body
PF: predicated region fallthrough
CT: control target
= control target key end

     0   :  { %11 = vsyncpa [#allocation4], 0  ;;  %s5368_s0 = inlined_call_operand.hbm [shape: f32[8,32,32], index: 0, kind: input, shape index: {}]   ;;  %s5369_s1 = inlined_call_operand.hbm [shape: f32[4,32,32], index: 1, kind: input, shape index: {}]   ;;  %s5370_s2 = inlined_call_operand.hbm [shape: bf16[32,96], index: 2, kind: input, shape index: {}]   ;;  %s5371_s3 = inlined_call_operand.vmem [shape: f32[1,96], index: 3, kind: input, shape index: {}]   ;;  %s5372_s4 = inlined_call_operand.hbm [shape: bf16[32,32], index: 4, kind: input, shape index: {}]   ;;  %s5373_s5 = inlined_call_operand.vmem [shape: f32[1,32], index: 5, kind: input, shape index: {}]   ;;  %s5374_s6 = inlined_call_operand.hbm [shape: f32[8,32,32], index: 6, kind: output, shape index: {}]  }
   0x1   :  { %13 = vsyncpa [#allocation4 + $0x1], 0 }
   0x2   :  { %14 = vsyncpa [#allocation7], 0 }
   0x3   :  { %15 = vsyncpa [#allocation10], 0 }
   0x4   :  { %16 = vsyncpa [#allocation5], 0 }
   0x5   :  { %18 = vsyncpa [#allocation5 + $0x1], 0  ;;  %s3815_s21 = smov 0   ;;  %s3817_s22 = smov 0  }
   0x6   :  { %s3819_s23 = smov 0   ;;  %s3821_s24 = smov 0  }
   0x7 LB: > { %s3836_s25 = sadd.s32 4294967295, %s3756_s24   ;;  %s3060_s26 = sadd.s32 4294967294, %s3756_s24   ;;  %s3756_s24 = sphi %s3821_s24, %s5407_s24   ;;  %s3752_s23 = sphi %s3819_s23, %s5406_s23   ;;  %s3748_s22 = sphi %s3817_s22, %s5405_s22   ;;  %s3744_s21 = sphi %s3815_s21, %s5404_s21  }
   0x8   : > { %p44_p0 = scmp.ne.s32.totalorder %s3748_s22, %s3744_s21  ;;  %p45_p1 = scmp.eq.s32.totalorder %s3836_s25, 0 }
   0x9   : > { %p173_p2 = scmp.eq.s32.totalorder %s3836_s25, 1  ;;  %p179_p3 = scmp.eq.s32.totalorder %s3060_s26, 1 }
   0xa   : > { %p3845_p4 = por %p45_p1, %p44_p0  ;;  %p3061_p5 = scmp.ge.s32.totalorder %s3756_s24, 1 }
   0xb   : > { %p3850_p6 = por %p179_p3, %p44_p0  ;;  %p186_p7 = scmp.lt.s32.totalorder %s3756_s24, 3 }
   0xc   : > { %s197_s7 = sshll.u32 %s5369_s1, 4  ;;  %s3758_s9 = smov [#allocation6]   ;;  %s198_s7 = int_to_ptr.hbm [resolvable:$true] %s197_s7 }
   0xd   : > { %p3858_p8 = pnand %p3061_p5, %p186_p7  ;;  %s199_s10 = sshll.u32 %s3758_s9, 4  ;;  %s200_s10 = int_to_ptr.vmem [resolvable:$true] %s199_s10 }
   0xe   : > { %s211_s14 = sshll.u32 %s5370_s2, 4  ;;  %s5375_s15 = smov 128   ;;  %s212_s14 = int_to_ptr.hbm [resolvable:$true] %s211_s14 }
   0xf   : > { %p3208_p9 = pneg %p3858_p8  ;;  %s5376_s16 = smov 8  }
  0x10   : > { %s3761_s17 = smov [#allocation8]   ;;  %s3762_s19 = smov 64  }
  0x11   : > { %p3866_p10 = pnand %p3208_p9, %p45_p1  ;;  %s213_s18 = sshll.u32 %s3761_s17, 4  ;;  %s214_s18 = int_to_ptr.vmem [resolvable:$true] %s213_s18 }
  0x12   : > { %s3763_s20 = smov 4   ;;  %s228_s30 = sshll.u32 %s5372_s4, 4  ;;  %s229_s30 = int_to_ptr.hbm [resolvable:$true] %s228_s30 }
  0x13   : > { %3211 = dma.hbm_to_vmem [thread:$0]  (!%p3866_p10), %s198_s7, 2048, %s200_s10, [#allocation7], %s5375_s15, %s5375_s15, %s5376_s16  }
  0x14   : > { %3214 = dma.hbm_to_vmem [thread:$0]  (!%p3866_p10), %s212_s14, 256, %s214_s18, [#allocation7], %s3762_s19, %s3762_s19, %s3763_s20  }
  0x15   : > { %s3764_s7 = smov [#allocation9]   ;;  %s3887_s10 = sadd.s32 1, %s3756_s24  }
  0x16   : > { %s230_s9 = sshll.u32 %s3764_s7, 4  ;;  %s28_s12 = ssub.s32 %s3756_s24, %s3887_s10  ;;  %s231_s9 = int_to_ptr.vmem [resolvable:$true] %s230_s9 }
  0x17   : > { %3217 = dma.hbm_to_vmem [thread:$0]  (!%p3866_p10), %s229_s30, 256, %s231_s9, [#allocation10], %s3762_s19, %s3762_s19, %s3763_s20  }
  0x18   : > { %s31_s13 = sadd.s32 1, %s3752_s23  ;;  %p29_p12 = scmp.eq.s32.totalorder %s28_s12, 0 }
  0x19   : > { %p38_p13 = scmp.ne.s32.totalorder %s3752_s23, %s3748_s22  ;;  %p39_p0 = scmp.eq.s32.totalorder %s3756_s24, 0 }
  0x1a   : > { %s3896_s14 = scalar_select %p29_p12, %s3752_s23, %s31_s13  }
  0x1b   : > { %p3900_p3 = por %p173_p2, %p38_p13  ;;  %p3229_p5 = scmp.lt.s32.totalorder %s3756_s24, 2 }
  0x1c   : > { %s247_s18 = sand.u32 1, %s3752_s23   ;;  %s3179_s26 = sshll.u32 %s3756_s24, 7 }
  0x1d   : > { %p40_p7 = por %p39_p0, %p38_p13  ;;  %s3066_s11 = sshll.u32 %s247_s18, 7 }
  0x1e   : > { %s257_s29 = scalar_lea.hbm %s5368_s0, %s3179_s26  ;;  %s251_s7 = scalar_lea.vmem [#allocation3], %s3066_s11 }
  0x1f   : > { %s258_s30 = sshll.u32 %s257_s29, 4  ;;  %s260_s9 = sshll.u32 %s251_s7, 4  ;;  %s259_s30 = int_to_ptr.hbm [resolvable:$true] %s258_s30  ;;  %s261_s9 = int_to_ptr.vmem [resolvable:$true] %s260_s9 }
  0x20   : > { %p3910_p9 = pnand %p3229_p5, %p40_p7  ;;  %s248_s13 = scalar_lea.sflag [#allocation4], %s247_s18 }
  0x21   : > { %s3652_s15 = sshra.s32 %s259_s30, 4  ;;  %s3659_s11 = scalar_lea.hbm %s5368_s0, 256  ;;  %s3653_s15 = int_to_ptr.hbm [resolvable:$true] %s3652_s15 }
  0x22   : > { %s3654_s16 = scalar_lea.hbm %s3653_s15, 128  ;;  %p3656_p10 = pneg %p3910_p9 }
  0x23   : > { %p3655_p2 = scmp.ne.s32.totalorder %s3653_s15, %s3654_s16  ;;  %p3660_p0 = scmp.lt.s32.totalorder %s3653_s15, %s5368_s0 }
  0x24   : > { %p3661_p5 = scmp.lt.s32.totalorder %s3659_s11, %s3654_s16 }
  0x25   : > { %p3657_p12 = pnand %p3656_p10, %p3655_p2 }
  0x26   : > { %p3662_p7 = por %p3661_p5, %p3660_p0 }
  0x27   : > { %p3658_p13 = pneg %p3657_p12 }
  0x29   : > { %p3663_p11 = pnand %p3662_p7, %p3658_p13 }
  0x2b   : > { %3666 = shalt.err (!%p3663_p11)
}
  0x2c   : > { %s5383_s18 = smov 8   ;;  %s5384_s7 = smov 128  }
  0x2d   : > { %3221 = dma.hbm_to_vmem [thread:$0]  (!%p3910_p9), %s259_s30, 2048, %s261_s9, %s248_s13, %s5384_s7, %s5384_s7, %s5383_s18  }
  0x2e   : > { %272 = sbr.rel (%p3858_p8) target bundleno = 2790 (0xae6), region = 44 }
  0x33   : > { %s3930_s26 = sand.u32 1, %s3748_s22  }
  0x34   : > { %s3071_s15 = sshll.u32 %s3930_s26, 7  ;;  %s275_s16 = scalar_lea.sflag [#allocation4], %s3930_s26 }
  0x35   : > { %s3936_s19 = scalar_lea.vmem [#allocation3], %s3071_s15 }
  0x36   : > { %3727 = dma.done.wait (%p3845_p4), %s275_s16, 2048  }
  0x37   : > { %3729 = vsyncadd (%p3845_p4), %s275_s16, 4294965248 }
  0x38   : > { %3731 = dma.done.wait (%p45_p1), [#allocation7], 2304  }
  0x39   : > { %3733 = vsyncadd (%p45_p1), [#allocation7], 4294964992 }
  0x3a   : > { %3735 = dma.done.wait (%p45_p1), [#allocation10], 256  }
  0x3b   : > { %3737 = vsyncadd (%p45_p1), [#allocation10], 4294967040  ;;  %v3181_v0 = vld [vmem:[#allocation8 + $0x8] sm:$0xff]  ;;  %v3180_v1 = vld [vmem:[#allocation8] sm:$0xff]  ;;  %vm370_vm0 = vcmask 261120   ;;  %s3765_s30 = smov 96  }
  0x3c   : > { %v326_v2 = vld [vmem:[%s3936_s19] sm:$0xff]  ;;  %v327_v3 = vld [vmem:[%s3936_s19 + $0x8] sm:$0xff]  ;;  %401 = vmatpush.bf16.msra.mxu0 %v3181_v0  ;;  %3186 = vmatpush.bf16.msra.mxu1 %v3181_v0  ;;  %v328_v14 = vld [vmem:[%s3936_s19 + $0x10] sm:$0xff]  ;;  %s3766_s9 = smov 64   ;;  %s3767_s12 = smov 88   ;;  %vm490_vm1 = vcmask 64512  }
  0x3d   : > { %v330_v4 = vld [vmem:[%s3936_s19 + $0x20] sm:$0xff]  ;;  %v331_v5 = vld [vmem:[%s3936_s19 + $0x28] sm:$0xff]  ;;  %3187 = vmatpush.bf16.msra.mxu2 %v3181_v0  ;;  %3188 = vmatpush.bf16.msra.mxu3 %v3181_v0  ;;  %v342_v10 = vpack.c.bf16 %v327_v3, %v326_v2  ;;  %v329_v15 = vld [vmem:[%s3936_s19 + $0x18] sm:$0xff]  ;;  %s3768_s13 = smov 120   ;;  %s3769_s11 = smov 56   ;;  %vm1605_vm2 = vcmask 130112  }
  0x3e   : > { %v334_v6 = vld [vmem:[%s3936_s19 + $0x40] sm:$0xff]  ;;  %v335_v7 = vld [vmem:[%s3936_s19 + $0x48] sm:$0xff]  ;;  %v344_v11 = vpack.c.bf16 %v331_v5, %v330_v4  ;;  %v332_v16 = vld [vmem:[%s3936_s19 + $0x30] sm:$0xff]  ;;  %v343_v22 = vpack.c.bf16 %v329_v15, %v328_v14  ;;  %s3770_s20 = smov 80   ;;  %s3771_s29 = smov 112   ;;  %vm2198_vm3 = vcmask 195712  }
  0x3f   : > { %v338_v8 = vld [vmem:[%s3936_s19 + $0x60] sm:$0xff]  ;;  %v339_v9 = vld [vmem:[%s3936_s19 + $0x68] sm:$0xff]  ;;  %v346_v12 = vpack.c.bf16 %v335_v7, %v334_v6  ;;  %v333_v17 = vld [vmem:[%s3936_s19 + $0x38] sm:$0xff]  ;;  %s3772_s18 = smov 48   ;;  %s3773_s7 = smov 104   ;;  %vm2791_vm4 = vcmask 261312  }
  0x40   : > { %402 = vmatpush.bf16.msra.mxu0 %v3180_v1  ;;  %3189 = vmatpush.bf16.msra.mxu1 %v3180_v1  ;;  %v348_v13 = vpack.c.bf16 %v339_v9, %v338_v8  ;;  %v336_v18 = vld [vmem:[%s3936_s19 + $0x50] sm:$0xff]  ;;  %v337_v19 = vld [vmem:[%s3936_s19 + $0x58] sm:$0xff]  ;;  %v345_v23 = vpack.c.bf16 %v333_v17, %v332_v16  ;;  %v3288_v28 = vld [vmem:[%s5371_s3] ss:$0 sm:$0xff]  ;;  %s3774_s16 = smov 72   ;;  %s3776_s27 = smov 8  }
  0x41   : > { %3190 = vmatpush.bf16.msra.mxu2 %v3180_v1  ;;  %3191 = vmatpush.bf16.msra.mxu3 %v3180_v1  ;;  %v340_v20 = vld [vmem:[%s3936_s19 + $0x70] sm:$0xff]  ;;  %v341_v21 = vld [vmem:[%s3936_s19 + $0x78] sm:$0xff]  ;;  %v347_v24 = vpack.c.bf16 %v337_v19, %v336_v18  ;;  %s3775_s19 = smov 40   ;;  %s3777_s8 = smov 16  }
  0x42   : > { %v349_v25 = vpack.c.bf16 %v341_v21, %v340_v20 }
  0x43   : > { %3084 = vmatmul.msk.bf16.vlgmr.msra.gmra.mxu0 %vm370_vm0, %v342_v10  ;;  %3086 = vmatmul.msk.bf16.vlgmr.msra.gmra.mxu1 %vm370_vm0, %v344_v11 }
  0x44   : > { %3088 = vmatmul.msk.bf16.vlgmr.msra.gmra.mxu2 %vm370_vm0, %v346_v12  ;;  %3090 = vmatmul.msk.bf16.vlgmr.msra.gmra.mxu3 %vm370_vm0, %v348_v13 }
  0x53   : > { %3085 = vmatmul.msk.bf16.gmra.mxu0 %vm370_vm0, %v343_v22  ;;  %3087 = vmatmul.msk.bf16.gmra.mxu1 %vm370_vm0, %v345_v23 }
  0x54   : > { %3089 = vmatmul.msk.bf16.gmra.mxu2 %vm370_vm0, %v347_v24  ;;  %3091 = vmatmul.msk.bf16.gmra.mxu3 %vm370_vm0, %v349_v25 }
  0xc0   : > { %v404_v26 = vpop.f32.mrf.mxu0  ;;  %v414_v27 = vpop.f32.mrf.mxu1 }
  0xc1   : > { %v405_v29 = vadd.f32 %v3288_v28, %v404_v26  ;;  %v415_v60 = vadd.f32 %v3288_v28, %v414_v27 }
  0xc3   : > { %v460_v34 = vpack.c.bf16 %v405_v29, %v405_v29  ;;  %v464_v9 = vpack.c.bf16 %v415_v60, %v415_v60 }
  0xc5   : > { %v480_v37 = vunpack.c.l.b16 %v460_v34  ;;  %v526_v21 = vunpack.c.l.b16 %v464_v9 }
  0xc7   : > { %v424_v30 = vpop.f32.mrf.mxu2  ;;  %v434_v31 = vpop.f32.mrf.mxu3 }
  0xc8   : > { %v406_v32 = vpop.f32.mrf.mxu0  ;;  %v416_v33 = vpop.f32.mrf.mxu1  ;;  %v435_v48 = vadd.f32 %v3288_v28, %v434_v31  ;;  %v425_v15 = vadd.f32 %v3288_v28, %v424_v30 }
  0xc9   : > { %v407_v35 = vadd.f32 %v3288_v28, %v406_v32  ;;  %v417_v57 = vadd.f32 %v3288_v28, %v416_v33 }
  0xca   : > { %v472_v61 = vpack.c.bf16 %v435_v48, %v435_v48  ;;  %v468_v25 = vpack.c.bf16 %v425_v15, %v425_v15 }
  0xcb   : > { %v461_v36 = vpack.c.bf16 %v407_v35, %v407_v35  ;;  %v465_v4 = vpack.c.bf16 %v417_v57, %v417_v57 }
  0xcc   : > { %v616_v11 = vunpack.c.l.b16 %v472_v61  ;;  %v571_v31 = vunpack.c.l.b16 %v468_v25 }
  0xcd   : > { %v481_v38 = vunpack.c.l.b16 %v461_v36  ;;  %v527_v19 = vunpack.c.l.b16 %v465_v4 }
  0xcf   : > { %v3977_v39 = vpack.c.b16 %v481_v38, %v480_v37  ;;  %v426_v40 = vpop.f32.mrf.mxu2  ;;  %v436_v41 = vpop.f32.mrf.mxu3  ;;  %v3993_v29 = vpack.c.b16 %v527_v19, %v526_v21 }
  0xd0   : > { %v409_v42 = vpop.f32.mrf.mxu0  ;;  %v419_v43 = vpop.f32.mrf.mxu1  ;;  %v437_v51 = vadd.f32 %v3288_v28, %v436_v41  ;;  %v427_v16 = vadd.f32 %v3288_v28, %v426_v40 }
  0xd1   : > { %486 = vrot.lane.b32.xlu1 %v3977_v39, %s3765_s30  ;;  %v410_v44 = vadd.f32 %v3288_v28, %v409_v42  ;;  %v420_v45 = vadd.f32 %v3288_v28, %v419_v43 }
  0xd2   : > { %v473_v62 = vpack.c.bf16 %v437_v51, %v437_v51  ;;  %v469_v26 = vpack.c.bf16 %v427_v16, %v427_v16  ;;  %v4077_v16 = vld [vmem:[#allocation6 + $0x20] sm:$0xff] }
  0xd3   : > { %v462_v52 = vpack.c.bf16 %v410_v44, %v410_v44  ;;  %v466_v53 = vpack.c.bf16 %v420_v45, %v420_v45 }
  0xd4   : > { %v617_v12 = vunpack.c.l.b16 %v473_v62  ;;  %v572_v32 = vunpack.c.l.b16 %v469_v26 }
  0xd5   : > { %v482_v63 = vunpack.c.l.b16 %v462_v52  ;;  %v528_v0 = vunpack.c.l.b16 %v466_v53 }
  0xd6   : > { %v3989_v22 = vpack.c.b16 %v617_v12, %v616_v11  ;;  %v4003_v34 = vpack.c.b16 %v572_v32, %v571_v31  ;;  %v4070_v12 = vld [vmem:[#allocation6] sm:$0xff] }
  0xd7   : > { %v429_v46 = vpop.f32.mrf.mxu2  ;;  %v439_v47 = vpop.f32.mrf.mxu3 }
  0xd8   : > { %v411_v49 = vpop.f32.mrf.mxu0  ;;  %v421_v50 = vpop.f32.mrf.mxu1  ;;  %v430_v56 = vadd.f32 %v3288_v28, %v429_v46  ;;  %v440_v13 = vadd.f32 %v3288_v28, %v439_v47 }
  0xd9   : > { %v412_v54 = vadd.f32 %v3288_v28, %v411_v49  ;;  %v422_v55 = vadd.f32 %v3288_v28, %v421_v50 }
  0xda   : > { %v470_v3 = vpack.c.bf16 %v430_v56, %v430_v56  ;;  %v474_v23 = vpack.c.bf16 %v440_v13, %v440_v13 }
  0xdb   : > { %v463_v58 = vpack.c.bf16 %v412_v54, %v412_v54  ;;  %v467_v59 = vpack.c.bf16 %v422_v55, %v422_v55 }
  0xdc   : > { %v573_v17 = vunpack.c.l.b16 %v470_v3  ;;  %v618_v30 = vunpack.c.l.b16 %v474_v23  ;;  %v4084_v23 = vld [vmem:[#allocation6 + $0x8] sm:$0xff] }
  0xdd   : > { %v483_v1 = vunpack.c.l.b16 %v463_v58  ;;  %v529_v2 = vunpack.c.l.b16 %v467_v59 }
  0xdf   : > { %v3981_v5 = vpack.c.b16 %v483_v1, %v482_v63  ;;  %v3983_v6 = vpack.c.b16 %v529_v2, %v528_v0  ;;  %v431_v7 = vpop.f32.mrf.mxu2  ;;  %v441_v8 = vpop.f32.mrf.mxu3 }
  0xe0   : > { %v432_v10 = vadd.f32 %v3288_v28, %v431_v7  ;;  %v442_v14 = vadd.f32 %v3288_v28, %v441_v8  ;;  %v4063_v8 = vld [vmem:[#allocation6 + $0x40] sm:$0xff] }
  0xe1   : > { %534 = vrot.lane.b32.xlu0 %v3983_v6, %s3765_s30  ;;  %488 = vrot.lane.b32.xlu1 %v3981_v5, %s3765_s30 }
  0xe2   : > { %v471_v18 = vpack.c.bf16 %v432_v10, %v432_v10  ;;  %v475_v24 = vpack.c.bf16 %v442_v14, %v442_v14 }
  0xe4   : > { %v574_v20 = vunpack.c.l.b16 %v471_v18  ;;  %v619_v28 = vunpack.c.l.b16 %v475_v24  ;;  %v4086_v24 = vld [vmem:[#allocation6 + $0x28] sm:$0xff] }
  0xe6   : > { %v3991_v27 = vpack.c.b16 %v574_v20, %v573_v17  ;;  %v4001_v33 = vpack.c.b16 %v619_v28, %v618_v30  ;;  %v4091_v30 = vld [vmem:[#allocation6 + $0x10] sm:$0xff] }
  0xe8   : > { %579 = vrot.lane.b32.xlu2 %v3991_v27, %s3765_s30 }
  0xe9   : > { %532 = vrot.lane.b32.xlu0 %v3993_v29, %s3765_s30  ;;  %622 = vrot.lane.b32.xlu1 %v3989_v22, %s3765_s30 }
  0xf0   : > { %577 = vrot.lane.b32.xlu2 %v4003_v34, %s3765_s30 }
  0xf1   : > { %624 = vrot.lane.b32.xlu0 %v4001_v33, %s3765_s30  ;;  %859 = vrot.lane.b32.xlu1 %v3977_v39, %s3766_s9  ;;  %s3778_s30 = smov 24  }
  0xf8   : > { %902 = vrot.lane.b32.xlu2 %v3983_v6, %s3766_s9 }
  0xf9   : > { %900 = vrot.lane.b32.xlu0 %v3993_v29, %s3766_s9  ;;  %1074 = vrot.lane.b32.xlu1 %v3983_v6, %s3767_s12 }
 0x100   : > { %1035 = vrot.lane.b32.xlu2 %v3981_v5, %s3767_s12 }
 0x101   : > { %861 = vrot.lane.b32.xlu0 %v3981_v5, %s3766_s9  ;;  %943 = vrot.lane.b32.xlu1 %v3991_v27, %s3766_s9 }
 0x108   : > { %1033 = vrot.lane.b32.xlu2 %v3977_v39, %s3767_s12 }
 0x109   : > { %1029 = vrot.lane.b32.xlu0 %v3977_v39, %s3768_s13  ;;  %1113 = vrot.lane.b32.xlu1 %v3991_v27, %s3767_s12 }
 0x110   : > { %982 = vrot.lane.b32.xlu2 %v3989_v22, %s3766_s9 }
 0x111   : > { %941 = vrot.lane.b32.xlu0 %v4003_v34, %s3766_s9 }
 0x118   : > { %984 = vrot.lane.b32.xlu2 %v4001_v33, %s3766_s9  ;;  %s3702_s9 = scalar_lea.hbm %s5374_s6, 256 }
 0x119   : > { %1031 = vrot.lane.b32.xlu0 %v3981_v5, %s3768_s13 }
 0x121   : > { %1072 = vrot.lane.b32.xlu0 %v3993_v29, %s3767_s12 }
 0x142   : > { %v580_v35 = vpop.permute.xlu2 %579 }
 0x143   : > { %v591_v36 = vsel %vm490_vm1, %v580_v35, 0  ;;  %v487_v38 = vpop.permute.xlu1 %486 }
 0x144   : > { %599 = vmatpush.bf16.xpose.msrb.mxu3 %v591_v36  ;;  %v498_v49 = vsel %vm490_vm1, %v487_v38, 0 }
 0x14a   : > { %v578_v37 = vpop.permute.xlu2 %577 }
 0x14b   : > { %v588_v40 = vsel %vm490_vm1, %v578_v37, 0  ;;  %v4103_v37 = vld [vmem:[#allocation6 + $0x50] sm:$0xff] }
 0x14c   : > { %600 = vmatpush.bf16.xpose.msrb.mxu3 %v588_v40 }
 0x152   : > { %v903_v41 = vpop.permute.xlu2 %902 }
 0x153   : > { %3096 = vmatmul.msk.bf16.vlgmr.msrb.gmra.mxu3 %vm490_vm1, %v4003_v34  ;;  %v535_v42 = vpop.permute.xlu0 %534  ;;  %v489_v43 = vpop.permute.xlu1 %488 }
 0x154   : > { %918 = vmatpush.bf16.msra.mxu3 %v903_v41  ;;  %v501_v44 = vsel %vm490_vm1, %v489_v43, 0  ;;  %v546_v45 = vsel %vm490_vm1, %v535_v42, 0  ;;  %v4107_v41 = vld [vmem:[#allocation6 + $0x48] sm:$0xff]  ;;  %v4109_v42 = vld [vmem:[#allocation6 + $0x30] sm:$0xff] }
 0x155   : > { %509 = vmatpush.bf16.xpose.msrb.mxu1 %v501_v44  ;;  %554 = vmatpush.bf16.xpose.msrb.mxu2 %v546_v45 }
 0x15a   : > { %v1036_v46 = vpop.permute.xlu2 %1035 }
 0x15b   : > { %v533_v47 = vpop.permute.xlu0 %532  ;;  %v623_v48 = vpop.permute.xlu1 %622  ;;  %v1047_v58 = vsel %vm490_vm1, %v1036_v46, 0 }
 0x15c   : > { %v543_v50 = vsel %vm490_vm1, %v533_v47, 0  ;;  %v633_v55 = vsel %vm490_vm1, %v623_v48, 0 }
 0x15d   : > { %510 = vmatpush.bf16.xpose.msrb.mxu1 %v498_v49  ;;  %555 = vmatpush.bf16.xpose.msrb.mxu2 %v543_v50  ;;  %v4124_v50 = vld [vmem:[#allocation6 + $0x18] sm:$0xff] }
 0x162   : > { %v1034_v54 = vpop.permute.xlu2 %1033 }
 0x163   : > { %3097 = vmatmul.msk.bf16.gmra.mxu3 %vm490_vm1, %v3991_v27  ;;  %v625_v51 = vpop.permute.xlu0 %624  ;;  %v860_v52 = vpop.permute.xlu1 %859  ;;  %v1044_v62 = vsel %vm490_vm1, %v1034_v54, 0  ;;  %v4130_v54 = vld [vmem:[#allocation6 + $0x38] sm:$0xff] }
 0x164   : > { %v636_v53 = vsel %vm490_vm1, %v625_v51, 0  ;;  %3092 = vmatmul.msk.bf16.vlgmr.msrb.gmra.mxu1 %vm490_vm1, %v3977_v39  ;;  %3094 = vmatmul.msk.bf16.vlgmr.msrb.gmra.mxu2 %vm490_vm1, %v3993_v29 }
 0x165   : > { %644 = vmatpush.bf16.xpose.msra.mxu1 %v636_v53 }
 0x16a   : > { %v983_v59 = vpop.permute.xlu2 %982 }
 0x16b   : > { %v901_v56 = vpop.permute.xlu0 %900  ;;  %v1075_v57 = vpop.permute.xlu1 %1074 }
 0x16c   : > { %919 = vmatpush.bf16.msra.mxu3 %v901_v56  ;;  %v1086_v2 = vsel %vm490_vm1, %v1075_v57, 0 }
 0x16d   : > { %645 = vmatpush.bf16.xpose.msra.mxu1 %v633_v55 }
 0x170   : > { %1055 = vmatpush.bf16.xpose.msrb.mxu3 %v1047_v58 }
 0x172   : > { %v985_v63 = vpop.permute.xlu2 %984 }
 0x173   : > { %v862_v60 = vpop.permute.xlu0 %861  ;;  %v944_v61 = vpop.permute.xlu1 %943 }
 0x174   : > { %3093 = vmatmul.msk.bf16.gmra.mxu1 %vm490_vm1, %v3981_v5  ;;  %3095 = vmatmul.msk.bf16.gmra.mxu2 %vm490_vm1, %v3983_v6 }
 0x175   : > { %877 = vmatpush.bf16.msra.mxu2 %v862_v60  ;;  %959 = vmatpush.bf16.msrb.mxu1 %v944_v61 }
 0x178   : > { %1056 = vmatpush.bf16.xpose.msrb.mxu3 %v1044_v62  ;;  %v4145_v62 = vld [vmem:[#allocation6 + $0x60] sm:$0xff] }
 0x179   : > { %878 = vmatpush.bf16.msra.mxu2 %v860_v52  ;;  %v4128_v52 = vld [vmem:[#allocation6 + $0x58] sm:$0xff] }
 0x17b   : > { %v4053_v0 = vpop.permute.xlu0 %1029 }
 0x17d   : > { %1000 = vmatpush.bf16.msrb.mxu2 %v985_v63 }
 0x181   : > { %1001 = vmatpush.bf16.msrb.mxu2 %v983_v59 }
 0x183   : > { %v942_v1 = vpop.permute.xlu0 %941 }
 0x184   : > { %3098 = vmatmul.msk.bf16.vlgmr.msra.gmra.mxu1 %vm490_vm1, %v3989_v22 }
 0x185   : > { %960 = vmatpush.bf16.msrb.mxu1 %v942_v1 }
 0x189   : > { %1094 = vmatpush.bf16.xpose.msra.mxu1 %v1086_v2  ;;  %v4152_v2 = vld [vmem:[#allocation6 + $0x68] sm:$0xff] }
 0x18b   : > { %v4058_v3 = vpop.permute.xlu0 %1031 }
 0x193   : > { %v1073_v4 = vpop.permute.xlu0 %1072 }
 0x194   : > { %3099 = vmatmul.msk.bf16.gmra.mxu1 %vm490_vm1, %v4001_v33  ;;  %v1083_v7 = vsel %vm490_vm1, %v1073_v4, 0 }
 0x195   : > { %1095 = vmatpush.bf16.xpose.msra.mxu1 %v1083_v7 }
 0x1d6   : > { %v602_v9 = vpop.f32.mrf.mxu3 }
 0x1d7   : > { %v4066_v10 = vadd.f32 %v602_v9, %v4063_v8 }
 0x1d9   : > { %v681_v11 = vsel %vm370_vm0, %v4066_v10, -inf }
 0x1da   : > { %682 = vmax.xlane.f32.xlu0 %v681_v11 }
 0x1de   : > { %v604_v19 = vpop.f32.mrf.mxu3 }
 0x1df   : > { %v4115_v45 = vadd.f32 %v604_v19, %v4107_v41 }
 0x1e1   : > { %v512_v13 = vpop.f32.mrf.mxu1  ;;  %v684_v51 = vsel %vm370_vm0, %v4115_v45, -inf }
 0x1e2   : > { %v4073_v14 = vadd.f32 %v512_v13, %v4070_v12  ;;  %v4161_v13 = vld [vmem:[#allocation6 + $0x70] sm:$0xff] }
 0x1e4   : > { %v657_v15 = vsel %vm370_vm0, %v4073_v14, -inf }
 0x1e5   : > { %658 = vmax.xlane.f32.xlu1 %v657_v15 }
 0x1e6   : > { %v607_v38 = vpop.f32.mrf.mxu3 }
 0x1e7   : > { %v557_v17 = vpop.f32.mrf.mxu2  ;;  %v4112_v43 = vadd.f32 %v607_v38, %v4103_v37  ;;  %v4180_v38 = vpop.permute.xlu1 %1113 }
 0x1e8   : > { %v4080_v18 = vadd.f32 %v557_v17, %v4077_v16 }
 0x1e9   : > { %v514_v20 = vpop.f32.mrf.mxu1  ;;  %v687_v48 = vsel %vm370_vm0, %v4112_v43, -inf }
 0x1ea   : > { %v669_v21 = vsel %vm370_vm0, %v4080_v18, -inf  ;;  %v4089_v25 = vadd.f32 %v514_v20, %v4084_v23  ;;  %v4172_v20 = vld [vmem:[#allocation6 + $0x78] sm:$0xff] }
 0x1eb   : > { %670 = vmax.xlane.f32.xlu2 %v669_v21 }
 0x1ec   : > { %v660_v36 = vsel %vm370_vm0, %v4089_v25, -inf }
 0x1ee   : > { %v609_v53 = vpop.f32.mrf.mxu3 }
 0x1ef   : > { %v559_v26 = vpop.f32.mrf.mxu2  ;;  %v4136_v57 = vadd.f32 %v609_v53, %v4128_v52 }
 0x1f0   : > { %v4094_v28 = vadd.f32 %v559_v26, %v4086_v24 }
 0x1f1   : > { %v517_v31 = vpop.f32.mrf.mxu1  ;;  %v690_v63 = vsel %vm370_vm0, %v4136_v57, -inf }
 0x1f2   : > { %v4097_v32 = vadd.f32 %v517_v31, %v4091_v30  ;;  %v672_v35 = vsel %vm370_vm0, %v4094_v28, -inf }
 0x1f3   : > { %673 = vmax.xlane.f32.xlu0 %v672_v35  ;;  %661 = vmax.xlane.f32.xlu2 %v660_v36 }
 0x1f4   : > { %v663_v40 = vsel %vm370_vm0, %v4097_v32, -inf }
 0x1f5   : > { %664 = vmax.xlane.f32.xlu1 %v663_v40 }
 0x1f7   : > { %v562_v44 = vpop.f32.mrf.mxu2 }
 0x1f8   : > { %v4118_v46 = vadd.f32 %v562_v44, %v4109_v42 }
 0x1f9   : > { %v519_v47 = vpop.f32.mrf.mxu1 }
 0x1fa   : > { %v675_v49 = vsel %vm370_vm0, %v4118_v46, -inf  ;;  %v4133_v55 = vadd.f32 %v519_v47, %v4124_v50 }
 0x1fb   : > { %688 = vmax.xlane.f32.xlu0 %v687_v48  ;;  %676 = vmax.xlane.f32.xlu2 %v675_v49 }
 0x1fc   : > { %v666_v61 = vsel %vm370_vm0, %v4133_v55, -inf }
 0x1fd   : > { %685 = vmax.xlane.f32.xlu1 %v684_v51 }
 0x1ff   : > { %v564_v56 = vpop.f32.mrf.mxu2 }
 0x200   : > { %v4139_v58 = vadd.f32 %v564_v56, %v4130_v54 }
 0x201   : > { %v647_v59 = vpop.f32.mrf.mxu1 }
 0x202   : > { %v678_v60 = vsel %vm370_vm0, %v4139_v58, -inf  ;;  %v4150_v1 = vadd.f32 %v647_v59, %v4145_v62 }
 0x203   : > { %679 = vmax.xlane.f32.xlu0 %v678_v60  ;;  %667 = vmax.xlane.f32.xlu2 %v666_v61 }
 0x204   : > { %v693_v9 = vsel %vm370_vm0, %v4150_v1, -inf }
 0x205   : > { %691 = vmax.xlane.f32.xlu1 %v690_v63 }
 0x209   : > { %v649_v4 = vpop.f32.mrf.mxu1 }
 0x20a   : > { %v4155_v7 = vadd.f32 %v649_v4, %v4152_v2 }
 0x20b   : > { %694 = vmax.xlane.f32.xlu2 %v693_v9 }
 0x20c   : > { %v696_v11 = vsel %vm370_vm0, %v4155_v7, -inf }
 0x20d   : > { %697 = vmax.xlane.f32.xlu0 %v696_v11 }
 0x211   : > { %v652_v15 = vpop.f32.mrf.mxu1 }
 0x212   : > { %v4164_v17 = vadd.f32 %v652_v15, %v4161_v13 }
 0x214   : > { %v699_v19 = vsel %vm370_vm0, %v4164_v17, -inf }
 0x215   : > { %700 = vmax.xlane.f32.xlu0 %v699_v19 }
 0x219   : > { %v654_v21 = vpop.f32.mrf.mxu1 }
 0x21a   : > { %v4175_v26 = vadd.f32 %v654_v21, %v4172_v20 }
 0x21c   : > { %v702_v31 = vsel %vm370_vm0, %v4175_v26, -inf }
 0x21e   : > { %1111 = vrot.lane.b32.xlu1 %v4003_v34, %s3767_s12 }
 0x229   : > { %1068 = vrot.lane.b32.xlu0 %v3993_v29, %s3768_s13 }
 0x248   : > { %703 = vmax.xlane.f32.xlu1 %v702_v31 }
 0x24d   : > { %v683_v35 = vpop.xlane.xlu0 %682 }
 0x24e   : > { %v713_v36 = vsub.f32 %v4066_v10, %v683_v35 }
 0x250   : > { %v737_v40 = vmul.f32 1.442695, %v713_v36 }
 0x252   : > { %3290 = vpow2.f32 %v737_v40 }
 0x258   : > { %v4182_v44 = vpop.eup %3290  ;;  %v659_v47 = vpop.xlane.xlu1 %658 }
 0x259   : > { %v705_v48 = vsub.f32 %v4073_v14, %v659_v47  ;;  %v777_v49 = vsel %vm370_vm0, %v4182_v44, 0.0 }
 0x25a   : > { %778 = vadd.xlane.f32.xlu0 %v777_v49 }
 0x25b   : > { %v721_v51 = vmul.f32 1.442695, %v705_v48 }
 0x25d   : > { %3292 = vpow2.f32 %v721_v51 }
 0x25e   : > { %v671_v53 = vpop.xlane.xlu2 %670 }
 0x25f   : > { %v709_v56 = vsub.f32 %v4080_v18, %v671_v53 }
 0x261   : > { %v729_v59 = vmul.f32 1.442695, %v709_v56 }
 0x263   : > { %v4188_v10 = vpop.eup %3292  ;;  %3294 = vpow2.f32 %v729_v59 }
 0x264   : > { %v753_v60 = vsel %vm370_vm0, %v4188_v10, 0.0 }
 0x265   : > { %754 = vadd.xlane.f32.xlu1 %v753_v60 }
 0x266   : > { %v674_v61 = vpop.xlane.xlu0 %673  ;;  %v662_v63 = vpop.xlane.xlu2 %661 }
 0x267   : > { %v710_v14 = vsub.f32 %v4094_v28, %v674_v61  ;;  %v706_v4 = vsub.f32 %v4089_v25, %v662_v63 }
 0x268   : > { %v665_v9 = vpop.xlane.xlu1 %664 }
 0x269   : > { %v4194_v11 = vpop.eup %3294  ;;  %v731_v15 = vmul.f32 1.442695, %v710_v14  ;;  %v723_v19 = vmul.f32 1.442695, %v706_v4  ;;  %v707_v18 = vsub.f32 %v4097_v32, %v665_v9 }
 0x26a   : > { %v765_v31 = vsel %vm370_vm0, %v4194_v11, 0.0 }
 0x26b   : > { %3296 = vpow2.f32 %v731_v15  ;;  %v725_v21 = vmul.f32 1.442695, %v707_v18 }
 0x26c   : > { %3298 = vpow2.f32 %v723_v19 }
 0x26d   : > { %3300 = vpow2.f32 %v725_v21  ;;  %766 = vadd.xlane.f32.xlu1 %v765_v31 }
 0x26e   : > { %v677_v35 = vpop.xlane.xlu2 %676  ;;  %v689_v56 = vpop.xlane.xlu0 %688 }
 0x26f   : > { %v711_v28 = vsub.f32 %v4118_v46, %v677_v35  ;;  %v715_v63 = vsub.f32 %v4112_v43, %v689_v56 }
 0x270   : > { %v686_v36 = vpop.xlane.xlu1 %685 }
 0x271   : > { %v4200_v25 = vpop.eup %3296  ;;  %v733_v40 = vmul.f32 1.442695, %v711_v28  ;;  %v714_v47 = vsub.f32 %v4115_v45, %v686_v36  ;;  %v741_v15 = vmul.f32 1.442695, %v715_v63 }
 0x272   : > { %v4203_v48 = vpop.eup %3298  ;;  %v768_v32 = vsel %vm370_vm0, %v4200_v25, 0.0 }
 0x273   : > { %v4207_v49 = vpop.eup %3300  ;;  %v739_v51 = vmul.f32 1.442695, %v714_v47  ;;  %769 = vadd.xlane.f32.xlu2 %v768_v32  ;;  %3302 = vpow2.f32 %v733_v40  ;;  %v756_v53 = vsel %vm370_vm0, %v4203_v48, 0.0 }
 0x274   : > { %v759_v46 = vsel %vm370_vm0, %v4207_v49, 0.0 }
 0x275   : > { %3304 = vpow2.f32 %v739_v51  ;;  %757 = vadd.xlane.f32.xlu1 %v756_v53  ;;  %760 = vadd.xlane.f32.xlu0 %v759_v46 }
 0x276   : > { %v668_v45 = vpop.xlane.xlu2 %667 }
 0x277   : > { %v708_v59 = vsub.f32 %v4133_v55, %v668_v45  ;;  %v680_v55 = vpop.xlane.xlu0 %679 }
 0x278   : > { %v692_v19 = vpop.xlane.xlu1 %691  ;;  %v712_v28 = vsub.f32 %v4139_v58, %v680_v55 }
 0x279   : > { %v727_v60 = vmul.f32 1.442695, %v708_v59  ;;  %v4214_v61 = vpop.eup %3302  ;;  %v716_v31 = vsub.f32 %v4136_v57, %v692_v19 }
 0x27a   : > { %v771_v4 = vsel %vm370_vm0, %v4214_v61, 0.0  ;;  %v735_v47 = vmul.f32 1.442695, %v712_v28 }
 0x27b   : > { %v4217_v14 = vpop.eup %3304  ;;  %3306 = vpow2.f32 %v727_v60  ;;  %772 = vadd.xlane.f32.xlu2 %v771_v4  ;;  %v743_v40 = vmul.f32 1.442695, %v716_v31 }
 0x27c   : > { %v780_v9 = vsel %vm370_vm0, %v4217_v14, 0.0  ;;  %3308 = vpow2.f32 %v741_v15 }
 0x27d   : > { %781 = vadd.xlane.f32.xlu0 %v780_v9 }
 0x27e   : > { %v695_v18 = vpop.xlane.xlu2 %694 }
 0x27f   : > { %v717_v21 = vsub.f32 %v4150_v1, %v695_v18 }
 0x280   : > { %v698_v45 = vpop.xlane.xlu0 %697 }
 0x281   : > { %v745_v43 = vmul.f32 1.442695, %v717_v21  ;;  %v4225_v35 = vpop.eup %3306  ;;  %v718_v59 = vsub.f32 %v4155_v7, %v698_v45 }
 0x282   : > { %v762_v36 = vsel %vm370_vm0, %v4225_v35, 0.0  ;;  %v4230_v32 = vpop.eup %3308 }
 0x283   : > { %3310 = vpow2.f32 %v745_v43  ;;  %763 = vadd.xlane.f32.xlu1 %v762_v36  ;;  %v783_v1 = vsel %vm370_vm0, %v4230_v32, 0.0  ;;  %v747_v60 = vmul.f32 1.442695, %v718_v59 }
 0x284   : > { %3312 = vpow2.f32 %v743_v40 }
 0x285   : > { %3314 = vpow2.f32 %v735_v47 }
 0x286   : > { %3316 = vpow2.f32 %v747_v60 }
 0x288   : > { %v701_v9 = vpop.xlane.xlu0 %700 }
 0x289   : > { %v4232_v51 = vpop.eup %3310  ;;  %v719_v31 = vsub.f32 %v4164_v17, %v701_v9 }
 0x28a   : > { %v789_v57 = vsel %vm370_vm0, %v4232_v51, 0.0  ;;  %v4238_v58 = vpop.eup %3312 }
 0x28b   : > { %790 = vadd.xlane.f32.xlu0 %v789_v57  ;;  %784 = vadd.xlane.f32.xlu1 %v783_v1  ;;  %v4240_v53 = vpop.eup %3314  ;;  %v786_v46 = vsel %vm370_vm0, %v4238_v58, 0.0  ;;  %v749_v47 = vmul.f32 1.442695, %v719_v31 }
 0x28c   : > { %v774_v56 = vsel %vm370_vm0, %v4240_v53, 0.0  ;;  %v4259_v63 = vpop.eup %3316 }
 0x28d   : > { %v792_v4 = vsel %vm370_vm0, %v4259_v63, 0.0 }
 0x290   : > { %v4271_v7 = vpop.permute.xlu1 %1111 }
 0x293   : > { %787 = vadd.xlane.f32.xlu0 %v786_v46  ;;  %1070 = vrot.lane.b32.xlu2 %v3983_v6, %s3768_s13 }
 0x294   : > { %775 = vadd.xlane.f32.xlu1 %v774_v56 }
 0x29b   : > { %v4279_v19 = vpop.permute.xlu0 %1068 }
 0x2a7   : > { %1107 = vrot.lane.b32.xlu0 %v4003_v34, %s3768_s13 }
 0x2ad   : > { %1109 = vrot.lane.b32.xlu1 %v3991_v27, %s3768_s13 }
 0x2af   : > { %1152 = vrot.lane.b32.xlu0 %v4001_v33, %s3767_s12 }
 0x2b5   : > { %1150 = vrot.lane.b32.xlu1 %v3989_v22, %s3767_s12 }
 0x2b7   : > { %1146 = vrot.lane.b32.xlu0 %v3989_v22, %s3768_s13 }
 0x2bb   : > { %v704_v15 = vpop.xlane.xlu1 %703 }
 0x2bc   : > { %793 = vadd.xlane.f32.xlu2 %v792_v4  ;;  %v720_v46 = vsub.f32 %v4175_v26, %v704_v15 }
 0x2bd   : > { %1148 = vrot.lane.b32.xlu1 %v4001_v33, %s3768_s13  ;;  %s5273_s13 = scalar_lea.vmem [#allocation11], %s3071_s15  ;;  %s3185_s15 = sshll.u32 %s3836_s25, 7 }
 0x2be   : > { %v751_v60 = vmul.f32 1.442695, %v720_v46 }
 0x2bf   : > { %1389 = vrot.lane.b32.xlu0 %v3981_v5, %s3769_s11 }
 0x2c5   : > { %1628 = vrot.lane.b32.xlu1 %v3981_v5, %s3770_s20 }
 0x2c7   : > { %1626 = vrot.lane.b32.xlu0 %v3977_v39, %s3770_s20 }
 0x2cd   : > { %1430 = vrot.lane.b32.xlu1 %v3983_v6, %s3769_s11  ;;  %v779_v55 = vpop.xlane.xlu0 %778 }
 0x2cf   : > { %1428 = vrot.lane.b32.xlu0 %v3993_v29, %s3769_s11 }
 0x2d4   : > { %1387 = vrot.lane.b32.xlu2 %v3977_v39, %s3769_s11 }
 0x2d8   : > { %v755_v18 = vpop.xlane.xlu1 %754 }
 0x2e0   : > { %v767_v21 = vpop.xlane.xlu1 %766 }
 0x2e1   : > { %3318 = vrcp.f32 %v767_v21 }
 0x2e2   : > { %3320 = vrcp.f32 %v755_v18 }
 0x2e6   : > { %v770_v43 = vpop.xlane.xlu2 %769 }
 0x2e7   : > { %v3319_v28 = vpop.eup %3318  ;;  %3322 = vrcp.f32 %v770_v43 }
 0x2e8   : > { %v761_v36 = vpop.xlane.xlu0 %760  ;;  %v758_v40 = vpop.xlane.xlu1 %757  ;;  %v821_v1 = vmul.f32 %v3319_v28, %v4194_v11 }
 0x2e9   : > { %v3321_v57 = vpop.eup %3320  ;;  %3324 = vrcp.f32 %v758_v40 }
 0x2ea   : > { %3326 = vrcp.f32 %v779_v55  ;;  %v817_v45 = vmul.f32 %v3321_v57, %v4188_v10  ;;  %v837_v59 = vpack.c.bf16 %v821_v1, %v821_v1 }
 0x2eb   : > { %3328 = vpow2.f32 %v749_v47 }
 0x2ec   : > { %v833_v31 = vpack.c.bf16 %v817_v45, %v817_v45  ;;  %v894_v11 = vunpack.c.l.b16 %v837_v59 }
 0x2ed   : > { %v3323_v56 = vpop.eup %3322 }
 0x2ee   : > { %v822_v17 = vmul.f32 %v3323_v56, %v4200_v25  ;;  %v853_v25 = vunpack.c.l.b16 %v833_v31  ;;  %v773_v31 = vpop.xlane.xlu2 %772 }
 0x2ef   : > { %v3325_v4 = vpop.eup %3324 }
 0x2f0   : > { %v838_v9 = vpack.c.bf16 %v822_v17, %v822_v17  ;;  %v782_v18 = vpop.xlane.xlu0 %781  ;;  %v3327_v21 = vpop.eup %3326  ;;  %v818_v43 = vmul.f32 %v3325_v4, %v4203_v48 }
 0x2f1   : > { %3330 = vrcp.f32 %v782_v18  ;;  %v4287_v26 = vpop.eup %3328  ;;  %v825_v10 = vmul.f32 %v3327_v21, %v4182_v44  ;;  %v1125_v44 = vsel %vm490_vm1, %v4180_v38, 0 }
 0x2f2   : > { %v895_v28 = vunpack.c.l.b16 %v838_v9  ;;  %3332 = vpow2.f32 %v751_v60  ;;  %v834_v15 = vpack.c.bf16 %v818_v43, %v818_v43  ;;  %v795_v47 = vsel %vm370_vm0, %v4287_v26, 0.0 }
 0x2f3   : > { %3334 = vrcp.f32 %v761_v36  ;;  %v841_v46 = vpack.c.bf16 %v825_v10, %v825_v10 }
 0x2f4   : > { %v898_v55 = vpack.c.b16 %v895_v28, %v894_v11  ;;  %v854_v40 = vunpack.c.l.b16 %v834_v15  ;;  %v1122_v11 = vsel %vm490_vm1, %v4271_v7, 0 }
 0x2f5   : > { %v935_v17 = vunpack.c.l.b16 %v841_v46 }
 0x2f6   : > { %3102 = vmatmul.msk.bf16.vlgmr.msra.gmra.mxu3 %vm370_vm0, %v898_v55  ;;  %v857_v48 = vpack.c.b16 %v854_v40, %v853_v25  ;;  %v764_v1 = vpop.xlane.xlu1 %763 }
 0x2f7   : > { %v3331_v57 = vpop.eup %3330  ;;  %796 = vadd.xlane.f32.xlu1 %v795_v47  ;;  %3336 = vrcp.f32 %v764_v1 }
 0x2f8   : > { %v826_v56 = vmul.f32 %v3331_v57, %v4217_v14  ;;  %v4294_v45 = vpop.eup %3332  ;;  %3100 = vmatmul.msk.bf16.vlgmr.msra.gmra.mxu2 %vm370_vm0, %v857_v48 }
 0x2f9   : > { %v3335_v36 = vpop.eup %3334  ;;  %1133 = vmatpush.bf16.xpose.msra.mxu2 %v1125_v44  ;;  %v798_v4 = vsel %vm370_vm0, %v4294_v45, 0.0 }
 0x2fa   : > { %v842_v59 = vpack.c.bf16 %v826_v56, %v826_v56  ;;  %v819_v9 = vmul.f32 %v3335_v36, %v4207_v49 }
 0x2fc   : > { %v936_v60 = vunpack.c.l.b16 %v842_v59  ;;  %v835_v28 = vpack.c.bf16 %v819_v9, %v819_v9 }
 0x2fd   : > { %v3337_v18 = vpop.eup %3336  ;;  %799 = vadd.xlane.f32.xlu2 %v798_v4 }
 0x2fe   : > { %v939_v14 = vpack.c.b16 %v936_v60, %v935_v17  ;;  %v791_v21 = vpop.xlane.xlu0 %790  ;;  %v785_v43 = vpop.xlane.xlu1 %784  ;;  %v820_v38 = vmul.f32 %v3337_v18, %v4225_v35  ;;  %v855_v49 = vunpack.c.l.b16 %v835_v28 }
 0x2ff   : > { %3338 = vrcp.f32 %v785_v43 }
 0x300   : > { %3104 = vmatmul.msk.bf16.vlgmr.msrb.gmra.mxu1 %vm370_vm0, %v939_v14  ;;  %v836_v15 = vpack.c.bf16 %v820_v38, %v820_v38  ;;  %3340 = vrcp.f32 %v773_v31  ;;  %v1071_v38 = vpop.permute.xlu2 %1070 }
 0x301   : > { %1134 = vmatpush.bf16.xpose.msra.mxu2 %v1122_v11 }
 0x302   : > { %v856_v10 = vunpack.c.l.b16 %v836_v15 }
 0x304   : > { %v858_v47 = vpack.c.b16 %v856_v10, %v855_v49 }
 0x305   : > { %v3339_v25 = vpop.eup %3338 }
 0x306   : > { %v788_v55 = vpop.xlane.xlu0 %787  ;;  %v3341_v57 = vpop.eup %3340  ;;  %v827_v35 = vmul.f32 %v3339_v25, %v4230_v32 }
 0x307   : > { %3342 = vrcp.f32 %v788_v55  ;;  %v776_v40 = vpop.xlane.xlu1 %775  ;;  %v823_v48 = vmul.f32 %v3341_v57, %v4214_v61 }
 0x308   : > { %3344 = vrcp.f32 %v776_v40  ;;  %3101 = vmatmul.msk.bf16.gmra.mxu2 %vm370_vm0, %v858_v47  ;;  %v843_v56 = vpack.c.bf16 %v827_v35, %v827_v35 }
 0x309   : > { %v839_v36 = vpack.c.bf16 %v823_v48, %v823_v48  ;;  %3346 = vrcp.f32 %v791_v21 }
 0x30a   : > { %v937_v60 = vunpack.c.l.b16 %v843_v56 }
 0x30b   : > { %v896_v9 = vunpack.c.l.b16 %v839_v36 }
 0x30d   : > { %v3343_v7 = vpop.eup %3342 }
 0x30e   : > { %v3345_v1 = vpop.eup %3344  ;;  %v828_v46 = vmul.f32 %v3343_v7, %v4238_v58 }
 0x30f   : > { %v824_v44 = vmul.f32 %v3345_v1, %v4240_v53  ;;  %v3347_v49 = vpop.eup %3346 }
 0x310   : > { %1471 = vrot.lane.b32.xlu1 %v3991_v27, %s3769_s11  ;;  %v844_v59 = vpack.c.bf16 %v828_v46, %v828_v46  ;;  %v829_v25 = vmul.f32 %v3347_v49, %v4232_v51 }
 0x311   : > { %v840_v17 = vpack.c.bf16 %v824_v44, %v824_v44 }
 0x312   : > { %v938_v4 = vunpack.c.l.b16 %v844_v59  ;;  %v845_v40 = vpack.c.bf16 %v829_v25, %v829_v25 }
 0x313   : > { %v897_v18 = vunpack.c.l.b16 %v840_v17 }
 0x314   : > { %v940_v32 = vpack.c.b16 %v938_v4, %v937_v60  ;;  %v976_v7 = vunpack.c.l.b16 %v845_v40 }
 0x315   : > { %v899_v14 = vpack.c.b16 %v897_v18, %v896_v9  ;;  %1622 = vrot.lane.b32.xlu2 %v3977_v39, %s3771_s29 }
 0x316   : > { %3105 = vmatmul.msk.bf16.gmra.mxu1 %vm370_vm0, %v940_v32 }
 0x317   : > { %3103 = vmatmul.msk.bf16.gmra.mxu3 %vm370_vm0, %v899_v14 }
 0x319   : > { %v4317_v61 = vpop.permute.xlu0 %1107 }
 0x31d   : > { %1469 = vrot.lane.b32.xlu2 %v4003_v34, %s3769_s11 }
 0x31f   : > { %v4321_v58 = vpop.permute.xlu1 %1109 }
 0x321   : > { %v1153_v53 = vpop.permute.xlu0 %1152 }
 0x322   : > { %v1164_v31 = vsel %vm490_vm1, %v1153_v53, 0 }
 0x323   : > { %1172 = vmatpush.bf16.xpose.msra.mxu3 %v1164_v31 }
 0x326   : > { %3110 = vmatmul.msk.bf16.vlgmr.msra.gmra.mxu1 %vm490_vm1, %v4279_v19 }
 0x327   : > { %3108 = vmatmul.msk.bf16.vlgmr.msrb.gmra.mxu3 %vm490_vm1, %v4053_v0  ;;  %v1151_v43 = vpop.permute.xlu1 %1150 }
 0x328   : > { %v1161_v28 = vsel %vm490_vm1, %v1151_v43, 0 }
 0x329   : > { %v1147_v11 = vpop.permute.xlu0 %1146 }
 0x32b   : > { %1173 = vmatpush.bf16.xpose.msra.mxu3 %v1161_v28 }
 0x32f   : > { %v1149_v15 = vpop.permute.xlu1 %1148  ;;  %v794_v10 = vpop.xlane.xlu2 %793 }
 0x330   : > { %3348 = vrcp.f32 %v794_v10 }
 0x331   : > { %v1390_v55 = vpop.permute.xlu0 %1389 }
 0x332   : > { %1405 = vmatpush.bf16.msrb.mxu0 %v1390_v55 }
 0x336   : > { %3111 = vmatmul.msk.bf16.gmra.mxu1 %vm490_vm1, %v1071_v38  ;;  %v3349_v19 = vpop.eup %3348 }
 0x337   : > { %3109 = vmatmul.msk.bf16.gmra.mxu3 %vm490_vm1, %v4058_v3  ;;  %v1629_v0 = vpop.permute.xlu1 %1628  ;;  %v830_v47 = vmul.f32 %v3349_v19, %v4259_v63  ;;  %v1388_v57 = vpop.permute.xlu2 %1387 }
 0x338   : > { %v1640_v21 = vsel %vm490_vm1, %v1629_v0, 0  ;;  %1406 = vmatpush.bf16.msrb.mxu0 %v1388_v57 }
 0x339   : > { %v1627_v35 = vpop.permute.xlu0 %1626  ;;  %v846_v48 = vpack.c.bf16 %v830_v47, %v830_v47 }
 0x33a   : > { %v1637_v3 = vsel %vm490_vm1, %v1627_v35, 0 }
 0x33b   : > { %v977_v1 = vunpack.c.l.b16 %v846_v48 }
 0x33c   : > { %1648 = vmatpush.bf16.xpose.msra.mxu0 %v1640_v21 }
 0x33d   : > { %v980_v51 = vpack.c.b16 %v977_v1, %v976_v7 }
 0x33f   : > { %v1431_v46 = vpop.permute.xlu1 %1430  ;;  %3106 = vmatmul.msk.bf16.vlgmr.msrb.gmra.mxu2 %vm370_vm0, %v980_v51 }
 0x340   : > { %1446 = vmatpush.bf16.msrb.mxu1 %v1431_v46 }
 0x341   : > { %v1429_v56 = vpop.permute.xlu0 %1428 }
 0x344   : > { %1649 = vmatpush.bf16.xpose.msra.mxu0 %v1637_v3  ;;  %1447 = vmatpush.bf16.msrb.mxu1 %v1429_v56 }
 0x347   : > { %3114 = vmatmul.msk.bf16.vlgmr.msra.gmra.mxu3 %vm490_vm1, %v1147_v11 }
 0x357   : > { %3115 = vmatmul.msk.bf16.gmra.mxu3 %vm490_vm1, %v1149_v15 }
 0x36a   : > { %v797_v63 = vpop.xlane.xlu1 %796 }
 0x36b   : > { %3350 = vrcp.f32 %v797_v63 }
 0x370   : > { %v800_v44 = vpop.xlane.xlu2 %799 }
 0x371   : > { %v3351_v36 = vpop.eup %3350  ;;  %3352 = vrcp.f32 %v800_v44 }
 0x372   : > { %v831_v59 = vmul.f32 %v3351_v36, %v4287_v26 }
 0x374   : > { %v847_v9 = vpack.c.bf16 %v831_v59, %v831_v59 }
 0x376   : > { %v978_v31 = vunpack.c.l.b16 %v847_v9 }
 0x377   : > { %v3353_v17 = vpop.eup %3352 }
 0x378   : > { %v832_v4 = vmul.f32 %v3353_v17, %v4294_v45  ;;  %v4342_v32 = vpop.permute.xlu2 %1622 }
 0x379   : > { %v921_v60 = vpop.f32.mrf.mxu3 }
 0x37a   : > { %1017 = vst.msk [vmem:[#allocation2 + $0x20] sm:$0xff] %vm490_vm1, %v921_v60  ;;  %v848_v18 = vpack.c.bf16 %v832_v4, %v832_v4 }
 0x37b   : > { %v880_v14 = vpop.f32.mrf.mxu2 }
 0x37c   : > { %1013 = vst.msk [vmem:[#allocation2] sm:$0xff] %vm490_vm1, %v880_v14  ;;  %v979_v43 = vunpack.c.l.b16 %v848_v18 }
 0x37d   : > { %v962_v53 = vpop.f32.mrf.mxu1 }
 0x37e   : > { %1021 = vst.msk [vmem:[#allocation2 + $0x40] sm:$0xff] %vm490_vm1, %v962_v53  ;;  %v981_v38 = vpack.c.b16 %v979_v43, %v978_v31 }
 0x380   : > { %3107 = vmatmul.msk.bf16.gmra.mxu2 %vm370_vm0, %v981_v38  ;;  %v1470_v15 = vpop.permute.xlu2 %1469 }
 0x381   : > { %v923_v26 = vpop.f32.mrf.mxu3 }
 0x382   : > { %1018 = vst.msk [vmem:[#allocation2 + $0x28] sm:$0xff] %vm490_vm1, %v923_v26  ;;  %v1472_v45 = vpop.permute.xlu1 %1471 }
 0x383   : > { %1487 = vmatpush.bf16.msrb.mxu2 %v1472_v45  ;;  %v882_v11 = vpop.f32.mrf.mxu2 }
 0x384   : > { %1014 = vst.msk [vmem:[#allocation2 + $0x8] sm:$0xff] %vm490_vm1, %v882_v11 }
 0x385   : > { %v964_v28 = vpop.f32.mrf.mxu1 }
 0x386   : > { %1022 = vst.msk [vmem:[#allocation2 + $0x48] sm:$0xff] %vm490_vm1, %v964_v28 }
 0x387   : > { %1488 = vmatpush.bf16.msrb.mxu2 %v1470_v15 }
 0x38b   : > { %v885_v10 = vpop.f32.mrf.mxu2 }
 0x38c   : > { %1015 = vst.msk [vmem:[#allocation2 + $0x10] sm:$0xff] %vm490_vm1, %v885_v10 }
 0x390   : > { %3112 = vmatmul.msk.bf16.vlgmr.msra.gmra.mxu2 %vm490_vm1, %v4317_v61 }
 0x393   : > { %v967_v49 = vpop.f32.mrf.mxu1  ;;  %v887_v55 = vpop.f32.mrf.mxu2 }
 0x394   : > { %1023 = vst.msk [vmem:[#allocation2 + $0x50] sm:$0xff] %vm490_vm1, %v967_v49 }
 0x395   : > { %1016 = vst.msk [vmem:[#allocation2 + $0x18] sm:$0xff] %vm490_vm1, %v887_v55 }
 0x39a   : > { %v926_v25 = vpop.f32.mrf.mxu3 }
 0x39b   : > { %1019 = vst.msk [vmem:[#allocation2 + $0x30] sm:$0xff] %vm490_vm1, %v926_v25  ;;  %v969_v19 = vpop.f32.mrf.mxu1 }
 0x39c   : > { %1024 = vst.msk [vmem:[#allocation2 + $0x58] sm:$0xff] %vm490_vm1, %v969_v19 }
 0x3a0   : > { %3113 = vmatmul.msk.bf16.gmra.mxu2 %vm490_vm1, %v4321_v58 }
 0x3a2   : > { %v928_v0 = vpop.f32.mrf.mxu3 }
 0x3a3   : > { %1020 = vst.msk [vmem:[#allocation2 + $0x38] sm:$0xff] %vm490_vm1, %v928_v0  ;;  %v1097_v40 = vpop.f32.mrf.mxu1 }
 0x3a4   : > { %v4361_v61 = vadd.f32 %v1097_v40, %v4077_v16 }
 0x3a6   : > { %v1197_v47 = vsel %vm370_vm0, %v4361_v61, -inf }
 0x3a7   : > { %1198 = vmax.xlane.f32.xlu2 %v1197_v47 }
 0x3aa   : > { %v1058_v21 = vpop.f32.mrf.mxu3 }
 0x3ab   : > { %v1059_v57 = vadd.f32 %v1058_v21, %v4070_v12  ;;  %v1099_v35 = vpop.f32.mrf.mxu1 }
 0x3ac   : > { %v4367_v48 = vadd.f32 %v1099_v35, %v4086_v24 }
 0x3ad   : > { %v1185_v58 = vsel %vm370_vm0, %v1059_v57, -inf }
 0x3ae   : > { %1186 = vmax.xlane.f32.xlu0 %v1185_v58  ;;  %v1200_v7 = vsel %vm370_vm0, %v4367_v48, -inf }
 0x3af   : > { %1201 = vmax.xlane.f32.xlu1 %v1200_v7 }
 0x3b2   : > { %v1060_v16 = vpop.f32.mrf.mxu3 }
 0x3b3   : > { %v4373_v1 = vadd.f32 %v1060_v16, %v4084_v23  ;;  %v1102_v24 = vpop.f32.mrf.mxu1 }
 0x3b4   : > { %v4383_v3 = vadd.f32 %v1102_v24, %v4109_v42 }
 0x3b5   : > { %v1188_v51 = vsel %vm370_vm0, %v4373_v1, -inf }
 0x3b6   : > { %1189 = vmax.xlane.f32.xlu2 %v1188_v51  ;;  %v1203_v36 = vsel %vm370_vm0, %v4383_v3, -inf }
 0x3ba   : > { %v1063_v12 = vpop.f32.mrf.mxu3 }
 0x3bb   : > { %v4378_v46 = vadd.f32 %v1063_v12, %v4091_v30  ;;  %v1104_v59 = vpop.f32.mrf.mxu1 }
 0x3bc   : > { %v4394_v17 = vadd.f32 %v1104_v59, %v4130_v54 }
 0x3bd   : > { %v1191_v56 = vsel %vm370_vm0, %v4378_v46, -inf }
 0x3be   : > { %1192 = vmax.xlane.f32.xlu1 %v1191_v56 }
 0x3c2   : > { %v1065_v63 = vpop.f32.mrf.mxu3  ;;  %v1003_v44 = vpop.f32.mrf.mxu2 }
 0x3c3   : > { %v4386_v23 = vadd.f32 %v1065_v63, %v4124_v50  ;;  %1025 = vst.msk [vmem:[#allocation2 + $0x60] sm:$0xff] %vm490_vm1, %v1003_v44  ;;  %v1206_v50 = vsel %vm370_vm0, %v4394_v17, -inf }
 0x3c5   : > { %v1194_v30 = vsel %vm370_vm0, %v4386_v23, -inf }
 0x3c6   : > { %1204 = vmax.xlane.f32.xlu1 %v1203_v36  ;;  %1195 = vmax.xlane.f32.xlu0 %v1194_v30 }
 0x3ca   : > { %v1005_v42 = vpop.f32.mrf.mxu2  ;;  %v1175_v60 = vpop.f32.mrf.mxu3 }
 0x3cb   : > { %1026 = vst.msk [vmem:[#allocation2 + $0x68] sm:$0xff] %vm490_vm1, %v1005_v42  ;;  %v4402_v4 = vadd.f32 %v1175_v60, %v4145_v62 }
 0x3cd   : > { %v1221_v54 = vsel %vm370_vm0, %v4402_v4, -inf }
 0x3ce   : > { %1207 = vmax.xlane.f32.xlu0 %v1206_v50 }
 0x3d2   : > { %v1177_v18 = vpop.f32.mrf.mxu3 }
 0x3d3   : > { %v4408_v14 = vadd.f32 %v1177_v18, %v4152_v2 }
 0x3d5   : > { %v1224_v31 = vsel %vm370_vm0, %v4408_v14, -inf }
 0x3df   : > { %1667 = vrot.lane.b32.xlu1 %v3983_v6, %s3770_s20 }
 0x403   : > { %v1008_v9 = vpop.f32.mrf.mxu2 }
 0x404   : > { %1027 = vst.msk [vmem:[#allocation2 + $0x70] sm:$0xff] %vm490_vm1, %v1008_v9 }
 0x409   : > { %1222 = vmax.xlane.f32.xlu1 %v1221_v54 }
 0x40b   : > { %v1010_v53 = vpop.f32.mrf.mxu2 }
 0x40c   : > { %1028 = vst.msk [vmem:[#allocation2 + $0x78] sm:$0xff] %vm490_vm1, %v1010_v53 }
 0x411   : > { %1225 = vmax.xlane.f32.xlu1 %v1224_v31 }
 0x413   : > { %v1136_v62 = vpop.f32.mrf.mxu2 }
 0x414   : > { %v4414_v43 = vadd.f32 %v1136_v62, %v4063_v8  ;;  %v1180_v8 = vpop.f32.mrf.mxu3 }
 0x416   : > { %v1209_v38 = vsel %vm370_vm0, %v4414_v43, -inf }
 0x417   : > { %1210 = vmax.xlane.f32.xlu0 %v1209_v38 }
 0x41a   : > { %v1199_v11 = vpop.xlane.xlu2 %1198 }
 0x41b   : > { %v1138_v26 = vpop.f32.mrf.mxu2  ;;  %v1237_v40 = vsub.f32 %v4361_v61, %v1199_v11 }
 0x41c   : > { %v4419_v45 = vadd.f32 %v1138_v26, %v4107_v41  ;;  %v4429_v41 = vadd.f32 %v1180_v8, %v4161_v13 }
 0x41d   : > { %v1257_v35 = vmul.f32 1.442695, %v1237_v40 }
 0x41e   : > { %v1212_v2 = vsel %vm370_vm0, %v4419_v45, -inf  ;;  %v1227_v13 = vsel %vm370_vm0, %v4429_v41, -inf }
 0x41f   : > { %1213 = vmax.xlane.f32.xlu2 %v1212_v2 }
 0x421   : > { %v1187_v28 = vpop.xlane.xlu0 %1186 }
 0x422   : > { %v1233_v49 = vsub.f32 %v1059_v57, %v1187_v28  ;;  %v1182_v57 = vpop.f32.mrf.mxu3  ;;  %v1202_v61 = vpop.xlane.xlu1 %1201 }
 0x423   : > { %v1141_v15 = vpop.f32.mrf.mxu2  ;;  %v4443_v7 = vadd.f32 %v1182_v57, %v4172_v20  ;;  %v1238_v16 = vsub.f32 %v4367_v48, %v1202_v61 }
 0x424   : > { %v4424_v10 = vadd.f32 %v1141_v15, %v4103_v37  ;;  %v1249_v25 = vmul.f32 1.442695, %v1233_v49 }
 0x425   : > { %v1259_v12 = vmul.f32 1.442695, %v1238_v16 }
 0x426   : > { %v1215_v55 = vsel %vm370_vm0, %v4424_v10, -inf  ;;  %3354 = vpow2.f32 %v1249_v25 }
 0x427   : > { %1216 = vmax.xlane.f32.xlu2 %v1215_v55  ;;  %3356 = vpow2.f32 %v1257_v35 }
 0x429   : > { %v1190_v19 = vpop.xlane.xlu2 %1189 }
 0x42a   : > { %v1234_v47 = vsub.f32 %v4373_v1, %v1190_v19  ;;  %v1230_v1 = vsel %vm370_vm0, %v4443_v7, -inf }
 0x42b   : > { %v1143_v0 = vpop.f32.mrf.mxu2  ;;  %1624 = vrot.lane.b32.xlu0 %v3981_v5, %s3771_s29 }
 0x42c   : > { %v4435_v37 = vadd.f32 %v1143_v0, %v4128_v52  ;;  %v1251_v58 = vmul.f32 1.442695, %v1234_v47  ;;  %v4445_v52 = vpop.eup %3354 }
 0x42d   : > { %v1281_v51 = vsel %vm370_vm0, %v4445_v52, 0.0  ;;  %v4452_v24 = vpop.eup %3356 }
 0x42e   : > { %v1218_v21 = vsel %vm370_vm0, %v4435_v37, -inf  ;;  %3358 = vpow2.f32 %v1251_v58  ;;  %v1293_v44 = vsel %vm370_vm0, %v4452_v24, 0.0 }
 0x42f   : > { %1219 = vmax.xlane.f32.xlu1 %v1218_v21  ;;  %1228 = vmax.xlane.f32.xlu2 %v1227_v13  ;;  %3360 = vpow2.f32 %v1259_v12 }
 0x431   : > { %v1193_v20 = vpop.xlane.xlu1 %1192 }
 0x432   : > { %v1235_v63 = vsub.f32 %v4378_v46, %v1193_v20 }
 0x434   : > { %v4454_v56 = vpop.eup %3358  ;;  %v1253_v30 = vmul.f32 1.442695, %v1235_v63 }
 0x435   : > { %v1284_v48 = vsel %vm370_vm0, %v4454_v56, 0.0  ;;  %v4461_v59 = vpop.eup %3360 }
 0x436   : > { %3362 = vpow2.f32 %v1253_v30  ;;  %v1296_v50 = vsel %vm370_vm0, %v4461_v59, 0.0 }
 0x437   : > { %1231 = vmax.xlane.f32.xlu1 %v1230_v1  ;;  %1282 = vadd.xlane.f32.xlu2 %v1281_v51 }
 0x439   : > { %v1196_v36 = vpop.xlane.xlu0 %1195  ;;  %v1205_v46 = vpop.xlane.xlu1 %1204 }
 0x43a   : > { %v1236_v42 = vsub.f32 %v4386_v23, %v1196_v36  ;;  %v1239_v62 = vsub.f32 %v4383_v3, %v1205_v46 }
 0x43c   : > { %v1255_v60 = vmul.f32 1.442695, %v1236_v42  ;;  %v4466_v9 = vpop.eup %3362  ;;  %v1261_v38 = vmul.f32 1.442695, %v1239_v62 }
 0x43d   : > { %v1287_v54 = vsel %vm370_vm0, %v4466_v9, 0.0 }
 0x43e   : > { %3364 = vpow2.f32 %v1255_v60 }
 0x43f   : > { %1285 = vadd.xlane.f32.xlu1 %v1284_v48  ;;  %1294 = vadd.xlane.f32.xlu2 %v1293_v44  ;;  %3366 = vpow2.f32 %v1261_v38 }
 0x441   : > { %v1208_v26 = vpop.xlane.xlu0 %1207 }
 0x442   : > { %v1240_v2 = vsub.f32 %v4394_v17, %v1208_v26 }
 0x444   : > { %v4470_v53 = vpop.eup %3364  ;;  %v1263_v11 = vmul.f32 1.442695, %v1240_v2 }
 0x445   : > { %v1290_v23 = vsel %vm370_vm0, %v4470_v53, 0.0  ;;  %v4481_v15 = vpop.eup %3366 }
 0x446   : > { %3368 = vpow2.f32 %v1263_v11  ;;  %v1299_v55 = vsel %vm370_vm0, %v4481_v15, 0.0 }
 0x447   : > { %1297 = vadd.xlane.f32.xlu1 %v1296_v50 }
 0x44c   : > { %v4486_v3 = vpop.eup %3368 }
 0x44d   : > { %v1302_v40 = vsel %vm370_vm0, %v4486_v3, 0.0 }
 0x44f   : > { %1288 = vadd.xlane.f32.xlu1 %v1287_v54 }
 0x451   : > { %v1668_v18 = vpop.permute.xlu1 %1667 }
 0x452   : > { %v1679_v31 = vsel %vm490_vm1, %v1668_v18, 0 }
 0x453   : > { %1687 = vmatpush.bf16.xpose.msra.mxu1 %v1679_v31 }
 0x455   : > { %1291 = vadd.xlane.f32.xlu0 %v1290_v23 }
 0x457   : > { %1706 = vrot.lane.b32.xlu2 %v3991_v27, %s3770_s20 }
 0x468   : > { %1665 = vrot.lane.b32.xlu1 %v3993_v29, %s3770_s20 }
 0x47c   : > { %v1223_v28 = vpop.xlane.xlu1 %1222 }
 0x47d   : > { %v1245_v8 = vsub.f32 %v4402_v4, %v1223_v28 }
 0x47f   : > { %v1273_v49 = vmul.f32 1.442695, %v1245_v8 }
 0x480   : > { %1300 = vadd.xlane.f32.xlu2 %v1299_v55 }
 0x481   : > { %3370 = vpow2.f32 %v1273_v49 }
 0x484   : > { %v1226_v25 = vpop.xlane.xlu1 %1225 }
 0x485   : > { %v1246_v19 = vsub.f32 %v4408_v14, %v1226_v25 }
 0x487   : > { %v4489_v0 = vpop.eup %3370  ;;  %v1275_v17 = vmul.f32 1.442695, %v1246_v19 }
 0x488   : > { %v1317_v4 = vsel %vm370_vm0, %v4489_v0, 0.0  ;;  %1303 = vadd.xlane.f32.xlu2 %v1302_v40 }
 0x489   : > { %3372 = vpow2.f32 %v1275_v17  ;;  %1318 = vadd.xlane.f32.xlu0 %v1317_v4 }
 0x48a   : > { %v1211_v47 = vpop.xlane.xlu0 %1210 }
 0x48b   : > { %v1241_v21 = vsub.f32 %v4414_v43, %v1211_v47 }
 0x48d   : > { %v1265_v13 = vmul.f32 1.442695, %v1241_v21 }
 0x48f   : > { %v4496_v57 = vpop.eup %3372  ;;  %3374 = vpow2.f32 %v1265_v13 }
 0x490   : > { %v1320_v14 = vsel %vm370_vm0, %v4496_v57, 0.0 }
 0x492   : > { %v1214_v35 = vpop.xlane.xlu2 %1213  ;;  %1321 = vadd.xlane.f32.xlu1 %v1320_v14 }
 0x493   : > { %v1242_v58 = vsub.f32 %v4419_v45, %v1214_v35 }
 0x495   : > { %v4501_v61 = vpop.eup %3374  ;;  %v1267_v16 = vmul.f32 1.442695, %v1242_v58 }
 0x496   : > { %v1305_v1 = vsel %vm370_vm0, %v4501_v61, 0.0 }
 0x497   : > { %3376 = vpow2.f32 %v1267_v16  ;;  %1306 = vadd.xlane.f32.xlu2 %v1305_v1 }
 0x49a   : > { %v1217_v43 = vpop.xlane.xlu2 %1216 }
 0x49b   : > { %v1243_v51 = vsub.f32 %v4424_v10, %v1217_v43 }
 0x49d   : > { %v4506_v12 = vpop.eup %3376  ;;  %v1269_v20 = vmul.f32 1.442695, %v1243_v51  ;;  %v1625_v8 = vpop.permute.xlu0 %1624 }
 0x49e   : > { %v1308_v63 = vsel %vm370_vm0, %v4506_v12, 0.0 }
 0x49f   : > { %3378 = vpow2.f32 %v1269_v20  ;;  %1309 = vadd.xlane.f32.xlu0 %v1308_v63 }
 0x4a2   : > { %v1229_v45 = vpop.xlane.xlu2 %1228  ;;  %v4510_v48 = vpop.xlane.xlu1 %1219 }
 0x4a3   : > { %v1247_v13 = vsub.f32 %v4429_v41, %v1229_v45  ;;  %v1244_v63 = vsub.f32 %v4435_v37, %v4510_v48 }
 0x4a5   : > { %v4512_v44 = vpop.eup %3378  ;;  %v1277_v16 = vmul.f32 1.442695, %v1247_v13  ;;  %v1271_v41 = vmul.f32 1.442695, %v1244_v63 }
 0x4a6   : > { %v1311_v36 = vsel %vm370_vm0, %v4512_v44, 0.0 }
 0x4a7   : > { %1312 = vadd.xlane.f32.xlu0 %v1311_v36 }
 0x4aa   : > { %v1283_v30 = vpop.xlane.xlu2 %1282  ;;  %v1232_v42 = vpop.xlane.xlu1 %1231 }
 0x4ab   : > { %1512 = vrot.lane.b32.xlu1 %v4001_v33, %s3769_s11  ;;  %3380 = vrcp.f32 %v1283_v30  ;;  %v1248_v43 = vsub.f32 %v4443_v7, %v1232_v42 }
 0x4ad   : > { %v1279_v36 = vmul.f32 1.442695, %v1248_v43 }
 0x4af   : > { %1704 = vrot.lane.b32.xlu2 %v4003_v34, %s3770_s20 }
 0x4b1   : > { %v3381_v60 = vpop.eup %3380 }
 0x4b2   : > { %v1295_v10 = vpop.xlane.xlu2 %1294  ;;  %v1286_v50 = vpop.xlane.xlu1 %1285  ;;  %v1345_v46 = vmul.f32 %v3381_v60, %v4445_v52 }
 0x4b3   : > { %1700 = vrot.lane.b32.xlu1 %v4003_v34, %s3771_s29  ;;  %3382 = vrcp.f32 %v1286_v50 }
 0x4b4   : > { %3384 = vrcp.f32 %v1295_v10  ;;  %v1361_v62 = vpack.c.bf16 %v1345_v46, %v1345_v46 }
 0x4b6   : > { %v1381_v11 = vunpack.c.l.b16 %v1361_v62 }
 0x4b7   : > { %1510 = vrot.lane.b32.xlu2 %v3989_v22, %s3769_s11 }
 0x4b9   : > { %v3383_v54 = vpop.eup %3382 }
 0x4ba   : > { %v1707_v18 = vpop.permute.xlu2 %1706  ;;  %v1298_v31 = vpop.xlane.xlu1 %1297  ;;  %v1346_v38 = vmul.f32 %v3383_v54, %v4454_v56 }
 0x4bb   : > { %v3385_v23 = vpop.eup %3384  ;;  %v1718_v26 = vsel %vm490_vm1, %v1707_v18, 0  ;;  %3386 = vrcp.f32 %v1298_v31  ;;  %1661 = vrot.lane.b32.xlu0 %v3993_v29, %s3771_s29  ;;  %1663 = vrot.lane.b32.xlu1 %v3983_v6, %s3771_s29 }
 0x4bc   : > { %1726 = vmatpush.bf16.xpose.msra.mxu2 %v1718_v26  ;;  %v1362_v52 = vpack.c.bf16 %v1346_v38, %v1346_v38  ;;  %v1349_v2 = vmul.f32 %v3385_v23, %v4452_v24 }
 0x4be   : > { %v1382_v28 = vunpack.c.l.b16 %v1362_v52  ;;  %v1365_v25 = vpack.c.bf16 %v1349_v2, %v1349_v2 }
 0x4c0   : > { %v1385_v55 = vpack.c.b16 %v1382_v28, %v1381_v11  ;;  %v1422_v40 = vunpack.c.l.b16 %v1365_v25 }
 0x4c1   : > { %v3387_v49 = vpop.eup %3386 }
 0x4c2   : > { %v1350_v56 = vmul.f32 %v3387_v49, %v4461_v59  ;;  %v1289_v19 = vpop.xlane.xlu1 %1288  ;;  %3116 = vmatmul.msk.bf16.vlgmr.msrb.gmra.mxu0 %vm370_vm0, %v1385_v55 }
 0x4c3   : > { %3388 = vrcp.f32 %v1289_v19  ;;  %1702 = vrot.lane.b32.xlu1 %v3991_v27, %s3771_s29 }
 0x4c4   : > { %v1366_v17 = vpack.c.bf16 %v1350_v56, %v1350_v56 }
 0x4c6   : > { %v1423_v4 = vunpack.c.l.b16 %v1366_v17 }
 0x4c8   : > { %v1426_v47 = vpack.c.b16 %v1423_v4, %v1422_v40  ;;  %v1292_v24 = vpop.xlane.xlu0 %1291 }
 0x4c9   : > { %v3389_v21 = vpop.eup %3388  ;;  %3390 = vrcp.f32 %v1292_v24 }
 0x4ca   : > { %3118 = vmatmul.msk.bf16.vlgmr.msrb.gmra.mxu1 %vm370_vm0, %v1426_v47  ;;  %v1347_v59 = vmul.f32 %v3389_v21, %v4466_v9  ;;  %3392 = vpow2.f32 %v1277_v16 }
 0x4cb   : > { %1745 = vrot.lane.b32.xlu1 %v4001_v33, %s3770_s20  ;;  %3394 = vpow2.f32 %v1279_v36 }
 0x4cc   : > { %v1363_v58 = vpack.c.bf16 %v1347_v59, %v1347_v59  ;;  %3396 = vpow2.f32 %v1271_v41 }
 0x4ce   : > { %v1383_v51 = vunpack.c.l.b16 %v1363_v58 }
 0x4cf   : > { %v3391_v14 = vpop.eup %3390 }
 0x4d0   : > { %v1348_v35 = vmul.f32 %v3391_v14, %v4470_v53  ;;  %v4551_v45 = vpop.eup %3392 }
 0x4d1   : > { %v1323_v37 = vsel %vm370_vm0, %v4551_v45, 0.0  ;;  %v4555_v48 = vpop.eup %3394 }
 0x4d2   : > { %v1364_v1 = vpack.c.bf16 %v1348_v35, %v1348_v35  ;;  %v4559_v30 = vpop.eup %3396  ;;  %v1326_v42 = vsel %vm370_vm0, %v4555_v48, 0.0 }
 0x4d3   : > { %1739 = vrot.lane.b32.xlu1 %v3989_v22, %s3771_s29  ;;  %v1314_v10 = vsel %vm370_vm0, %v4559_v30, 0.0 }
 0x4d4   : > { %v1384_v20 = vunpack.c.l.b16 %v1364_v1 }
 0x4d6   : > { %v1386_v9 = vpack.c.b16 %v1384_v20, %v1383_v51 }
 0x4d8   : > { %3117 = vmatmul.msk.bf16.gmra.mxu0 %vm370_vm0, %v1386_v9 }
 0x4da   : > { %v1666_v53 = vpop.permute.xlu1 %1665 }
 0x4db   : > { %1980 = vrot.lane.b32.xlu1 %v3977_v39, %s3772_s18  ;;  %v1676_v7 = vsel %vm490_vm1, %v1666_v53, 0 }
 0x4dc   : > { %1688 = vmatpush.bf16.xpose.msra.mxu1 %v1676_v7 }
 0x4e0   : > { %1324 = vadd.xlane.f32.xlu2 %v1323_v37 }
 0x4e3   : > { %2023 = vrot.lane.b32.xlu1 %v3983_v6, %s3772_s18 }
 0x4e5   : > { %1327 = vadd.xlane.f32.xlu0 %v1326_v42 }
 0x4e8   : > { %1315 = vadd.xlane.f32.xlu2 %v1314_v10  ;;  %3124 = vmatmul.msk.bf16.vlgmr.msra.gmra.mxu0 %vm490_vm1, %v4342_v32 }
 0x4eb   : > { %2217 = vrot.lane.b32.xlu1 %v3981_v5, %s3773_s7 }
 0x4f3   : > { %v1301_v50 = vpop.xlane.xlu2 %1300  ;;  %2258 = vrot.lane.b32.xlu1 %v3993_v29, %s3774_s16 }
 0x4f4   : > { %3398 = vrcp.f32 %v1301_v50 }
 0x4f8   : > { %3125 = vmatmul.msk.bf16.gmra.mxu0 %vm490_vm1, %v1625_v8 }
 0x4f9   : > { %1741 = vrot.lane.b32.xlu0 %v4001_v33, %s3771_s29  ;;  %s2954_s29 = scalar_lea.hbm %s5374_s6, %s3185_s15 }
 0x4fa   : > { %v3399_v46 = vpop.eup %3398 }
 0x4fb   : > { %v1304_v60 = vpop.xlane.xlu2 %1303  ;;  %v1351_v32 = vmul.f32 %v3399_v46, %v4481_v15 }
 0x4fc   : > { %3400 = vrcp.f32 %v1304_v60  ;;  %v1319_v26 = vpop.xlane.xlu0 %1318 }
 0x4fd   : > { %v1367_v31 = vpack.c.bf16 %v1351_v32, %v1351_v32 }
 0x4ff   : > { %v1424_v62 = vunpack.c.l.b16 %v1367_v31 }
 0x500   : > { %1743 = vrot.lane.b32.xlu2 %v3989_v22, %s3770_s20 }
 0x501   : > { %1982 = vrot.lane.b32.xlu0 %v3981_v5, %s3772_s18 }
 0x502   : > { %v3401_v54 = vpop.eup %3400 }
 0x503   : > { %v1352_v18 = vmul.f32 %v3401_v54, %v4486_v3 }
 0x505   : > { %v1368_v23 = vpack.c.bf16 %v1352_v18, %v1352_v18  ;;  %v1322_v2 = vpop.xlane.xlu1 %1321 }
 0x507   : > { %v1425_v38 = vunpack.c.l.b16 %v1368_v23 }
 0x508   : > { %2221 = vrot.lane.b32.xlu2 %v3981_v5, %s3774_s16 }
 0x509   : > { %2219 = vrot.lane.b32.xlu0 %v3977_v39, %s3774_s16  ;;  %v1427_v15 = vpack.c.b16 %v1425_v38, %v1424_v62 }
 0x50a   : > { %v1307_v52 = vpop.xlane.xlu2 %1306 }
 0x50b   : > { %3119 = vmatmul.msk.bf16.gmra.mxu1 %vm370_vm0, %v1427_v15  ;;  %3402 = vrcp.f32 %v1307_v52 }
 0x50c   : > { %3404 = vrcp.f32 %v1322_v2 }
 0x50d   : > { %3406 = vrcp.f32 %v1319_v26 }
 0x510   : > { %2021 = vrot.lane.b32.xlu2 %v3993_v29, %s3772_s18 }
 0x511   : > { %2064 = vrot.lane.b32.xlu0 %v3991_v27, %s3772_s18  ;;  %v3403_v28 = vpop.eup %3402 }
 0x512   : > { %v1705_v3 = vpop.permute.xlu2 %1704  ;;  %v1310_v11 = vpop.xlane.xlu0 %1309  ;;  %v1353_v25 = vmul.f32 %v3403_v28, %v4501_v61 }
 0x513   : > { %3408 = vrcp.f32 %v1310_v11  ;;  %v1715_v8 = vsel %vm490_vm1, %v1705_v3, 0  ;;  %v3405_v49 = vpop.eup %3404 }
 0x514   : > { %1727 = vmatpush.bf16.xpose.msra.mxu2 %v1715_v8  ;;  %v3407_v55 = vpop.eup %3406  ;;  %v1358_v56 = vmul.f32 %v3405_v49, %v4496_v57  ;;  %v1369_v40 = vpack.c.bf16 %v1353_v25, %v1353_v25  ;;  %v4622_v49 = vld [vmem:[#allocation6] sm:$0xff] }
 0x515   : > { %v1357_v17 = vmul.f32 %v3407_v55, %v4489_v0 }
 0x516   : > { %v1374_v47 = vpack.c.bf16 %v1358_v56, %v1358_v56  ;;  %v1463_v13 = vunpack.c.l.b16 %v1369_v40 }
 0x517   : > { %v1373_v21 = vpack.c.bf16 %v1357_v17, %v1357_v17 }
 0x518   : > { %2215 = vrot.lane.b32.xlu2 %v3977_v39, %s3773_s7  ;;  %v1505_v57 = vunpack.c.l.b16 %v1374_v47 }
 0x519   : > { %v3409_v19 = vpop.eup %3408  ;;  %2062 = vrot.lane.b32.xlu0 %v4003_v34, %s3772_s18  ;;  %v1504_v35 = vunpack.c.l.b16 %v1373_v21 }
 0x51a   : > { %v1354_v4 = vmul.f32 %v3409_v19, %v4506_v12  ;;  %v1511_v0 = vpop.permute.xlu2 %1510  ;;  %v1313_v16 = vpop.xlane.xlu0 %1312 }
 0x51b   : > { %v1508_v58 = vpack.c.b16 %v1505_v57, %v1504_v35 }
 0x51c   : > { %v1370_v24 = vpack.c.bf16 %v1354_v4, %v1354_v4  ;;  %v4631_v4 = vld [vmem:[#allocation6 + $0x8] sm:$0xff] }
 0x51d   : > { %v1513_v59 = vpop.permute.xlu1 %1512 }
 0x51e   : > { %v1464_v61 = vunpack.c.l.b16 %v1370_v24  ;;  %1528 = vmatpush.bf16.msrb.mxu3 %v1513_v59 }
 0x520   : > { %v1467_v14 = vpack.c.b16 %v1464_v61, %v1463_v13  ;;  %2260 = vrot.lane.b32.xlu2 %v3983_v6, %s3774_s16 }
 0x522   : > { %3120 = vmatmul.msk.bf16.vlgmr.msrb.gmra.mxu2 %vm370_vm0, %v1467_v14  ;;  %1529 = vmatpush.bf16.msrb.mxu3 %v1511_v0 }
 0x525   : > { %3122 = vmatmul.msk.bf16.vlgmr.msrb.gmra.mxu3 %vm370_vm0, %v1508_v58  ;;  %v4602_v12 = vpop.permute.xlu1 %1700 }
 0x52d   : > { %v1662_v1 = vpop.permute.xlu0 %1661  ;;  %v1664_v43 = vpop.permute.xlu1 %1663 }
 0x52e   : > { %3126 = vmatmul.msk.bf16.vlgmr.msra.gmra.mxu1 %vm490_vm1, %v1662_v1 }
 0x535   : > { %v4605_v51 = vpop.permute.xlu1 %1702 }
 0x53d   : > { %v1746_v20 = vpop.permute.xlu1 %1745 }
 0x53e   : > { %v1757_v63 = vsel %vm490_vm1, %v1746_v20, 0  ;;  %3127 = vmatmul.msk.bf16.gmra.mxu1 %vm490_vm1, %v1664_v43 }
 0x53f   : > { %1765 = vmatpush.bf16.xpose.msra.mxu3 %v1757_v63  ;;  %v4609_v9 = vpop.f32.mrf.mxu0 }
 0x545   : > { %v1740_v36 = vpop.permute.xlu1 %1739 }
 0x547   : > { %v4611_v41 = vpop.f32.mrf.mxu0  ;;  %v4648_v1 = vpop.f32.mrf.mxu1 }
 0x54d   : > { %v1981_v53 = vpop.permute.xlu1 %1980 }
 0x54f   : > { %v4654_v63 = vpop.f32.mrf.mxu1 }
 0x553   : > { %v1325_v7 = vpop.xlane.xlu2 %1324 }
 0x554   : > { %3410 = vrcp.f32 %v1325_v7 }
 0x555   : > { %v4613_v37 = vpop.f32.mrf.mxu0  ;;  %v2024_v42 = vpop.permute.xlu1 %2023  ;;  %3412 = vrcp.f32 %v1313_v16 }
 0x556   : > { %2039 = vmatpush.bf16.msrb.mxu1 %v2024_v42 }
 0x558   : > { %v1328_v10 = vpop.xlane.xlu0 %1327 }
 0x559   : > { %3414 = vrcp.f32 %v1328_v10  ;;  %v4660_v10 = vld [vmem:[#allocation6 + $0x20] sm:$0xff] }
 0x55a   : > { %v3411_v50 = vpop.eup %3410 }
 0x55b   : > { %v1316_v60 = vpop.xlane.xlu2 %1315  ;;  %v3413_v46 = vpop.eup %3412  ;;  %v1359_v32 = vmul.f32 %v3411_v50, %v4551_v45 }
 0x55c   : > { %3416 = vrcp.f32 %v1316_v60  ;;  %v1355_v31 = vmul.f32 %v3413_v46, %v4512_v44  ;;  %v4667_v46 = vld [vmem:[#allocation6 + $0x18] sm:$0xff] }
 0x55d   : > { %v4616_v54 = vpop.f32.mrf.mxu0  ;;  %v1375_v62 = vpack.c.bf16 %v1359_v32, %v1359_v32  ;;  %v4644_v14 = vpop.permute.xlu1 %2217 }
 0x55e   : > { %v1371_v2 = vpack.c.bf16 %v1355_v31, %v1355_v31  ;;  %v4672_v31 = vld [vmem:[#allocation6 + $0x28] sm:$0xff] }
 0x55f   : > { %v3415_v18 = vpop.eup %3414  ;;  %v1506_v11 = vunpack.c.l.b16 %v1375_v62 }
 0x560   : > { %v1360_v23 = vmul.f32 %v3415_v18, %v4555_v48  ;;  %v1465_v55 = vunpack.c.l.b16 %v1371_v2  ;;  %v4686_v2 = vld [vmem:[#allocation6 + $0x30] sm:$0xff] }
 0x562   : > { %v3417_v38 = vpop.eup %3416  ;;  %v1376_v15 = vpack.c.bf16 %v1360_v23, %v1360_v23 }
 0x563   : > { %v1744_v26 = vpop.permute.xlu2 %1743  ;;  %v1356_v52 = vmul.f32 %v3417_v38, %v4559_v30 }
 0x564   : > { %v1754_v3 = vsel %vm490_vm1, %v1744_v26, 0  ;;  %v1507_v28 = vunpack.c.l.b16 %v1376_v15  ;;  %v4681_v15 = vld [vmem:[#allocation6 + $0x10] sm:$0xff] }
 0x565   : > { %v1651_v8 = vpop.f32.mrf.mxu0  ;;  %1766 = vmatpush.bf16.xpose.msra.mxu3 %v1754_v3  ;;  %v1372_v45 = vpack.c.bf16 %v1356_v52, %v1356_v52  ;;  %v2259_v43 = vpop.permute.xlu1 %2258 }
 0x566   : > { %v4625_v44 = vadd.f32 %v4622_v49, %v1651_v8  ;;  %v1509_v48 = vpack.c.b16 %v1507_v28, %v1506_v11 }
 0x567   : > { %v1466_v25 = vunpack.c.l.b16 %v1372_v45  ;;  %v4695_v45 = vld [vmem:[#allocation6 + $0x38] sm:$0xff] }
 0x568   : > { %3123 = vmatmul.msk.bf16.gmra.mxu3 %vm370_vm0, %v1509_v48  ;;  %v1778_v30 = vsel %vm370_vm0, %v4625_v44, -inf }
 0x569   : > { %1779 = vmax.xlane.f32.xlu1 %v1778_v30  ;;  %v1468_v56 = vpack.c.b16 %v1466_v25, %v1465_v55 }
 0x56b   : > { %3121 = vmatmul.msk.bf16.gmra.mxu2 %vm370_vm0, %v1468_v56  ;;  %v2222_v19 = vpop.permute.xlu2 %2221  ;;  %v1742_v17 = vpop.permute.xlu0 %1741 }
 0x56c   : > { %v2233_v13 = vsel %vm490_vm1, %v2222_v19, 0 }
 0x56d   : > { %v1653_v40 = vpop.f32.mrf.mxu0 }
 0x56e   : > { %v4634_v47 = vadd.f32 %v4631_v4, %v1653_v40 }
 0x570   : > { %v1781_v24 = vsel %vm370_vm0, %v4634_v47, -inf }
 0x571   : > { %1782 = vmax.xlane.f32.xlu0 %v1781_v24 }
 0x573   : > { %v2022_v21 = vpop.permute.xlu2 %2021  ;;  %v1983_v59 = vpop.permute.xlu0 %1982 }
 0x574   : > { %1998 = vmatpush.bf16.msrb.mxu0 %v1983_v59  ;;  %2040 = vmatpush.bf16.msrb.mxu1 %v2022_v21 }
 0x575   : > { %v1656_v7 = vpop.f32.mrf.mxu0 }
 0x576   : > { %v4684_v26 = vadd.f32 %v4681_v15, %v1656_v7 }
 0x578   : > { %3130 = vmatmul.msk.bf16.vlgmr.msra.gmra.mxu3 %vm490_vm1, %v1740_v36  ;;  %1999 = vmatpush.bf16.msrb.mxu0 %v1981_v53  ;;  %v1784_v11 = vsel %vm370_vm0, %v4684_v26, -inf }
 0x57b   : > { %v4640_v61 = vpop.permute.xlu2 %2215  ;;  %v2220_v57 = vpop.permute.xlu0 %2219  ;;  %3128 = vmatmul.msk.bf16.vlgmr.msra.gmra.mxu2 %vm490_vm1, %v4602_v12  ;;  %v2269_v12 = vsel %vm490_vm1, %v2259_v43, 0 }
 0x57c   : > { %2241 = vmatpush.bf16.xpose.msra.mxu0 %v2233_v13  ;;  %v2230_v35 = vsel %vm490_vm1, %v2220_v57, 0 }
 0x57d   : > { %v1658_v60 = vpop.f32.mrf.mxu0 }
 0x57e   : > { %v4670_v32 = vadd.f32 %v4667_v46, %v1658_v60 }
 0x580   : > { %v1787_v38 = vsel %vm370_vm0, %v4670_v32, -inf }
 0x583   : > { %v2261_v0 = vpop.permute.xlu2 %2260  ;;  %v2065_v58 = vpop.permute.xlu0 %2064 }
 0x584   : > { %2242 = vmatpush.bf16.xpose.msra.mxu0 %v2230_v35  ;;  %v2272_v16 = vsel %vm490_vm1, %v2261_v0, 0  ;;  %2080 = vmatpush.bf16.msrb.mxu2 %v2065_v58  ;;  %v4719_v0 = vld [vmem:[#allocation6 + $0x60] sm:$0xff] }
 0x585   : > { %2280 = vmatpush.bf16.xpose.msra.mxu1 %v2272_v16 }
 0x588   : > { %3131 = vmatmul.msk.bf16.gmra.mxu3 %vm490_vm1, %v1742_v17  ;;  %v4656_v36 = vpop.f32.mrf.mxu1 }
 0x58b   : > { %v2063_v20 = vpop.permute.xlu0 %2062  ;;  %3129 = vmatmul.msk.bf16.gmra.mxu2 %vm490_vm1, %v4605_v51 }
 0x58c   : > { %2081 = vmatpush.bf16.msrb.mxu2 %v2063_v20  ;;  %v4726_v20 = vld [vmem:[#allocation6 + $0x40] sm:$0xff] }
 0x58d   : > { %2281 = vmatpush.bf16.xpose.msra.mxu1 %v2269_v12 }
 0x590   : > { %v4658_v53 = vpop.f32.mrf.mxu1 }
 0x591   : > { %5385 = vst [vmem:[#allocation16_spill] sm:$0xff] %v4658_v53 }
 0x5a5   : > { %v4704_v30 = vpop.f32.mrf.mxu2 }
 0x5a6   : > { %5387 = vst [vmem:[#allocation18_spill] sm:$0xff] %v4704_v30 }
 0x5a8   : > { %v4702_v25 = vpop.f32.mrf.mxu3 }
 0x5a9   : > { %5386 = vst [vmem:[#allocation17_spill] sm:$0xff] %v4702_v25 }
 0x5ab   : > { %v1690_v42 = vpop.f32.mrf.mxu1 }
 0x5ac   : > { %v4663_v50 = vadd.f32 %v4660_v10, %v1690_v42 }
 0x5ad   : > { %v4708_v19 = vpop.f32.mrf.mxu2 }
 0x5ae   : > { %v1790_v51 = vsel %vm370_vm0, %v4663_v50, -inf  ;;  %5389 = vst [vmem:[#allocation20_spill] sm:$0xff] %v4708_v19 }
 0x5af   : > { %1791 = vmax.xlane.f32.xlu1 %v1790_v51  ;;  %v4735_v51 = vld [vmem:[#allocation6 + $0x68] sm:$0xff] }
 0x5b0   : > { %v4706_v56 = vpop.f32.mrf.mxu3 }
 0x5b1   : > { %5388 = vst [vmem:[#allocation19_spill] sm:$0xff] %v4706_v56 }
 0x5b3   : > { %v1692_v18 = vpop.f32.mrf.mxu1 }
 0x5b4   : > { %v4675_v23 = vadd.f32 %v4672_v31, %v1692_v18 }
 0x5b6   : > { %v1793_v62 = vsel %vm370_vm0, %v4675_v23, -inf }
 0x5b7   : > { %1794 = vmax.xlane.f32.xlu2 %v1793_v62  ;;  %1788 = vmax.xlane.f32.xlu1 %v1787_v38  ;;  %v4742_v38 = vld [vmem:[#allocation6 + $0x48] sm:$0xff] }
 0x5bb   : > { %v1695_v52 = vpop.f32.mrf.mxu1 }
 0x5bc   : > { %v4689_v3 = vadd.f32 %v4686_v2, %v1695_v52 }
 0x5be   : > { %v1796_v28 = vsel %vm370_vm0, %v4689_v3, -inf }
 0x5bf   : > { %1785 = vmax.xlane.f32.xlu2 %v1784_v11  ;;  %1797 = vmax.xlane.f32.xlu0 %v1796_v28 }
 0x5c3   : > { %v1697_v8 = vpop.f32.mrf.mxu1 }
 0x5c4   : > { %v4698_v48 = vadd.f32 %v4695_v45, %v1697_v8 }
 0x5c6   : > { %v1799_v55 = vsel %vm370_vm0, %v4698_v48, -inf }
 0x5c7   : > { %1800 = vmax.xlane.f32.xlu1 %v1799_v55  ;;  %v4751_v55 = vld [vmem:[#allocation6 + $0x70] sm:$0xff] }
 0x5dc   : > { %v1780_v24 = vpop.xlane.xlu1 %1779 }
 0x5dd   : > { %v1826_v59 = vsub.f32 %v4625_v44, %v1780_v24 }
 0x5df   : > { %v1842_v57 = vmul.f32 1.442695, %v1826_v59 }
 0x5e1   : > { %3418 = vpow2.f32 %v1842_v57  ;;  %v4756_v57 = vld [vmem:[#allocation6 + $0x50] sm:$0xff] }
 0x5e7   : > { %v4733_v7 = vpop.eup %3418 }
 0x5e8   : > { %v1874_v62 = vsel %vm370_vm0, %v4733_v7, 0.0 }
 0x5eb   : > { %v4710_v17 = vpop.f32.mrf.mxu3 }
 0x5ec   : > { %5390 = vst [vmem:[#allocation21_spill] sm:$0xff] %v4710_v17 }
 0x5ee   : > { %v4712_v40 = vpop.f32.mrf.mxu2 }
 0x5ef   : > { %5391 = vst [vmem:[#allocation22_spill] sm:$0xff] %v4712_v40 }
 0x5f3   : > { %v4714_v21 = vpop.f32.mrf.mxu3 }
 0x5f4   : > { %5392 = vst [vmem:[#allocation23_spill] sm:$0xff] %v4714_v21 }
 0x5f6   : > { %v4717_v13 = vpop.f32.mrf.mxu2 }
 0x5f7   : > { %5393 = vst [vmem:[#allocation24_spill] sm:$0xff] %v4717_v13 }
 0x5fb   : > { %v1768_v35 = vpop.f32.mrf.mxu3 }
 0x5fc   : > { %v4722_v58 = vadd.f32 %v4719_v0, %v1768_v35 }
 0x5fe   : > { %v1729_v16 = vpop.f32.mrf.mxu2  ;;  %v1814_v43 = vsel %vm370_vm0, %v4722_v58, -inf }
 0x5ff   : > { %v4729_v12 = vadd.f32 %v4726_v20, %v1729_v16  ;;  %1815 = vmax.xlane.f32.xlu1 %v1814_v43 }
 0x601   : > { %v1802_v44 = vsel %vm370_vm0, %v4729_v12, -inf }
 0x602   : > { %1803 = vmax.xlane.f32.xlu2 %v1802_v44 }
 0x603   : > { %v1770_v42 = vpop.f32.mrf.mxu3 }
 0x604   : > { %v4738_v60 = vadd.f32 %v4735_v51, %v1770_v42  ;;  %v4765_v42 = vld [vmem:[#allocation6 + $0x58] sm:$0xff] }
 0x606   : > { %v1731_v18 = vpop.f32.mrf.mxu2  ;;  %v1817_v28 = vsel %vm370_vm0, %v4738_v60, -inf }
 0x607   : > { %v4745_v52 = vadd.f32 %v4742_v38, %v1731_v18  ;;  %1875 = vadd.xlane.f32.xlu1 %v1874_v62 }
 0x609   : > { %v1805_v11 = vsel %vm370_vm0, %v4745_v52, -inf }
 0x60a   : > { %1806 = vmax.xlane.f32.xlu0 %v1805_v11  ;;  %1818 = vmax.xlane.f32.xlu2 %v1817_v28  ;;  %v4772_v28 = vld [vmem:[#allocation6 + $0x78] sm:$0xff] }
 0x60b   : > { %v1773_v8 = vpop.f32.mrf.mxu3 }
 0x60c   : > { %v4754_v24 = vadd.f32 %v4751_v55, %v1773_v8 }
 0x60e   : > { %v1734_v59 = vpop.f32.mrf.mxu2  ;;  %v1820_v16 = vsel %vm370_vm0, %v4754_v24, -inf }
 0x60f   : > { %v4759_v35 = vadd.f32 %v4756_v57, %v1734_v59 }
 0x611   : > { %v1808_v43 = vsel %vm370_vm0, %v4759_v35, -inf }
 0x612   : > { %1821 = vmax.xlane.f32.xlu0 %v1820_v16  ;;  %1809 = vmax.xlane.f32.xlu2 %v1808_v43  ;;  %v1783_v16 = vpop.xlane.xlu0 %1782 }
 0x613   : > { %v1775_v11 = vpop.f32.mrf.mxu3  ;;  %v1827_v21 = vsub.f32 %v4634_v47, %v1783_v16 }
 0x614   : > { %v4775_v8 = vadd.f32 %v4772_v28, %v1775_v11 }
 0x616   : > { %v1736_v44 = vpop.f32.mrf.mxu2  ;;  %v1823_v59 = vsel %vm370_vm0, %v4775_v8, -inf }
 0x617   : > { %v4768_v18 = vadd.f32 %v4765_v42, %v1736_v44 }
 0x619   : > { %v1811_v62 = vsel %vm370_vm0, %v4768_v18, -inf }
 0x61a   : > { %1812 = vmax.xlane.f32.xlu2 %v1811_v62  ;;  %v1844_v62 = vmul.f32 1.442695, %v1827_v21 }
 0x620   : > { %2254 = vrot.lane.b32.xlu1 %v3993_v29, %s3773_s7 }
 0x622   : > { %1824 = vmax.xlane.f32.xlu2 %v1823_v59  ;;  %v1792_v43 = vpop.xlane.xlu1 %1791 }
 0x623   : > { %v1830_v44 = vsub.f32 %v4663_v50, %v1792_v43 }
 0x625   : > { %v1850_v56 = vmul.f32 1.442695, %v1830_v44 }
 0x627   : > { %3420 = vpow2.f32 %v1850_v56 }
 0x628   : > { %3422 = vpow2.f32 %v1844_v62 }
 0x62a   : > { %v1795_v13 = vpop.xlane.xlu2 %1794  ;;  %v1789_v59 = vpop.xlane.xlu1 %1788 }
 0x62b   : > { %v1831_v11 = vsub.f32 %v4675_v23, %v1795_v13  ;;  %v1829_v50 = vsub.f32 %v4670_v32, %v1789_v59 }
 0x62d   : > { %v4783_v17 = vpop.eup %3420  ;;  %v1852_v19 = vmul.f32 1.442695, %v1831_v11 }
 0x62e   : > { %v1886_v25 = vsel %vm370_vm0, %v4783_v17, 0.0  ;;  %v4788_v30 = vpop.eup %3422 }
 0x62f   : > { %1887 = vadd.xlane.f32.xlu2 %v1886_v25  ;;  %3424 = vpow2.f32 %v1852_v19  ;;  %v1877_v16 = vsel %vm370_vm0, %v4788_v30, 0.0  ;;  %v1848_v25 = vmul.f32 1.442695, %v1829_v50 }
 0x632   : > { %v1786_v40 = vpop.xlane.xlu2 %1785  ;;  %v1798_v21 = vpop.xlane.xlu0 %1797 }
 0x633   : > { %v1828_v47 = vsub.f32 %v4684_v26, %v1786_v40  ;;  %v1832_v23 = vsub.f32 %v4689_v3, %v1798_v21 }
 0x635   : > { %v1846_v56 = vmul.f32 1.442695, %v1828_v47  ;;  %v4795_v13 = vpop.eup %3424  ;;  %v1854_v43 = vmul.f32 1.442695, %v1832_v23 }
 0x636   : > { %v1889_v32 = vsel %vm370_vm0, %v4795_v13, 0.0 }
 0x637   : > { %3426 = vpow2.f32 %v1846_v56  ;;  %1878 = vadd.xlane.f32.xlu2 %v1877_v16 }
 0x638   : > { %3428 = vpow2.f32 %v1848_v25 }
 0x639   : > { %3430 = vpow2.f32 %v1854_v43 }
 0x63a   : > { %v1801_v11 = vpop.xlane.xlu1 %1800 }
 0x63b   : > { %v1833_v59 = vsub.f32 %v4698_v48, %v1801_v11 }
 0x63d   : > { %v4797_v44 = vpop.eup %3426  ;;  %v1856_v47 = vmul.f32 1.442695, %v1833_v59 }
 0x63e   : > { %v1880_v26 = vsel %vm370_vm0, %v4797_v44, 0.0  ;;  %v4803_v19 = vpop.eup %3428 }
 0x63f   : > { %1881 = vadd.xlane.f32.xlu0 %v1880_v26  ;;  %1890 = vadd.xlane.f32.xlu2 %v1889_v32  ;;  %v4805_v40 = vpop.eup %3430  ;;  %v1883_v3 = vsel %vm370_vm0, %v4803_v19, 0.0  ;;  %3432 = vpow2.f32 %v1856_v47 }
 0x640   : > { %v1892_v62 = vsel %vm370_vm0, %v4805_v40, 0.0 }
 0x645   : > { %v4818_v43 = vpop.eup %3432 }
 0x646   : > { %v1895_v26 = vsel %vm370_vm0, %v4818_v43, 0.0 }
 0x647   : > { %1884 = vadd.xlane.f32.xlu2 %v1883_v3 }
 0x64a   : > { %1893 = vadd.xlane.f32.xlu1 %v1892_v62 }
 0x653   : > { %2297 = vrot.lane.b32.xlu0 %v4003_v34, %s3774_s16 }
 0x65f   : > { %2299 = vrot.lane.b32.xlu2 %v3991_v27, %s3774_s16 }
 0x672   : > { %v1816_v50 = vpop.xlane.xlu1 %1815 }
 0x673   : > { %v1838_v56 = vsub.f32 %v4722_v58, %v1816_v50 }
 0x675   : > { %v1866_v21 = vmul.f32 1.442695, %v1838_v56  ;;  %v1804_v16 = vpop.xlane.xlu2 %1803 }
 0x676   : > { %v1834_v23 = vsub.f32 %v4729_v12, %v1804_v16 }
 0x677   : > { %3434 = vpow2.f32 %v1866_v21 }
 0x678   : > { %v1858_v25 = vmul.f32 1.442695, %v1834_v23 }
 0x67a   : > { %3436 = vpow2.f32 %v1858_v25 }
 0x67d   : > { %v4822_v32 = vpop.eup %3434  ;;  %v1807_v48 = vpop.xlane.xlu0 %1806  ;;  %1896 = vadd.xlane.f32.xlu0 %v1895_v26 }
 0x67e   : > { %v1819_v3 = vpop.xlane.xlu2 %1818  ;;  %v1835_v62 = vsub.f32 %v4745_v52, %v1807_v48  ;;  %v1910_v12 = vsel %vm370_vm0, %v4822_v32, 0.0 }
 0x67f   : > { %v1839_v58 = vsub.f32 %v4738_v60, %v1819_v3  ;;  %1911 = vadd.xlane.f32.xlu1 %v1910_v12 }
 0x680   : > { %v1860_v11 = vmul.f32 1.442695, %v1835_v62  ;;  %v4828_v47 = vpop.eup %3436 }
 0x681   : > { %v1868_v59 = vmul.f32 1.442695, %v1839_v58  ;;  %v1898_v50 = vsel %vm370_vm0, %v4828_v47, 0.0 }
 0x682   : > { %3438 = vpow2.f32 %v1860_v11 }
 0x683   : > { %3440 = vpow2.f32 %v1868_v59  ;;  %v1876_v59 = vpop.xlane.xlu1 %1875 }
 0x685   : > { %1899 = vadd.xlane.f32.xlu0 %v1898_v50 }
 0x686   : > { %v1810_v56 = vpop.xlane.xlu2 %1809 }
 0x687   : > { %v1836_v21 = vsub.f32 %v4759_v35, %v1810_v56 }
 0x688   : > { %v4833_v52 = vpop.eup %3438 }
 0x689   : > { %v1862_v60 = vmul.f32 1.442695, %v1836_v21  ;;  %v4835_v16 = vpop.eup %3440  ;;  %v1901_v23 = vsel %vm370_vm0, %v4833_v52, 0.0 }
 0x68a   : > { %v1913_v25 = vsel %vm370_vm0, %v4835_v16, 0.0  ;;  %1902 = vadd.xlane.f32.xlu1 %v1901_v23 }
 0x68b   : > { %3442 = vpow2.f32 %v1862_v60  ;;  %1914 = vadd.xlane.f32.xlu2 %v1913_v25 }
 0x68e   : > { %v1813_v26 = vpop.xlane.xlu2 %1812 }
 0x68f   : > { %v1837_v48 = vsub.f32 %v4768_v18, %v1813_v26  ;;  %v1822_v18 = vpop.xlane.xlu0 %1821 }
 0x691   : > { %v1864_v3 = vmul.f32 1.442695, %v1837_v48  ;;  %v4842_v62 = vpop.eup %3442 }
 0x692   : > { %v1904_v35 = vsel %vm370_vm0, %v4842_v62, 0.0 }
 0x693   : > { %3444 = vpow2.f32 %v1864_v3  ;;  %1905 = vadd.xlane.f32.xlu2 %v1904_v35 }
 0x694   : > { %3446 = vrcp.f32 %v1876_v59 }
 0x696   : > { %v1825_v11 = vpop.xlane.xlu2 %1824 }
 0x699   : > { %v4846_v58 = vpop.eup %3444 }
 0x69a   : > { %v1907_v12 = vsel %vm370_vm0, %v4846_v58, 0.0  ;;  %v3447_v21 = vpop.eup %3446 }
 0x69b   : > { %1908 = vadd.xlane.f32.xlu0 %v1907_v12  ;;  %v1938_v60 = vmul.f32 %v3447_v21, %v4733_v7 }
 0x69d   : > { %v1954_v25 = vpack.c.bf16 %v1938_v60, %v1938_v60 }
 0x69f   : > { %v1974_v59 = vunpack.c.l.b16 %v1954_v25 }
 0x6a2   : > { %v1888_v50 = vpop.xlane.xlu2 %1887 }
 0x6a3   : > { %2105 = vrot.lane.b32.xlu1 %v4001_v33, %s3772_s18 }
 0x6aa   : > { %v1879_v56 = vpop.xlane.xlu2 %1878 }
 0x6ab   : > { %3448 = vrcp.f32 %v1879_v56  ;;  %2103 = vrot.lane.b32.xlu2 %v3989_v22, %s3772_s18  ;;  %2293 = vrot.lane.b32.xlu1 %v4003_v34, %s3773_s7  ;;  %s2955_s18 = sshll.u32 %s5273_s13, 4  ;;  %s2956_s18 = int_to_ptr.vmem [resolvable:$true] %s2955_s18 }
 0x6ac   : > { %3450 = vrcp.f32 %v1888_v50 }
 0x6af   : > { %2256 = vrot.lane.b32.xlu0 %v3983_v6, %s3773_s7 }
 0x6b1   : > { %v3449_v23 = vpop.eup %3448 }
 0x6b2   : > { %v1939_v26 = vmul.f32 %v3449_v23, %v4788_v30  ;;  %v1882_v48 = vpop.xlane.xlu0 %1881  ;;  %v1891_v3 = vpop.xlane.xlu2 %1890 }
 0x6b3   : > { %2295 = vrot.lane.b32.xlu1 %v3991_v27, %s3773_s7  ;;  %v3451_v35 = vpop.eup %3450  ;;  %3452 = vrcp.f32 %v1891_v3 }
 0x6b4   : > { %v1955_v12 = vpack.c.bf16 %v1939_v26, %v1939_v26  ;;  %3454 = vrcp.f32 %v1882_v48  ;;  %v1942_v7 = vmul.f32 %v3451_v35, %v4783_v17  ;;  %v1841_v35 = vsub.f32 %v4775_v8, %v1825_v11 }
 0x6b6   : > { %v1975_v56 = vunpack.c.l.b16 %v1955_v12  ;;  %v1958_v30 = vpack.c.bf16 %v1942_v7, %v1942_v7  ;;  %v1872_v7 = vmul.f32 1.442695, %v1841_v35 }
 0x6b8   : > { %v1978_v50 = vpack.c.b16 %v1975_v56, %v1974_v59  ;;  %v2015_v25 = vunpack.c.l.b16 %v1958_v30 }
 0x6b9   : > { %v3453_v21 = vpop.eup %3452 }
 0x6ba   : > { %v1885_v53 = vpop.xlane.xlu2 %1884  ;;  %3132 = vmatmul.msk.bf16.vlgmr.msrb.gmra.mxu0 %vm370_vm0, %v1978_v50  ;;  %v3455_v60 = vpop.eup %3454  ;;  %v1943_v23 = vmul.f32 %v3453_v21, %v4795_v13 }
 0x6bb   : > { %3456 = vrcp.f32 %v1885_v53  ;;  %2338 = vrot.lane.b32.xlu1 %v4001_v33, %s3774_s16  ;;  %v1940_v48 = vmul.f32 %v3455_v60, %v4797_v44  ;;  %v1840_v44 = vsub.f32 %v4754_v24, %v1822_v18 }
 0x6bc   : > { %v1959_v26 = vpack.c.bf16 %v1943_v23, %v1943_v23  ;;  %3458 = vpow2.f32 %v1872_v7 }
 0x6bd   : > { %v1956_v50 = vpack.c.bf16 %v1940_v48, %v1940_v48  ;;  %v1870_v11 = vmul.f32 1.442695, %v1840_v44  ;;  %v2255_v48 = vpop.permute.xlu1 %2254 }
 0x6be   : > { %v2016_v3 = vunpack.c.l.b16 %v1959_v26 }
 0x6bf   : > { %v1976_v21 = vunpack.c.l.b16 %v1956_v50  ;;  %3460 = vpow2.f32 %v1870_v11 }
 0x6c0   : > { %v2019_v17 = vpack.c.b16 %v2016_v3, %v2015_v25 }
 0x6c1   : > { %v3457_v12 = vpop.eup %3456 }
 0x6c2   : > { %v2300_v59 = vpop.permute.xlu2 %2299  ;;  %v1941_v56 = vmul.f32 %v3457_v12, %v4803_v19  ;;  %3134 = vmatmul.msk.bf16.vlgmr.msrb.gmra.mxu1 %vm370_vm0, %v2019_v17  ;;  %v4879_v23 = vpop.eup %3458 }
 0x6c3   : > { %v2311_v53 = vsel %vm490_vm1, %v2300_v59, 0  ;;  %2336 = vrot.lane.b32.xlu1 %v3989_v22, %s3774_s16  ;;  %v1919_v24 = vsel %vm370_vm0, %v4879_v23, 0.0  ;;  %s2942_s16 = scalar_lea.sflag [#allocation5], %s3930_s26 }
 0x6c4   : > { %2319 = vmatpush.bf16.xpose.msra.mxu2 %v2311_v53  ;;  %v1957_v13 = vpack.c.bf16 %v1941_v56, %v1941_v56 }
 0x6c5   : > { %v2298_v30 = vpop.permute.xlu0 %2297  ;;  %v4883_v18 = vpop.eup %3460 }
 0x6c6   : > { %v1977_v60 = vunpack.c.l.b16 %v1957_v13  ;;  %v2308_v19 = vsel %vm490_vm1, %v2298_v30, 0  ;;  %v1916_v26 = vsel %vm370_vm0, %v4883_v18, 0.0  ;;  %v1894_v25 = vpop.xlane.xlu1 %1893 }
 0x6c7   : > { %3462 = vrcp.f32 %v1894_v25 }
 0x6c8   : > { %v1979_v8 = vpack.c.b16 %v1977_v60, %v1976_v21 }
 0x6ca   : > { %3133 = vmatmul.msk.bf16.gmra.mxu0 %vm370_vm0, %v1979_v8 }
 0x6cb   : > { %2575 = vrot.lane.b32.xlu1 %v3981_v5, %s3775_s19 }
 0x6cc   : > { %2320 = vmatpush.bf16.xpose.msra.mxu2 %v2308_v19 }
 0x6cd   : > { %v3463_v3 = vpop.eup %3462 }
 0x6ce   : > { %v1944_v12 = vmul.f32 %v3463_v3, %v4805_v40 }
 0x6d0   : > { %v1960_v35 = vpack.c.bf16 %v1944_v12, %v1944_v12 }
 0x6d2   : > { %v2017_v50 = vunpack.c.l.b16 %v1960_v35 }
 0x6d4   : > { %1920 = vadd.xlane.f32.xlu2 %v1919_v24 }
 0x6d9   : > { %1917 = vadd.xlane.f32.xlu0 %v1916_v26 }
 0x6da   : > { %3140 = vmatmul.msk.bf16.vlgmr.msra.gmra.mxu0 %vm490_vm1, %v4640_v61 }
 0x6ea   : > { %3141 = vmatmul.msk.bf16.gmra.mxu0 %vm490_vm1, %v4644_v14 }
 0x6ec   : > { %2334 = vrot.lane.b32.xlu2 %v4001_v33, %s3773_s7 }
 0x6ed   : > { %2332 = vrot.lane.b32.xlu0 %v3989_v22, %s3773_s7  ;;  %s2957_s7 = sshll.u32 %s2954_s29, 4  ;;  %s2958_s7 = int_to_ptr.hbm [resolvable:$true] %s2957_s7 }
 0x6ee   : > { %s3696_s25 = sshra.s32 %s2958_s7, 4  ;;  %s3697_s25 = int_to_ptr.hbm [resolvable:$true] %s3696_s25 }
 0x6ef   : > { %p3703_p11 = scmp.lt.s32.totalorder %s3697_s25, %s5374_s6 }
 0x6f0   : > { %v1897_v5 = vpop.xlane.xlu0 %1896 }
 0x6f1   : > { %3464 = vrcp.f32 %v1897_v5 }
 0x6f2   : > { %v1912_v61 = vpop.xlane.xlu1 %1911 }
 0x6f4   : > { %2573 = vrot.lane.b32.xlu2 %v3977_v39, %s3775_s19 }
 0x6f7   : > { %v3465_v17 = vpop.eup %3464 }
 0x6f8   : > { %v1945_v14 = vmul.f32 %v3465_v17, %v4818_v43  ;;  %v1900_v59 = vpop.xlane.xlu0 %1899 }
 0x6f9   : > { %3466 = vrcp.f32 %v1900_v59 }
 0x6fa   : > { %v1961_v56 = vpack.c.bf16 %v1945_v14, %v1945_v14 }
 0x6fc   : > { %v2018_v53 = vunpack.c.l.b16 %v1961_v56 }
 0x6fd   : > { %v1903_v13 = vpop.xlane.xlu1 %1902 }
 0x6fe   : > { %v1915_v44 = vpop.xlane.xlu2 %1914  ;;  %3468 = vrcp.f32 %v1903_v13  ;;  %v2020_v7 = vpack.c.b16 %v2018_v53, %v2017_v50 }
 0x6ff   : > { %v3467_v21 = vpop.eup %3466  ;;  %3470 = vrcp.f32 %v1915_v44 }
 0x700   : > { %3135 = vmatmul.msk.bf16.gmra.mxu1 %vm370_vm0, %v2020_v7  ;;  %v1946_v40 = vmul.f32 %v3467_v21, %v4828_v47  ;;  %3472 = vrcp.f32 %v1912_v61 }
 0x702   : > { %v1962_v60 = vpack.c.bf16 %v1946_v40, %v1946_v40 }
 0x704   : > { %v3469_v39 = vpop.eup %3468  ;;  %v2056_v11 = vunpack.c.l.b16 %v1962_v60 }
 0x705   : > { %v1947_v30 = vmul.f32 %v3469_v39, %v4833_v52  ;;  %v3471_v26 = vpop.eup %3470 }
 0x706   : > { %v1906_v43 = vpop.xlane.xlu2 %1905  ;;  %v3473_v25 = vpop.eup %3472  ;;  %v1951_v47 = vmul.f32 %v3471_v26, %v4835_v16 }
 0x707   : > { %v1963_v8 = vpack.c.bf16 %v1947_v30, %v1947_v30  ;;  %3474 = vrcp.f32 %v1906_v43  ;;  %v1950_v52 = vmul.f32 %v3473_v25, %v4822_v32 }
 0x708   : > { %v1967_v61 = vpack.c.bf16 %v1951_v47, %v1951_v47 }
 0x709   : > { %v2057_v19 = vunpack.c.l.b16 %v1963_v8  ;;  %v1966_v35 = vpack.c.bf16 %v1950_v52, %v1950_v52 }
 0x70a   : > { %v2098_v50 = vunpack.c.l.b16 %v1967_v61 }
 0x70b   : > { %v2060_v24 = vpack.c.b16 %v2057_v19, %v2056_v11  ;;  %v2097_v13 = vunpack.c.l.b16 %v1966_v35 }
 0x70d   : > { %3136 = vmatmul.msk.bf16.vlgmr.msrb.gmra.mxu2 %vm370_vm0, %v2060_v24  ;;  %v3475_v3 = vpop.eup %3474 }
 0x70e   : > { %v1909_v5 = vpop.xlane.xlu0 %1908  ;;  %v1948_v12 = vmul.f32 %v3475_v3, %v4842_v62  ;;  %v2104_v7 = vpop.permute.xlu2 %2103 }
 0x70f   : > { %3476 = vrcp.f32 %v1909_v5 }
 0x710   : > { %3142 = vmatmul.msk.bf16.vlgmr.msra.gmra.mxu1 %vm490_vm1, %v2255_v48  ;;  %v1964_v14 = vpack.c.bf16 %v1948_v12, %v1948_v12  ;;  %v2101_v48 = vpack.c.b16 %v2098_v50, %v2097_v13 }
 0x712   : > { %v2058_v44 = vunpack.c.l.b16 %v1964_v14 }
 0x715   : > { %v3477_v17 = vpop.eup %3476  ;;  %v2106_v56 = vpop.permute.xlu1 %2105 }
 0x716   : > { %v1949_v59 = vmul.f32 %v3477_v17, %v4846_v58  ;;  %2121 = vmatpush.bf16.msrb.mxu3 %v2106_v56 }
 0x718   : > { %v1965_v53 = vpack.c.bf16 %v1949_v59, %v1949_v59 }
 0x71a   : > { %v2059_v16 = vunpack.c.l.b16 %v1965_v53  ;;  %2122 = vmatpush.bf16.msrb.mxu3 %v2104_v7 }
 0x71c   : > { %v2061_v21 = vpack.c.b16 %v2059_v16, %v2058_v44 }
 0x71d   : > { %3138 = vmatmul.msk.bf16.vlgmr.msrb.gmra.mxu3 %vm370_vm0, %v2101_v48  ;;  %v2294_v32 = vpop.permute.xlu1 %2293 }
 0x71e   : > { %3137 = vmatmul.msk.bf16.gmra.mxu2 %vm370_vm0, %v2061_v21 }
 0x721   : > { %v2257_v62 = vpop.permute.xlu0 %2256 }
 0x722   : > { %3143 = vmatmul.msk.bf16.gmra.mxu1 %vm490_vm1, %v2257_v62 }
 0x725   : > { %v2296_v58 = vpop.permute.xlu1 %2295 }
 0x72d   : > { %v2339_v40 = vpop.permute.xlu1 %2338 }
 0x72e   : > { %3144 = vmatmul.msk.bf16.vlgmr.msra.gmra.mxu2 %vm490_vm1, %v2294_v32  ;;  %v2350_v39 = vsel %vm490_vm1, %v2339_v40, 0 }
 0x72f   : > { %2358 = vmatpush.bf16.xpose.msra.mxu3 %v2350_v39 }
 0x735   : > { %v2337_v60 = vpop.permute.xlu1 %2336 }
 0x736   : > { %v2347_v30 = vsel %vm490_vm1, %v2337_v60, 0 }
 0x737   : > { %v4914_v43 = vpop.f32.mrf.mxu0  ;;  %2359 = vmatpush.bf16.xpose.msra.mxu3 %v2347_v30 }
 0x73d   : > { %v2576_v8 = vpop.permute.xlu1 %2575 }
 0x73e   : > { %3145 = vmatmul.msk.bf16.gmra.mxu2 %vm490_vm1, %v2296_v58  ;;  %2591 = vmatpush.bf16.msrb.mxu0 %v2576_v8 }
 0x73f   : > { %v4917_v11 = vpop.f32.mrf.mxu0  ;;  %v4938_v21 = vpop.f32.mrf.mxu1 }
 0x747   : > { %v1921_v19 = vpop.xlane.xlu2 %1920  ;;  %v4919_v24 = vpop.f32.mrf.mxu0 }
 0x748   : > { %3478 = vrcp.f32 %v1921_v19  ;;  %v4941_v32 = vpop.f32.mrf.mxu1 }
 0x74c   : > { %v1918_v26 = vpop.xlane.xlu0 %1917 }
 0x74d   : > { %3480 = vrcp.f32 %v1918_v26 }
 0x74e   : > { %v3479_v25 = vpop.eup %3478 }
 0x74f   : > { %v1953_v5 = vmul.f32 %v3479_v25, %v4879_v23  ;;  %v2335_v3 = vpop.permute.xlu2 %2334  ;;  %v4922_v47 = vpop.f32.mrf.mxu0 }
 0x751   : > { %v1969_v12 = vpack.c.bf16 %v1953_v5, %v1953_v5 }
 0x753   : > { %v3481_v52 = vpop.eup %3480  ;;  %v2100_v35 = vunpack.c.l.b16 %v1969_v12 }
 0x754   : > { %v1952_v61 = vmul.f32 %v3481_v52, %v4883_v18 }
 0x756   : > { %v1968_v17 = vpack.c.bf16 %v1952_v61, %v1952_v61 }
 0x757   : > { %v2574_v59 = vpop.permute.xlu2 %2573  ;;  %v2244_v56 = vpop.f32.mrf.mxu0 }
 0x758   : > { %v2099_v14 = vunpack.c.l.b16 %v1968_v17  ;;  %v4926_v50 = vadd.f32 %v4622_v49, %v2244_v56  ;;  %2592 = vmatpush.bf16.msrb.mxu0 %v2574_v59 }
 0x75a   : > { %v2102_v53 = vpack.c.b16 %v2100_v35, %v2099_v14  ;;  %v2371_v23 = vsel %vm370_vm0, %v4926_v50, -inf }
 0x75b   : > { %2372 = vmax.xlane.f32.xlu1 %v2371_v23 }
 0x75c   : > { %3139 = vmatmul.msk.bf16.gmra.mxu3 %vm370_vm0, %v2102_v53 }
 0x75f   : > { %v2246_v13 = vpop.f32.mrf.mxu0  ;;  %v2333_v49 = vpop.permute.xlu0 %2332 }
 0x760   : > { %v2247_v44 = vadd.f32 %v4631_v4, %v2246_v13 }
 0x762   : > { %v2374_v18 = vsel %vm370_vm0, %v2247_v44, -inf }
 0x763   : > { %2375 = vmax.xlane.f32.xlu0 %v2374_v18 }
 0x767   : > { %v2249_v7 = vpop.f32.mrf.mxu0 }
 0x768   : > { %v4934_v16 = vadd.f32 %v4681_v15, %v2249_v7 }
 0x76a   : > { %v2377_v48 = vsel %vm370_vm0, %v4934_v16, -inf }
 0x76b   : > { %2378 = vmax.xlane.f32.xlu2 %v2377_v48 }
 0x76c   : > { %3146 = vmatmul.msk.bf16.vlgmr.msra.gmra.mxu3 %vm490_vm1, %v2333_v49 }
 0x77c   : > { %3147 = vmatmul.msk.bf16.gmra.mxu3 %vm490_vm1, %v2335_v3  ;;  %v2251_v3 = vpop.f32.mrf.mxu0 }
 0x77d   : > { %v4944_v4 = vpop.f32.mrf.mxu1 }
 0x785   : > { %v4946_v62 = vpop.f32.mrf.mxu1 }
 0x78d   : > { %v2283_v58 = vpop.f32.mrf.mxu1 }
 0x78e   : > { %v2284_v15 = vadd.f32 %v4660_v10, %v2283_v58 }
 0x790   : > { %v4949_v40 = vpop.f32.mrf.mxu2  ;;  %v2383_v39 = vsel %vm370_vm0, %v2284_v15, -inf }
 0x791   : > { %2384 = vmax.xlane.f32.xlu1 %v2383_v39 }
 0x795   : > { %v2285_v60 = vpop.f32.mrf.mxu1 }
 0x796   : > { %v4953_v30 = vadd.f32 %v4672_v31, %v2285_v60  ;;  %v4967_v31 = vadd.f32 %v4667_v46, %v2251_v3 }
 0x798   : > { %v4955_v8 = vpop.f32.mrf.mxu2  ;;  %v2386_v19 = vsel %vm370_vm0, %v4953_v30, -inf  ;;  %v2380_v17 = vsel %vm370_vm0, %v4967_v31, -inf }
 0x799   : > { %2387 = vmax.xlane.f32.xlu0 %v2386_v19 }
 0x79f   : > { %v2288_v26 = vpop.f32.mrf.mxu1 }
 0x7a0   : > { %v4960_v25 = vadd.f32 %v4686_v2, %v2288_v26  ;;  %v4988_v13 = vpop.f32.mrf.mxu3 }
 0x7a1   : > { %v4962_v10 = vpop.f32.mrf.mxu2 }
 0x7a2   : > { %v2389_v5 = vsel %vm370_vm0, %v4960_v25, -inf }
 0x7a3   : > { %2390 = vmax.xlane.f32.xlu1 %v2389_v5 }
 0x7a7   : > { %v2290_v52 = vpop.f32.mrf.mxu1 }
 0x7a8   : > { %v4970_v12 = vadd.f32 %v4695_v45, %v2290_v52  ;;  %v4990_v18 = vpop.f32.mrf.mxu3 }
 0x7a9   : > { %v4972_v61 = vpop.f32.mrf.mxu2 }
 0x7aa   : > { %v2392_v2 = vsel %vm370_vm0, %v4970_v12, -inf }
 0x7ab   : > { %2393 = vmax.xlane.f32.xlu2 %v2392_v2  ;;  %2381 = vmax.xlane.f32.xlu1 %v2380_v17 }
 0x7b1   : > { %v2322_v35 = vpop.f32.mrf.mxu2 }
 0x7b2   : > { %v4979_v14 = vadd.f32 %v4726_v20, %v2322_v35 }
 0x7b4   : > { %v2395_v46 = vsel %vm370_vm0, %v4979_v14, -inf }
 0x7b5   : > { %2396 = vmax.xlane.f32.xlu2 %v2395_v46 }
 0x7b9   : > { %v2324_v45 = vpop.f32.mrf.mxu2 }
 0x7c1   : > { %v2327_v59 = vpop.f32.mrf.mxu2 }
 0x7c2   : > { %v5019_v46 = vadd.f32 %v4756_v57, %v2327_v59 }
 0x7c9   : > { %v2329_v56 = vpop.f32.mrf.mxu2 }
 0x7ca   : > { %v4984_v53 = vadd.f32 %v4765_v42, %v2329_v56 }
 0x7cc   : > { %v2404_v23 = vsel %vm370_vm0, %v4984_v53, -inf }
 0x7cd   : > { %2405 = vmax.xlane.f32.xlu1 %v2404_v23 }
 0x7ce   : > { %v2373_v52 = vpop.xlane.xlu1 %2372 }
 0x7d6   : > { %v2376_v20 = vpop.xlane.xlu0 %2375 }
 0x7d7   : > { %v2420_v7 = vsub.f32 %v2247_v44, %v2376_v20  ;;  %v5006_v44 = vadd.f32 %v4742_v38, %v2324_v45 }
 0x7d9   : > { %v2437_v49 = vmul.f32 1.442695, %v2420_v7  ;;  %v2398_v5 = vsel %vm370_vm0, %v5006_v44, -inf }
 0x7db   : > { %3482 = vpow2.f32 %v2437_v49 }
 0x7de   : > { %v2379_v23 = vpop.xlane.xlu2 %2378 }
 0x7df   : > { %v4992_v48 = vpop.f32.mrf.mxu3  ;;  %v2421_v57 = vsub.f32 %v4934_v16, %v2379_v23 }
 0x7e1   : > { %v4994_v58 = vpop.eup %3482 }
 0x7e2   : > { %v2470_v42 = vsel %vm370_vm0, %v4994_v58, 0.0 }
 0x7e3   : > { %2471 = vadd.xlane.f32.xlu1 %v2470_v42  ;;  %v2439_v42 = vmul.f32 1.442695, %v2421_v57 }
 0x7e7   : > { %v4998_v39 = vpop.f32.mrf.mxu3 }
 0x7ef   : > { %v2361_v60 = vpop.f32.mrf.mxu3 }
 0x7f0   : > { %v5001_v19 = vadd.f32 %v4719_v0, %v2361_v60  ;;  %v2419_v0 = vsub.f32 %v4926_v50, %v2373_v52 }
 0x7f2   : > { %v2407_v26 = vsel %vm370_vm0, %v5001_v19, -inf  ;;  %v2435_v38 = vmul.f32 1.442695, %v2419_v0 }
 0x7f3   : > { %2408 = vmax.xlane.f32.xlu0 %v2407_v26 }
 0x7f4   : > { %3484 = vpow2.f32 %v2435_v38 }
 0x7f7   : > { %v2363_v3 = vpop.f32.mrf.mxu3 }
 0x7f8   : > { %v5013_v2 = vadd.f32 %v4735_v51, %v2363_v3 }
 0x7fa   : > { %v2410_v17 = vsel %vm370_vm0, %v5013_v2, -inf  ;;  %v5024_v20 = vpop.eup %3484 }
 0x7fb   : > { %2399 = vmax.xlane.f32.xlu0 %v2398_v5  ;;  %v2467_v59 = vsel %vm370_vm0, %v5024_v20, 0.0 }
 0x7fc   : > { %2614 = vrot.lane.b32.xlu1 %v3993_v29, %s3775_s19  ;;  %v2401_v29 = vsel %vm370_vm0, %v5019_v46, -inf }
 0x803   : > { %2411 = vmax.xlane.f32.xlu0 %v2410_v17 }
 0x804   : > { %v2385_v35 = vpop.xlane.xlu1 %2384 }
 0x805   : > { %v2423_v45 = vsub.f32 %v2284_v15, %v2385_v35  ;;  %v2366_v35 = vpop.f32.mrf.mxu3 }
 0x807   : > { %v2443_v56 = vmul.f32 1.442695, %v2423_v45 }
 0x809   : > { %3486 = vpow2.f32 %v2443_v56 }
 0x80b   : > { %2402 = vmax.xlane.f32.xlu0 %v2401_v29  ;;  %v5048_v29 = vadd.f32 %v4751_v55, %v2366_v35 }
 0x80c   : > { %v2388_v51 = vpop.xlane.xlu0 %2387 }
 0x80d   : > { %v2424_v50 = vsub.f32 %v4953_v30, %v2388_v51 }
 0x80f   : > { %v5026_v7 = vpop.eup %3486  ;;  %v2445_v49 = vmul.f32 1.442695, %v2424_v50  ;;  %v2413_v50 = vsel %vm370_vm0, %v5048_v29, -inf }
 0x810   : > { %v2479_v15 = vsel %vm370_vm0, %v5026_v7, 0.0 }
 0x811   : > { %3488 = vpow2.f32 %v2445_v49  ;;  %2480 = vadd.xlane.f32.xlu2 %v2479_v15  ;;  %v2368_v49 = vpop.f32.mrf.mxu3 }
 0x812   : > { %3490 = vpow2.f32 %v2439_v42 }
 0x813   : > { %2468 = vadd.xlane.f32.xlu0 %v2467_v59  ;;  %v5058_v59 = vadd.f32 %v4772_v28, %v2368_v49 }
 0x815   : > { %v2416_v55 = vsel %vm370_vm0, %v5058_v59, -inf }
 0x816   : > { %v2391_v60 = vpop.xlane.xlu1 %2390 }
 0x817   : > { %v2425_v30 = vsub.f32 %v4960_v25, %v2391_v60  ;;  %v5034_v26 = vpop.eup %3488 }
 0x818   : > { %v2482_v16 = vsel %vm370_vm0, %v5034_v26, 0.0  ;;  %v5038_v52 = vpop.eup %3490 }
 0x819   : > { %v2447_v5 = vmul.f32 1.442695, %v2425_v30  ;;  %v2473_v25 = vsel %vm370_vm0, %v5038_v52, 0.0 }
 0x81b   : > { %3492 = vpow2.f32 %v2447_v5  ;;  %2483 = vadd.xlane.f32.xlu0 %v2482_v16 }
 0x81e   : > { %v2382_v3 = vpop.xlane.xlu1 %2381  ;;  %v2394_v17 = vpop.xlane.xlu2 %2393 }
 0x81f   : > { %v2422_v0 = vsub.f32 %v4967_v31, %v2382_v3  ;;  %v2426_v60 = vsub.f32 %v4970_v12, %v2394_v17 }
 0x821   : > { %v5041_v38 = vpop.eup %3492  ;;  %v2441_v45 = vmul.f32 1.442695, %v2422_v0  ;;  %v2449_v28 = vmul.f32 1.442695, %v2426_v60 }
 0x822   : > { %v2485_v56 = vsel %vm370_vm0, %v5041_v38, 0.0 }
 0x823   : > { %2474 = vadd.xlane.f32.xlu0 %v2473_v25  ;;  %2486 = vadd.xlane.f32.xlu2 %v2485_v56  ;;  %3494 = vpow2.f32 %v2441_v45 }
 0x828   : > { %v2397_v51 = vpop.xlane.xlu2 %2396 }
 0x829   : > { %v2427_v31 = vsub.f32 %v4979_v14, %v2397_v51  ;;  %v5051_v23 = vpop.eup %3494 }
 0x82a   : > { %v2476_v15 = vsel %vm370_vm0, %v5051_v23, 0.0 }
 0x82b   : > { %v2451_v57 = vmul.f32 1.442695, %v2427_v31  ;;  %2414 = vmax.xlane.f32.xlu2 %v2413_v50  ;;  %2477 = vadd.xlane.f32.xlu0 %v2476_v15 }
 0x82d   : > { %3496 = vpow2.f32 %v2451_v57 }
 0x82e   : > { %3498 = vpow2.f32 %v2449_v28 }
 0x833   : > { %v5062_v14 = vpop.eup %3496  ;;  %2417 = vmax.xlane.f32.xlu2 %v2416_v55 }
 0x834   : > { %v2491_v42 = vsel %vm370_vm0, %v5062_v14, 0.0  ;;  %v5071_v30 = vpop.eup %3498 }
 0x835   : > { %2492 = vadd.xlane.f32.xlu1 %v2491_v42  ;;  %v2488_v16 = vsel %vm370_vm0, %v5071_v30, 0.0 }
 0x83f   : > { %2616 = vrot.lane.b32.xlu0 %v3983_v6, %s3775_s19 }
 0x840   : > { %v2406_v6 = vpop.xlane.xlu1 %2405 }
 0x841   : > { %v2430_v12 = vsub.f32 %v4984_v53, %v2406_v6 }
 0x843   : > { %v2457_v51 = vmul.f32 1.442695, %v2430_v12 }
 0x84b   : > { %2657 = vrot.lane.b32.xlu2 %v3991_v27, %s3775_s19 }
 0x856   : > { %v2472_v31 = vpop.xlane.xlu1 %2471 }
 0x866   : > { %v2409_v5 = vpop.xlane.xlu0 %2408 }
 0x869   : > { %2489 = vadd.xlane.f32.xlu0 %v2488_v16 }
 0x86e   : > { %v2400_v3 = vpop.xlane.xlu0 %2399 }
 0x86f   : > { %v2428_v0 = vsub.f32 %v5006_v44, %v2400_v3 }
 0x871   : > { %v2453_v35 = vmul.f32 1.442695, %v2428_v0 }
 0x873   : > { %3500 = vpow2.f32 %v2453_v35 }
 0x876   : > { %v2412_v45 = vpop.xlane.xlu0 %2411 }
 0x877   : > { %v2432_v27 = vsub.f32 %v5013_v2, %v2412_v45 }
 0x879   : > { %v5078_v17 = vpop.eup %3500  ;;  %v2461_v25 = vmul.f32 1.442695, %v2432_v27 }
 0x87a   : > { %v2494_v56 = vsel %vm370_vm0, %v5078_v17, 0.0 }
 0x87b   : > { %3502 = vpow2.f32 %v2461_v25  ;;  %2495 = vadd.xlane.f32.xlu2 %v2494_v56 }
 0x87c   : > { %3504 = vpow2.f32 %v2457_v51 }
 0x87d   : > { %2655 = vrot.lane.b32.xlu0 %v4003_v34, %s3775_s19  ;;  %3506 = vrcp.f32 %v2472_v31 }
 0x87e   : > { %v2403_v44 = vpop.xlane.xlu0 %2402 }
 0x87f   : > { %v2429_v50 = vsub.f32 %v5019_v46, %v2403_v44 }
 0x881   : > { %v5085_v2 = vpop.eup %3502  ;;  %v2455_v53 = vmul.f32 1.442695, %v2429_v50 }
 0x882   : > { %v2506_v49 = vsel %vm370_vm0, %v5085_v2, 0.0  ;;  %v5089_v57 = vpop.eup %3504 }
 0x883   : > { %3508 = vpow2.f32 %v2455_v53  ;;  %2507 = vadd.xlane.f32.xlu1 %v2506_v49  ;;  %v3507_v55 = vpop.eup %3506  ;;  %v2500_v60 = vsel %vm370_vm0, %v5089_v57, 0.0 }
 0x884   : > { %v2532_v34 = vmul.f32 %v3507_v55, %v4994_v58  ;;  %v2481_v3 = vpop.xlane.xlu2 %2480  ;;  %v2431_v58 = vsub.f32 %v5001_v19, %v2409_v5 }
 0x886   : > { %v2469_v15 = vpop.xlane.xlu0 %2468  ;;  %v2548_v16 = vpack.c.bf16 %v2532_v34, %v2532_v34  ;;  %v2459_v51 = vmul.f32 1.442695, %v2431_v58 }
 0x887   : > { %3510 = vrcp.f32 %v2469_v15 }
 0x888   : > { %v2568_v45 = vunpack.c.l.b16 %v2548_v16 }
 0x889   : > { %v5091_v42 = vpop.eup %3508 }
 0x88a   : > { %v2497_v46 = vsel %vm370_vm0, %v5091_v42, 0.0 }
 0x88b   : > { %2498 = vadd.xlane.f32.xlu2 %v2497_v46  ;;  %2501 = vadd.xlane.f32.xlu1 %v2500_v60 }
 0x88d   : > { %v3511_v28 = vpop.eup %3510 }
 0x88e   : > { %v2531_v0 = vmul.f32 %v3511_v28, %v5024_v20  ;;  %v2484_v35 = vpop.xlane.xlu0 %2483 }
 0x890   : > { %v2547_v6 = vpack.c.bf16 %v2531_v0, %v2531_v0 }
 0x892   : > { %v2567_v27 = vunpack.c.l.b16 %v2547_v6 }
 0x894   : > { %v2571_v12 = vpack.c.b16 %v2568_v45, %v2567_v27 }
 0x896   : > { %v2475_v25 = vpop.xlane.xlu0 %2474  ;;  %v2487_v56 = vpop.xlane.xlu2 %2486  ;;  %3148 = vmatmul.msk.bf16.vlgmr.msrb.gmra.mxu0 %vm370_vm0, %v2571_v12 }
 0x897   : > { %3512 = vrcp.f32 %v2475_v25 }
 0x898   : > { %3514 = vpow2.f32 %v2459_v51 }
 0x89d   : > { %v3513_v50 = vpop.eup %3512 }
 0x89e   : > { %v2415_v31 = vpop.xlane.xlu2 %2414  ;;  %v2478_v44 = vpop.xlane.xlu0 %2477  ;;  %v2533_v20 = vmul.f32 %v3513_v50, %v5038_v52 }
 0x89f   : > { %3516 = vrcp.f32 %v2478_v44  ;;  %v5104_v53 = vpop.eup %3514  ;;  %v2433_v58 = vsub.f32 %v5048_v29, %v2415_v31 }
 0x8a0   : > { %3518 = vrcp.f32 %v2484_v35  ;;  %v2503_v15 = vsel %vm370_vm0, %v5104_v53, 0.0  ;;  %v2549_v34 = vpack.c.bf16 %v2533_v20, %v2533_v20 }
 0x8a1   : > { %3520 = vrcp.f32 %v2481_v3  ;;  %v2463_v25 = vmul.f32 1.442695, %v2433_v58 }
 0x8a3   : > { %2696 = vrot.lane.b32.xlu2 %v3989_v22, %s3775_s19 }
 0x8a4   : > { %2698 = vrot.lane.b32.xlu1 %v4001_v33, %s3775_s19  ;;  %v2569_v33 = vunpack.c.l.b16 %v2549_v34  ;;  %s3698_s19 = scalar_lea.hbm %s3697_s25, 128 }
 0x8a5   : > { %v3517_v19 = vpop.eup %3516  ;;  %p3699_p1 = scmp.ne.s32.totalorder %s3697_s25, %s3698_s19  ;;  %p3704_p9 = scmp.lt.s32.totalorder %s3702_s9, %s3698_s19 }
 0x8a6   : > { %v2418_v5 = vpop.xlane.xlu2 %2417  ;;  %v2534_v55 = vmul.f32 %v3517_v19, %v5051_v23  ;;  %v3519_v22 = vpop.eup %3518 }
 0x8a7   : > { %v2434_v49 = vsub.f32 %v5058_v59, %v2418_v5  ;;  %2504 = vadd.xlane.f32.xlu0 %v2503_v15  ;;  %v3521_v60 = vpop.eup %3520  ;;  %v2536_v59 = vmul.f32 %v3519_v22, %v5034_v26  ;;  %p3700_p4 = pnand %p3699_p1, %p3900_p3  ;;  %p3705_p2 = por %p3704_p9, %p3703_p11 }
 0x8a8   : > { %v2550_v52 = vpack.c.bf16 %v2534_v55, %v2534_v55  ;;  %v2535_v3 = vmul.f32 %v3521_v60, %v5026_v7  ;;  %v2615_v7 = vpop.permute.xlu1 %2614 }
 0x8a9   : > { %v2465_v46 = vmul.f32 1.442695, %v2434_v49  ;;  %v2552_v23 = vpack.c.bf16 %v2536_v59, %v2536_v59  ;;  %p3701_p8 = pneg %p3700_p4 }
 0x8aa   : > { %v2570_v28 = vunpack.c.l.b16 %v2550_v52  ;;  %v2551_v6 = vpack.c.bf16 %v2535_v3, %v2535_v3 }
 0x8ab   : > { %3522 = vpow2.f32 %v2465_v46  ;;  %1559 = vrot.lane.b32.xlu2 %v4611_v41, %s3776_s27  ;;  %v2609_v41 = vunpack.c.l.b16 %v2552_v23  ;;  %p3706_p10 = pnand %p3705_p2, %p3701_p8 }
 0x8ac   : > { %v2572_v16 = vpack.c.b16 %v2570_v28, %v2569_v33  ;;  %v2608_v26 = vunpack.c.l.b16 %v2551_v6  ;;  %3524 = vpow2.f32 %v2463_v25 }
 0x8ad   : > { %3526 = vrcp.f32 %v2487_v56 }
 0x8ae   : > { %v2658_v0 = vpop.permute.xlu2 %2657  ;;  %3149 = vmatmul.msk.bf16.gmra.mxu0 %vm370_vm0, %v2572_v16  ;;  %v2612_v12 = vpack.c.b16 %v2609_v41, %v2608_v26 }
 0x8af   : > { %2673 = vmatpush.bf16.msrb.mxu2 %v2658_v0 }
 0x8b1   : > { %v5117_v35 = vpop.eup %3522  ;;  %v2617_v45 = vpop.permute.xlu0 %2616 }
 0x8b2   : > { %v2512_v27 = vsel %vm370_vm0, %v5117_v35, 0.0  ;;  %2632 = vmatpush.bf16.msrb.mxu1 %v2617_v45  ;;  %v5129_v51 = vpop.eup %3524 }
 0x8b3   : > { %2150 = vrot.lane.b32.xlu2 %v4914_v43, %s3777_s8  ;;  %2513 = vadd.xlane.f32.xlu0 %v2512_v27  ;;  %v2509_v43 = vsel %vm370_vm0, %v5129_v51, 0.0  ;;  %v3527_v50 = vpop.eup %3526 }
 0x8b6   : > { %2633 = vmatpush.bf16.msrb.mxu1 %v2615_v7 }
 0x8b9   : > { %3150 = vmatmul.msk.bf16.vlgmr.msrb.gmra.mxu1 %vm370_vm0, %v2612_v12 }
 0x8bb   : > { %2152 = vrot.lane.b32.xlu2 %v4917_v11, %s3777_s8  ;;  %v2537_v11 = vmul.f32 %v3527_v50, %v5041_v38 }
 0x8bd   : > { %v2553_v31 = vpack.c.bf16 %v2537_v11, %v2537_v11 }
 0x8bf   : > { %v2610_v5 = vunpack.c.l.b16 %v2553_v31 }
 0x8c7   : > { %1557 = vrot.lane.b32.xlu0 %v4609_v9, %s3776_s27  ;;  %v2493_v9 = vpop.xlane.xlu1 %2492 }
 0x8ce   : > { %2510 = vadd.xlane.f32.xlu1 %v2509_v43 }
 0x8cf   : > { %1561 = vrot.lane.b32.xlu0 %v4613_v37, %s3776_s27 }
 0x8dc   : > { %v2490_v44 = vpop.xlane.xlu0 %2489 }
 0x8dd   : > { %3528 = vrcp.f32 %v2490_v44 }
 0x8de   : > { %3530 = vrcp.f32 %v2493_v9 }
 0x8e3   : > { %v3529_v29 = vpop.eup %3528 }
 0x8e4   : > { %v2538_v20 = vmul.f32 %v3529_v29, %v5071_v30  ;;  %v3531_v56 = vpop.eup %3530 }
 0x8e5   : > { %v2539_v30 = vmul.f32 %v3531_v56, %v5062_v14 }
 0x8e6   : > { %v2554_v19 = vpack.c.bf16 %v2538_v20, %v2538_v20 }
 0x8e7   : > { %1563 = vrot.lane.b32.xlu1 %v4616_v54, %s3776_s27  ;;  %v2555_v34 = vpack.c.bf16 %v2539_v30, %v2539_v30 }
 0x8e8   : > { %v2611_v49 = vunpack.c.l.b16 %v2554_v19 }
 0x8e9   : > { %v2649_v52 = vunpack.c.l.b16 %v2555_v34 }
 0x8ea   : > { %v2613_v15 = vpack.c.b16 %v2611_v49, %v2610_v5 }
 0x8ec   : > { %3151 = vmatmul.msk.bf16.gmra.mxu1 %vm370_vm0, %v2613_v15 }
 0x8ee   : > { %v2496_v37 = vpop.xlane.xlu2 %2495 }
 0x8ef   : > { %3532 = vrcp.f32 %v2496_v37  ;;  %2158 = vrot.lane.b32.xlu1 %v4938_v21, %s3777_s8  ;;  %v2656_v38 = vpop.permute.xlu0 %2655 }
 0x8f0   : > { %2674 = vmatpush.bf16.msrb.mxu2 %v2656_v38 }
 0x8f5   : > { %v3533_v55 = vpop.eup %3532 }
 0x8f6   : > { %v2540_v54 = vmul.f32 %v3533_v55, %v5078_v17  ;;  %v2508_v22 = vpop.xlane.xlu1 %2507 }
 0x8f8   : > { %v2556_v46 = vpack.c.bf16 %v2540_v54, %v2540_v54 }
 0x8fa   : > { %v2650_v60 = vunpack.c.l.b16 %v2556_v46 }
 0x8fc   : > { %v2653_v33 = vpack.c.b16 %v2650_v60, %v2649_v52  ;;  %v5397_v52 = vld [vmem:[#allocation20_spill] sm:$0xff] }
 0x8fe   : > { %v2499_v28 = vpop.xlane.xlu2 %2498  ;;  %3152 = vmatmul.msk.bf16.vlgmr.msrb.gmra.mxu2 %vm370_vm0, %v2653_v33  ;;  %v2502_v59 = vpop.xlane.xlu1 %2501 }
 0x8ff   : > { %3534 = vrcp.f32 %v2499_v28  ;;  %v5399_v28 = vld [vmem:[#allocation21_spill] sm:$0xff] }
 0x900   : > { %3536 = vrcp.f32 %v2502_v59 }
 0x901   : > { %3538 = vrcp.f32 %v2508_v22  ;;  %v3182_v22 = vld [vmem:[#allocation9] sm:$0xff] }
 0x905   : > { %v3535_v21 = vpop.eup %3534 }
 0x906   : > { %v3537_v16 = vpop.eup %3536  ;;  %v2541_v3 = vmul.f32 %v3535_v21, %v5091_v42  ;;  %v2697_v14 = vpop.permute.xlu2 %2696 }
 0x907   : > { %v2542_v0 = vmul.f32 %v3537_v16, %v5089_v57  ;;  %v3539_v58 = vpop.eup %3538 }
 0x908   : > { %v2557_v23 = vpack.c.bf16 %v2541_v3, %v2541_v3  ;;  %v2544_v43 = vmul.f32 %v3539_v58, %v5085_v2 }
 0x909   : > { %v2558_v17 = vpack.c.bf16 %v2542_v0, %v2542_v0 }
 0x90a   : > { %v2651_v6 = vunpack.c.l.b16 %v2557_v23  ;;  %v2560_v50 = vpack.c.bf16 %v2544_v43, %v2544_v43 }
 0x90b   : > { %v2652_v45 = vunpack.c.l.b16 %v2558_v17 }
 0x90c   : > { %v2691_v31 = vunpack.c.l.b16 %v2560_v50 }
 0x90d   : > { %v2654_v27 = vpack.c.b16 %v2652_v45, %v2651_v6 }
 0x90e   : > { %v1560_v41 = vpop.permute.xlu2 %1559 }
 0x90f   : > { %1607 = vst.msk [vmem:[#allocation2 + $0x8] sm:$0xff] %vm1605_vm2, %v1560_v41  ;;  %3153 = vmatmul.msk.bf16.gmra.mxu2 %vm370_vm0, %v2654_v27  ;;  %v5401_v27 = vld [vmem:[#allocation19_spill] sm:$0xff] }
 0x913   : > { %v2594_v7 = vpop.f32.mrf.mxu0 }
 0x914   : > { %2743 = vrot.lane.b32.xlu0 %v2594_v7, %s3778_s30 }
 0x916   : > { %v2151_v42 = vpop.permute.xlu2 %2150  ;;  %v2699_v26 = vpop.permute.xlu1 %2698 }
 0x917   : > { %2714 = vmatpush.bf16.msrb.mxu3 %v2699_v26 }
 0x91a   : > { %v2505_v57 = vpop.xlane.xlu0 %2504 }
 0x91b   : > { %v2596_v12 = vpop.f32.mrf.mxu0  ;;  %2715 = vmatpush.bf16.msrb.mxu3 %v2697_v14  ;;  %3540 = vrcp.f32 %v2505_v57 }
 0x91c   : > { %2156 = vrot.lane.b32.xlu0 %v4922_v47, %s3777_s8  ;;  %2745 = vrot.lane.b32.xlu2 %v2596_v12, %s3778_s30 }
 0x91e   : > { %v2153_v25 = vpop.permute.xlu2 %2152 }
 0x91f   : > { %2200 = vst.msk [vmem:[#allocation2 + $0x8] sm:$0xff] %vm2198_vm3, %v2153_v25 }
 0x921   : > { %v3541_v44 = vpop.eup %3540 }
 0x922   : > { %v2543_v11 = vmul.f32 %v3541_v44, %v5104_v53 }
 0x924   : > { %2154 = vrot.lane.b32.xlu2 %v4919_v24, %s3777_s8  ;;  %v2559_v29 = vpack.c.bf16 %v2543_v11, %v2543_v11  ;;  %v5402_v11 = vld [vmem:[#allocation23_spill] sm:$0xff] }
 0x926   : > { %v2690_v20 = vunpack.c.l.b16 %v2559_v29  ;;  %v2514_v19 = vpop.xlane.xlu0 %2513 }
 0x927   : > { %3542 = vrcp.f32 %v2514_v19 }
 0x928   : > { %v2694_v9 = vpack.c.b16 %v2691_v31, %v2690_v20 }
 0x92a   : > { %3154 = vmatmul.msk.bf16.vlgmr.msrb.gmra.mxu3 %vm370_vm0, %v2694_v9 }
 0x92b   : > { %v2599_v47 = vpop.f32.mrf.mxu0 }
 0x92c   : > { %2747 = vrot.lane.b32.xlu2 %v2599_v47, %s3778_s30 }
 0x933   : > { %v2601_v2 = vpop.f32.mrf.mxu0 }
 0x934   : > { %1565 = vrot.lane.b32.xlu2 %v4648_v1, %s3776_s27  ;;  %2749 = vrot.lane.b32.xlu0 %v2601_v2, %s3778_s30  ;;  %v3543_v1 = vpop.eup %3542 }
 0x935   : > { %v2546_v37 = vmul.f32 %v3543_v1, %v5117_v35  ;;  %v5394_v35 = vld [vmem:[#allocation16_spill] sm:$0xff] }
 0x936   : > { %v2635_v53 = vpop.f32.mrf.mxu1 }
 0x939   : > { %v1558_v5 = vpop.permute.xlu0 %1557 }
 0x93a   : > { %1606 = vst.msk [vmem:[#allocation2] sm:$0xff] %vm1605_vm2, %v1558_v5 }
 0x93b   : > { %2199 = vst.msk [vmem:[#allocation2] sm:$0xff] %vm2198_vm3, %v2151_v42 }
 0x93c   : > { %2160 = vrot.lane.b32.xlu2 %v4941_v32, %s3777_s8  ;;  %1567 = vrot.lane.b32.xlu0 %v4654_v63, %s3776_s27  ;;  %v2562_v63 = vpack.c.bf16 %v2546_v37, %v2546_v37 }
 0x93e   : > { %v2637_v24 = vpop.f32.mrf.mxu1  ;;  %v2693_v30 = vunpack.c.l.b16 %v2562_v63 }
 0x93f   : > { %2753 = vrot.lane.b32.xlu1 %v2637_v24, %s3778_s30 }
 0x941   : > { %v2511_v49 = vpop.xlane.xlu1 %2510  ;;  %v1562_v15 = vpop.permute.xlu0 %1561 }
 0x942   : > { %3544 = vrcp.f32 %v2511_v49  ;;  %1608 = vst.msk [vmem:[#allocation2 + $0x10] sm:$0xff] %vm1605_vm2, %v1562_v15 }
 0x944   : > { %1569 = vrot.lane.b32.xlu2 %v4656_v36, %s3776_s27  ;;  %2751 = vrot.lane.b32.xlu0 %v2635_v53, %s3778_s30  ;;  %v5395_v36 = vld [vmem:[#allocation18_spill] sm:$0xff] }
 0x947   : > { %2162 = vrot.lane.b32.xlu1 %v4944_v4, %s3777_s8  ;;  %v5396_v4 = vld [vmem:[#allocation22_spill] sm:$0xff] }
 0x948   : > { %v3545_v32 = vpop.eup %3544 }
 0x949   : > { %v2545_v56 = vmul.f32 %v3545_v32, %v5129_v51  ;;  %v3183_v51 = vld [vmem:[#allocation9 + $0x8] sm:$0xff] }
 0x94a   : > { %2882 = vmatpush.bf16.msra.mxu0 %v3183_v51 }
 0x94b   : > { %v2561_v38 = vpack.c.bf16 %v2545_v56, %v2545_v56 }
 0x94c   : > { %2164 = vrot.lane.b32.xlu2 %v4946_v62, %s3777_s8  ;;  %1571 = vrot.lane.b32.xlu0 %v5394_v35, %s3776_s27 }
 0x94d   : > { %v2692_v55 = vunpack.c.l.b16 %v2561_v38 }
 0x94e   : > { %2883 = vmatpush.bf16.msra.mxu0 %v3182_v22 }
 0x94f   : > { %v2695_v34 = vpack.c.b16 %v2693_v30, %v2692_v55 }
 0x951   : > { %3155 = vmatmul.msk.bf16.gmra.mxu3 %vm370_vm0, %v2695_v34 }
 0x954   : > { %1573 = vrot.lane.b32.xlu2 %v5395_v36, %s3776_s27 }
 0x959   : > { %v1564_v54 = vpop.permute.xlu1 %1563 }
 0x95a   : > { %1609 = vst.msk [vmem:[#allocation2 + $0x18] sm:$0xff] %vm1605_vm2, %v1564_v54 }
 0x95c   : > { %2168 = vrot.lane.b32.xlu2 %v4955_v8, %s3777_s8  ;;  %v5398_v8 = vld [vmem:[#allocation17_spill] sm:$0xff] }
 0x961   : > { %v2159_v17 = vpop.permute.xlu1 %2158 }
 0x964   : > { %1577 = vrot.lane.b32.xlu2 %v5396_v4, %s3776_s27 }
 0x969   : > { %v2640_v62 = vpop.f32.mrf.mxu1 }
 0x96a   : > { %2755 = vrot.lane.b32.xlu0 %v2640_v62, %s3778_s30  ;;  %v5265_v62 = vld [vmem:[%s5373_s5] ss:$0 sm:$0xff] }
 0x96c   : > { %2172 = vrot.lane.b32.xlu2 %v4972_v61, %s3777_s8 }
 0x971   : > { %v2642_v46 = vpop.f32.mrf.mxu1 }
 0x972   : > { %1575 = vrot.lane.b32.xlu0 %v5397_v52, %s3776_s27  ;;  %2757 = vrot.lane.b32.xlu1 %v2642_v46, %s3778_s30 }
 0x974   : > { %1581 = vrot.lane.b32.xlu2 %v5398_v8, %s3776_s27 }
 0x976   : > { %v2746_v60 = vpop.permute.xlu2 %2745 }
 0x977   : > { %2793 = vst.msk [vmem:[#allocation2 + $0x8] sm:$0xff] %vm2791_vm4, %v2746_v60 }
 0x97a   : > { %2166 = vrot.lane.b32.xlu1 %v4949_v40, %s3777_s8  ;;  %v5400_v40 = vld [vmem:[#allocation24_spill] sm:$0xff] }
 0x97c   : > { %2176 = vrot.lane.b32.xlu2 %v4990_v18, %s3777_s8 }
 0x97e   : > { %v2155_v61 = vpop.permute.xlu2 %2154  ;;  %v2809_v14 = vld [vmem:[#allocation2 + $0x8] sm:$0xff] }
 0x97f   : > { %2201 = vst.msk [vmem:[#allocation2 + $0x10] sm:$0xff] %vm2198_vm3, %v2155_v61 }
 0x981   : > { %v2676_v33 = vpop.f32.mrf.mxu2 }
 0x982   : > { %2759 = vrot.lane.b32.xlu0 %v2676_v33, %s3778_s30 }
 0x984   : > { %1585 = vrot.lane.b32.xlu2 %v5399_v28, %s3776_s27 }
 0x986   : > { %v2744_v59 = vpop.permute.xlu0 %2743  ;;  %v2748_v21 = vpop.permute.xlu2 %2747 }
 0x987   : > { %2792 = vst.msk [vmem:[#allocation2] sm:$0xff] %vm2791_vm4, %v2744_v59 }
 0x988   : > { %2794 = vst.msk [vmem:[#allocation2 + $0x10] sm:$0xff] %vm2791_vm4, %v2748_v21 }
 0x989   : > { %v2678_v16 = vpop.f32.mrf.mxu2 }
 0x98a   : > { %1579 = vrot.lane.b32.xlu0 %v5400_v40, %s3776_s27  ;;  %2761 = vrot.lane.b32.xlu1 %v2678_v16, %s3778_s30 }
 0x98c   : > { %2180 = vrot.lane.b32.xlu2 %v4998_v39, %s3777_s8 }
 0x98e   : > { %v2157_v18 = vpop.permute.xlu0 %2156  ;;  %v2808_v3 = vld [vmem:[#allocation2] sm:$0xff]  ;;  %v1566_v0 = vpop.permute.xlu2 %1565 }
 0x98f   : > { %2202 = vst.msk [vmem:[#allocation2 + $0x18] sm:$0xff] %vm2198_vm3, %v2157_v18  ;;  %v2824_v23 = vpack.c.bf16 %v2809_v14, %v2808_v3  ;;  %v2810_v12 = vld [vmem:[#allocation2 + $0x10] sm:$0xff] }
 0x990   : > { %1610 = vst.msk [vmem:[#allocation2 + $0x20] sm:$0xff] %vm1605_vm2, %v1566_v0 }
 0x991   : > { %2203 = vst.msk [vmem:[#allocation2 + $0x20] sm:$0xff] %vm2198_vm3, %v2159_v17  ;;  %3164 = vmatmul.msk.bf16.vlgmr.msra.gmra.mxu0 %vm370_vm0, %v2824_v23 }
 0x992   : > { %v2681_v6 = vpop.f32.mrf.mxu2  ;;  %2170 = vrot.lane.b32.xlu1 %v4962_v10, %s3777_s8 }
 0x993   : > { %2763 = vrot.lane.b32.xlu0 %v2681_v6, %s3778_s30 }
 0x996   : > { %v2161_v39 = vpop.permute.xlu2 %2160 }
 0x99a   : > { %v2683_v45 = vpop.f32.mrf.mxu2 }
 0x99b   : > { %1583 = vrot.lane.b32.xlu0 %v5401_v27, %s3776_s27  ;;  %2765 = vrot.lane.b32.xlu1 %v2683_v45, %s3778_s30 }
 0x99e   : > { %v1570_v41 = vpop.permute.xlu2 %1569 }
 0x99f   : > { %1612 = vst.msk [vmem:[#allocation2 + $0x30] sm:$0xff] %vm1605_vm2, %v1570_v41 }
 0x9a3   : > { %2174 = vrot.lane.b32.xlu1 %v4988_v13, %s3777_s8 }
 0x9a6   : > { %v2165_v7 = vpop.permute.xlu2 %2164  ;;  %v2750_v42 = vpop.permute.xlu0 %2749 }
 0x9a7   : > { %2795 = vst.msk [vmem:[#allocation2 + $0x18] sm:$0xff] %vm2791_vm4, %v2750_v42 }
 0x9ad   : > { %v2717_v10 = vpop.f32.mrf.mxu3 }
 0x9ae   : > { %v1574_v26 = vpop.permute.xlu2 %1573  ;;  %v1568_v57 = vpop.permute.xlu0 %1567  ;;  %2767 = vrot.lane.b32.xlu0 %v2717_v10, %s3778_s30  ;;  %v2811_v58 = vld [vmem:[#allocation2 + $0x18] sm:$0xff] }
 0x9af   : > { %1614 = vst.msk [vmem:[#allocation2 + $0x40] sm:$0xff] %vm1605_vm2, %v1574_v26  ;;  %v2825_v25 = vpack.c.bf16 %v2811_v58, %v2810_v12 }
 0x9b0   : > { %1611 = vst.msk [vmem:[#allocation2 + $0x28] sm:$0xff] %vm1605_vm2, %v1568_v57 }
 0x9b1   : > { %2204 = vst.msk [vmem:[#allocation2 + $0x28] sm:$0xff] %vm2198_vm3, %v2161_v39  ;;  %3165 = vmatmul.msk.bf16.gmra.mxu0 %vm370_vm0, %v2825_v25  ;;  %v2754_v13 = vpop.permute.xlu1 %2753 }
 0x9b2   : > { %2797 = vst.msk [vmem:[#allocation2 + $0x28] sm:$0xff] %vm2791_vm4, %v2754_v13 }
 0x9b5   : > { %v2719_v43 = vpop.f32.mrf.mxu3 }
 0x9b6   : > { %v2169_v44 = vpop.permute.xlu2 %2168  ;;  %v2752_v50 = vpop.permute.xlu0 %2751  ;;  %1587 = vrot.lane.b32.xlu0 %v5402_v11, %s3776_s27  ;;  %2769 = vrot.lane.b32.xlu1 %v2719_v43, %s3778_s30 }
 0x9b7   : > { %2796 = vst.msk [vmem:[#allocation2 + $0x20] sm:$0xff] %vm2791_vm4, %v2752_v50 }
 0x9b9   : > { %v2163_v29 = vpop.permute.xlu1 %2162  ;;  %v2813_v47 = vld [vmem:[#allocation2 + $0x28] sm:$0xff] }
 0x9ba   : > { %2205 = vst.msk [vmem:[#allocation2 + $0x30] sm:$0xff] %vm2198_vm3, %v2163_v29 }
 0x9be   : > { %v1578_v31 = vpop.permute.xlu2 %1577  ;;  %v1572_v20 = vpop.permute.xlu0 %1571  ;;  %2178 = vrot.lane.b32.xlu1 %v4992_v48, %s3777_s8  ;;  %v2812_v9 = vld [vmem:[#allocation2 + $0x20] sm:$0xff] }
 0x9bf   : > { %1616 = vst.msk [vmem:[#allocation2 + $0x50] sm:$0xff] %vm1605_vm2, %v1578_v31  ;;  %v2826_v19 = vpack.c.bf16 %v2813_v47, %v2812_v9 }
 0x9c0   : > { %1613 = vst.msk [vmem:[#allocation2 + $0x38] sm:$0xff] %vm1605_vm2, %v1572_v20 }
 0x9c1   : > { %2206 = vst.msk [vmem:[#allocation2 + $0x38] sm:$0xff] %vm2198_vm3, %v2165_v7  ;;  %3166 = vmatmul.msk.bf16.gmra.mxu0 %vm370_vm0, %v2826_v19 }
 0x9c6   : > { %v2173_v2 = vpop.permute.xlu2 %2172 }
 0x9ce   : > { %v1582_v53 = vpop.permute.xlu2 %1581 }
 0x9cf   : > { %1618 = vst.msk [vmem:[#allocation2 + $0x60] sm:$0xff] %vm1605_vm2, %v1582_v53 }
 0x9d4   : > { %v2722_v5 = vpop.f32.mrf.mxu3 }
 0x9d5   : > { %2771 = vrot.lane.b32.xlu0 %v2722_v5, %s3778_s30 }
 0x9d6   : > { %v2177_v24 = vpop.permute.xlu2 %2176 }
 0x9dc   : > { %v2724_v48 = vpop.f32.mrf.mxu3  ;;  %v2756_v49 = vpop.permute.xlu0 %2755 }
 0x9dd   : > { %2773 = vrot.lane.b32.xlu1 %v2724_v48, %s3778_s30  ;;  %2798 = vst.msk [vmem:[#allocation2 + $0x30] sm:$0xff] %vm2791_vm4, %v2756_v49 }
 0x9de   : > { %v1586_v1 = vpop.permute.xlu2 %1585 }
 0x9df   : > { %1620 = vst.msk [vmem:[#allocation2 + $0x70] sm:$0xff] %vm1605_vm2, %v1586_v1 }
 0x9e4   : > { %v1576_v15 = vpop.permute.xlu0 %1575  ;;  %v2758_v37 = vpop.permute.xlu1 %2757  ;;  %v2814_v63 = vld [vmem:[#allocation2 + $0x30] sm:$0xff] }
 0x9e5   : > { %1615 = vst.msk [vmem:[#allocation2 + $0x48] sm:$0xff] %vm1605_vm2, %v1576_v15 }
 0x9e6   : > { %2208 = vst.msk [vmem:[#allocation2 + $0x48] sm:$0xff] %vm2198_vm3, %v2169_v44  ;;  %v2181_v3 = vpop.permute.xlu2 %2180 }
 0x9e7   : > { %2799 = vst.msk [vmem:[#allocation2 + $0x38] sm:$0xff] %vm2791_vm4, %v2758_v37 }
 0x9ec   : > { %v2167_v32 = vpop.permute.xlu1 %2166 }
 0x9ed   : > { %2207 = vst.msk [vmem:[#allocation2 + $0x40] sm:$0xff] %vm2198_vm3, %v2167_v32 }
 0x9ee   : > { %v2815_v56 = vld [vmem:[#allocation2 + $0x38] sm:$0xff] }
 0x9ef   : > { %v2827_v38 = vpack.c.bf16 %v2815_v56, %v2814_v63 }
 0x9f1   : > { %3167 = vmatmul.msk.bf16.gmra.mxu0 %vm370_vm0, %v2827_v38 }
 0x9f4   : > { %v2760_v30 = vpop.permute.xlu0 %2759 }
 0x9f5   : > { %2800 = vst.msk [vmem:[#allocation2 + $0x40] sm:$0xff] %vm2791_vm4, %v2760_v30 }
 0x9fc   : > { %v1580_v55 = vpop.permute.xlu0 %1579  ;;  %v2762_v35 = vpop.permute.xlu1 %2761  ;;  %v2816_v54 = vld [vmem:[#allocation2 + $0x40] sm:$0xff] }
 0x9fd   : > { %1617 = vst.msk [vmem:[#allocation2 + $0x58] sm:$0xff] %vm1605_vm2, %v1580_v55 }
 0x9fe   : > { %2210 = vst.msk [vmem:[#allocation2 + $0x58] sm:$0xff] %vm2198_vm3, %v2173_v2 }
 0x9ff   : > { %2801 = vst.msk [vmem:[#allocation2 + $0x48] sm:$0xff] %vm2791_vm4, %v2762_v35 }
 0xa04   : > { %v2171_v34 = vpop.permute.xlu1 %2170 }
 0xa05   : > { %v2764_v36 = vpop.permute.xlu0 %2763  ;;  %2209 = vst.msk [vmem:[#allocation2 + $0x50] sm:$0xff] %vm2198_vm3, %v2171_v34 }
 0xa06   : > { %2802 = vst.msk [vmem:[#allocation2 + $0x50] sm:$0xff] %vm2791_vm4, %v2764_v36  ;;  %v2817_v4 = vld [vmem:[#allocation2 + $0x48] sm:$0xff] }
 0xa07   : > { %v2828_v51 = vpack.c.bf16 %v2817_v4, %v2816_v54 }
 0xa09   : > { %3168 = vmatmul.msk.bf16.gmra.mxu0 %vm370_vm0, %v2828_v51 }
 0xa0d   : > { %v1584_v22 = vpop.permute.xlu0 %1583  ;;  %v2766_v46 = vpop.permute.xlu1 %2765  ;;  %v2818_v28 = vld [vmem:[#allocation2 + $0x50] sm:$0xff] }
 0xa0e   : > { %1619 = vst.msk [vmem:[#allocation2 + $0x68] sm:$0xff] %vm1605_vm2, %v1584_v22  ;;  %v2885_v52 = vpop.f32.mrf.mxu0 }
 0xa0f   : > { %2212 = vst.msk [vmem:[#allocation2 + $0x68] sm:$0xff] %vm2198_vm3, %v2177_v24  ;;  %v2886_v8 = vadd.f32 %v5265_v62, %v2885_v52 }
 0xa10   : > { %2803 = vst.msk [vmem:[#allocation2 + $0x58] sm:$0xff] %vm2791_vm4, %v2766_v46 }
 0xa11   : > { %2925 = vst.msk [vmem:[%s5273_s13] sm:$0xff] %vm370_vm0, %v2886_v8 }
 0xa15   : > { %v2175_v60 = vpop.permute.xlu1 %2174 }
 0xa16   : > { %2211 = vst.msk [vmem:[#allocation2 + $0x60] sm:$0xff] %vm2198_vm3, %v2175_v60  ;;  %v2887_v61 = vpop.f32.mrf.mxu0 }
 0xa17   : > { %v2888_v33 = vadd.f32 %v5265_v62, %v2887_v61  ;;  %v2819_v59 = vld [vmem:[#allocation2 + $0x58] sm:$0xff] }
 0xa18   : > { %v2829_v21 = vpack.c.bf16 %v2819_v59, %v2818_v28 }
 0xa19   : > { %2926 = vst.msk [vmem:[%s5273_s13 + $0x8] sm:$0xff] %vm370_vm0, %v2888_v33 }
 0xa1a   : > { %3169 = vmatmul.msk.bf16.gmra.mxu0 %vm370_vm0, %v2829_v21 }
 0xa20   : > { %v2768_v16 = vpop.permute.xlu0 %2767 }
 0xa21   : > { %2804 = vst.msk [vmem:[#allocation2 + $0x60] sm:$0xff] %vm2791_vm4, %v2768_v16 }
 0xa28   : > { %v1588_v40 = vpop.permute.xlu0 %1587  ;;  %v2770_v18 = vpop.permute.xlu1 %2769  ;;  %v2820_v17 = vld [vmem:[#allocation2 + $0x60] sm:$0xff] }
 0xa29   : > { %1621 = vst.msk [vmem:[#allocation2 + $0x78] sm:$0xff] %vm1605_vm2, %v1588_v40 }
 0xa2a   : > { %2214 = vst.msk [vmem:[#allocation2 + $0x78] sm:$0xff] %vm2198_vm3, %v2181_v3 }
 0xa2b   : > { %2805 = vst.msk [vmem:[#allocation2 + $0x68] sm:$0xff] %vm2791_vm4, %v2770_v18 }
 0xa2e   : > { %v2890_v14 = vpop.f32.mrf.mxu0 }
 0xa2f   : > { %v2891_v0 = vadd.f32 %v5265_v62, %v2890_v14 }
 0xa30   : > { %v2179_v23 = vpop.permute.xlu1 %2178 }
 0xa31   : > { %2927 = vst.msk [vmem:[%s5273_s13 + $0x10] sm:$0xff] %vm370_vm0, %v2891_v0 }
 0xa32   : > { %2213 = vst.msk [vmem:[#allocation2 + $0x70] sm:$0xff] %vm2198_vm3, %v2179_v23  ;;  %v2821_v6 = vld [vmem:[#allocation2 + $0x68] sm:$0xff] }
 0xa33   : > { %v2830_v39 = vpack.c.bf16 %v2821_v6, %v2820_v17 }
 0xa35   : > { %3170 = vmatmul.msk.bf16.gmra.mxu0 %vm370_vm0, %v2830_v39 }
 0xa36   : > { %v2892_v45 = vpop.f32.mrf.mxu0 }
 0xa37   : > { %v2893_v27 = vadd.f32 %v5265_v62, %v2892_v45 }
 0xa39   : > { %2928 = vst.msk [vmem:[%s5273_s13 + $0x18] sm:$0xff] %vm370_vm0, %v2893_v27 }
 0xa3e   : > { %v2895_v41 = vpop.f32.mrf.mxu0 }
 0xa3f   : > { %v2896_v7 = vadd.f32 %v5265_v62, %v2895_v41 }
 0xa41   : > { %2929 = vst.msk [vmem:[%s5273_s13 + $0x20] sm:$0xff] %vm370_vm0, %v2896_v7 }
 0xa46   : > { %v2897_v42 = vpop.f32.mrf.mxu0 }
 0xa47   : > { %v2772_v10 = vpop.permute.xlu0 %2771  ;;  %v2898_v26 = vadd.f32 %v5265_v62, %v2897_v42 }
 0xa48   : > { %2806 = vst.msk [vmem:[#allocation2 + $0x70] sm:$0xff] %vm2791_vm4, %v2772_v10 }
 0xa49   : > { %2930 = vst.msk [vmem:[%s5273_s13 + $0x28] sm:$0xff] %vm370_vm0, %v2898_v26 }
 0xa4f   : > { %v2774_v57 = vpop.permute.xlu1 %2773  ;;  %v2822_v12 = vld [vmem:[#allocation2 + $0x70] sm:$0xff] }
 0xa50   : > { %2807 = vst.msk [vmem:[#allocation2 + $0x78] sm:$0xff] %vm2791_vm4, %v2774_v57 }
 0xa57   : > { %v2823_v58 = vld [vmem:[#allocation2 + $0x78] sm:$0xff] }
 0xa58   : > { %v2831_v25 = vpack.c.bf16 %v2823_v58, %v2822_v12 }
 0xa5a   : > { %3171 = vmatmul.msk.bf16.gmra.mxu0 %vm370_vm0, %v2831_v25 }
 0xa6e   : > { %v2900_v13 = vpop.f32.mrf.mxu0 }
 0xa6f   : > { %v2901_v43 = vadd.f32 %v5265_v62, %v2900_v13 }
 0xa71   : > { %2931 = vst.msk [vmem:[%s5273_s13 + $0x30] sm:$0xff] %vm370_vm0, %v2901_v43 }
 0xa76   : > { %v2902_v44 = vpop.f32.mrf.mxu0 }
 0xa77   : > { %v2903_v50 = vadd.f32 %v5265_v62, %v2902_v44 }
 0xa79   : > { %2932 = vst.msk [vmem:[%s5273_s13 + $0x38] sm:$0xff] %vm370_vm0, %v2903_v50 }
 0xa86   : > { %v2905_v11 = vpop.f32.mrf.mxu0 }
 0xa87   : > { %v2906_v29 = vadd.f32 %v5265_v62, %v2905_v11 }
 0xa89   : > { %2933 = vst.msk [vmem:[%s5273_s13 + $0x40] sm:$0xff] %vm370_vm0, %v2906_v29 }
 0xa8e   : > { %v2907_v31 = vpop.f32.mrf.mxu0 }
 0xa8f   : > { %v2908_v20 = vadd.f32 %v5265_v62, %v2907_v31 }
 0xa91   : > { %2934 = vst.msk [vmem:[%s5273_s13 + $0x48] sm:$0xff] %vm370_vm0, %v2908_v20 }
 0xa97   : > { %v2910_v9 = vpop.f32.mrf.mxu0 }
 0xa98   : > { %v2911_v47 = vadd.f32 %v5265_v62, %v2910_v9 }
 0xa9a   : > { %2935 = vst.msk [vmem:[%s5273_s13 + $0x50] sm:$0xff] %vm370_vm0, %v2911_v47 }
 0xa9f   : > { %v2912_v19 = vpop.f32.mrf.mxu0 }
 0xaa0   : > { %v2913_v2 = vadd.f32 %v5265_v62, %v2912_v19 }
 0xaa2   : > { %2936 = vst.msk [vmem:[%s5273_s13 + $0x58] sm:$0xff] %vm370_vm0, %v2913_v2 }
 0xab2   : > { %v2915_v53 = vpop.f32.mrf.mxu0 }
 0xab3   : > { %v2916_v5 = vadd.f32 %v5265_v62, %v2915_v53 }
 0xab5   : > { %2937 = vst.msk [vmem:[%s5273_s13 + $0x60] sm:$0xff] %vm370_vm0, %v2916_v5 }
 0xaba   : > { %v2917_v24 = vpop.f32.mrf.mxu0 }
 0xabb   : > { %v2918_v48 = vadd.f32 %v5265_v62, %v2917_v24 }
 0xabd   : > { %2938 = vst.msk [vmem:[%s5273_s13 + $0x68] sm:$0xff] %vm370_vm0, %v2918_v48 }
 0xad7   : > { %v2920_v49 = vpop.f32.mrf.mxu0 }
 0xad8   : > { %v2921_v1 = vadd.f32 %v5265_v62, %v2920_v49 }
 0xada   : > { %2939 = vst.msk [vmem:[%s5273_s13 + $0x70] sm:$0xff] %vm370_vm0, %v2921_v1 }
 0xadf   : > { %v2922_v15 = vpop.f32.mrf.mxu0 }
 0xae0   : > { %v2923_v37 = vadd.f32 %v5265_v62, %v2922_v15 }
 0xae2   : > { %2940 = vst.msk [vmem:[%s5273_s13 + $0x78] sm:$0xff] %vm370_vm0, %v2923_v37 }
 0xae3   : > { %3709 = shalt.err (!%p3706_p10)
}
 0xae4   : > { %s3779_s26 = smov 128  }
 0xae5   : > { %3206 = dma.vmem_to_hbm [thread:$0]  (%p3900_p3), %s2956_s18, 2048, %s2958_s7, %s2942_s16, %s3779_s26, %s3779_s26, %s3776_s27  }
 0xae6 PF: > { %s2972_s13 = sand.u32 1, %s3744_s21   ;;  %p5403_p12 = scmp.ge.s32.totalorder %s3756_s24, 2 }
 0xae7   : > { %s2973_s11 = scalar_lea.sflag [#allocation5], %s2972_s13 }
 0xae8   : > { %p3223_p13 = pnand %p5403_p12, %p3850_p6 }
 0xaea   : > { %p3224_p0 = pneg %p3223_p13 }
 0xaec   : > { %3739 = dma.done.wait (%p3224_p0), %s2973_s11, 2048  }
 0xaed   : > { %3741 = vsyncadd (%p3224_p0), %s2973_s11, 4294965248  ;;  %p21_p5 = scmp.ge.s32.totalorder %s3887_s10, 4   ;;  %s5404_s21 = smov %s3748_s22 }
 0xaee   : > { %s5405_s22 = smov %s3752_s23  ;;  %s5406_s23 = smov %s3896_s14 }
 0xaef   : > { %s5407_s24 = smov %s3887_s10  ;;  %23 = sbr.rel (!%p21_p5) target bundleno = 7 (0x7), region = 101 }
 0xaf4   :  { %2979 = vsyncpa [#allocation4], 1 }
 0xaf5   :  { %2981 = vsyncpa [#allocation4 + $0x1], 1 }
 0xaf6   :  { %2982 = vsyncpa [#allocation7], 1 }
 0xaf7   :  { %2983 = vsyncpa [#allocation10], 1 }
 0xaf8   :  { %2984 = vsyncpa [#allocation5], 1 }
 0xaf9   :  { %2986 = vsyncpa [#allocation5 + $0x1], 1 }

</bundles_post_ra>
